<compile_context>
chip_gen: v7x
topology: tpu7x:2x2x1
jax: 0.10.0
libtpu: 0.0.40
codegen_flags: <defaults>
</compile_context>

<pallas_src>
import functools

import jax
import jax.numpy as jnp
from jax.experimental import pallas as pl
from jax.experimental.pallas import tpu as pltpu


def _round_up(x, m):
    return (x + m - 1) // m * m


# ---------------------------------------------------------------------------
# Fused tiled GEMM kernel:  out = post_act( pre_act(A) @ B + bias )
# ---------------------------------------------------------------------------
def _gemm_kernel(a_ref, b_ref, bias_ref, o_ref, acc_ref, *, pre_act, post_act):
    k = pl.program_id(2)

    @pl.when(k == 0)
    def _():
        acc_ref[...] = jnp.zeros_like(acc_ref)

    a = a_ref[...]                      # bf16 tile
    if pre_act == "leaky_relu":         # element-wise, commutes with im2col/pad
        a = jnp.where(a >= 0, a, a * 0.2)
    elif pre_act == "relu":
        a = jnp.maximum(a, 0)

    acc_ref[...] += jnp.dot(a, b_ref[...], preferred_element_type=jnp.float32)

    @pl.when(k == pl.num_programs(2) - 1)
    def _():
        y = acc_ref[...] + bias_ref[...]
        if post_act == "tanh":
            y = jnp.tanh(y)
        elif post_act == "relu":
            y = jnp.maximum(y, 0.0)
        elif post_act == "leaky_relu":
            y = jnp.where(y >= 0, y, 0.2 * y)
        o_ref[...] = y


def fused_gemm(a, b, bias, pre_act=None, post_act=None):
    """(M,K) @ (K,N) + bias(N,), bf16 MXU operands, f32 accumulate, fused epilogue."""
    M, K = a.shape
    K2, N = b.shape
    assert K == K2

    tm = min(256, _round_up(M, 8))
    tn = min(256, _round_up(N, 128))
    tk = min(512, _round_up(K, 128))
    Mp, Kp, Np = _round_up(M, tm), _round_up(K, tk), _round_up(N, tn)

    a_p = a.astype(jnp.bfloat16)
    if (Mp, Kp) != (M, K):
        a_p = jnp.pad(a_p, ((0, Mp - M), (0, Kp - K)))
    b_p = b.astype(jnp.bfloat16)
    if (Kp, Np) != (K, N):
        b_p = jnp.pad(b_p, ((0, Kp - K), (0, Np - N)))
    bias_p = bias.astype(jnp.float32)
    if Np != N:
        bias_p = jnp.pad(bias_p, ((0, Np - N),))
    bias_p = bias_p.reshape(1, Np)

    grid = (Mp // tm, Np // tn, Kp // tk)
    out = pl.pallas_call(
        functools.partial(_gemm_kernel, pre_act=pre_act, post_act=post_act),
        out_shape=jax.ShapeDtypeStruct((Mp, Np), jnp.float32),
        grid=grid,
        in_specs=[
            pl.BlockSpec((tm, tk), lambda i, j, k: (i, k)),
            pl.BlockSpec((tk, tn), lambda i, j, k: (k, j)),
            pl.BlockSpec((1, tn), lambda i, j, k: (0, j)),
        ],
        out_specs=pl.BlockSpec((tm, tn), lambda i, j, k: (i, j)),
        scratch_shapes=[pltpu.VMEM((tm, tn), jnp.float32)],
        compiler_params=pltpu.CompilerParams(
            dimension_semantics=("parallel", "parallel", "arbitrary")),
    )(a_p, b_p, bias_p)

    if (Mp, Np) != (M, N):
        out = out[:M, :N]
    return out


# ---------------------------------------------------------------------------
# BatchNorm2d (training mode: biased batch statistics, eps=1e-5), two passes.
# ---------------------------------------------------------------------------
def _bn_stats_kernel(x_ref, s_ref):
    @pl.when(pl.program_id(0) == 0)
    def _():
        s_ref[...] = jnp.zeros_like(s_ref)
    x = x_ref[...]
    s_ref[...] += jnp.concatenate(
        [jnp.sum(x, axis=0, keepdims=True),
         jnp.sum(x * x, axis=0, keepdims=True)], axis=0)


def _bn_apply_kernel(x_ref, s_ref, g_ref, b_ref, o_ref, *, inv_count):
    x = x_ref[...]
    s = s_ref[...]
    mean = s[0:1, :] * inv_count
    var = s[1:2, :] * inv_count - mean * mean
    inv = jax.lax.rsqrt(var + 1e-5)
    o_ref[...] = (x - mean) * (inv * g_ref[...]) + b_ref[...]


def pallas_batchnorm(x, gamma, beta):
    """x: NHWC float32. Tiled over M with a resident (2, C) stats accumulator."""
    N, H, W, C = x.shape
    M = N * H * W
    Cp = _round_up(C, 128)
    tm = min(512, _round_up(M, 8))
    Mp = _round_up(M, tm)

    x2 = x.reshape(M, C).astype(jnp.float32)
    if (Mp, Cp) != (M, C):
        x2 = jnp.pad(x2, ((0, Mp - M), (0, Cp - C)))     # zero rows don't affect stats
    g2 = jnp.pad(gamma.astype(jnp.float32), ((0, Cp - C),)).reshape(1, Cp)
    b2 = jnp.pad(beta.astype(jnp.float32), ((0, Cp - C),)).reshape(1, Cp)

    grid = (Mp // tm,)
    stats = pl.pallas_call(
        _bn_stats_kernel,
        out_shape=jax.ShapeDtypeStruct((2, Cp), jnp.float32),
        grid=grid,
        in_specs=[pl.BlockSpec((tm, Cp), lambda i: (i, 0))],
        out_specs=pl.BlockSpec((2, Cp), lambda i: (0, 0)),
        compiler_params=pltpu.CompilerParams(dimension_semantics=("arbitrary",)),
    )(x2)

    y = pl.pallas_call(
        functools.partial(_bn_apply_kernel, inv_count=1.0 / M),
        out_shape=jax.ShapeDtypeStruct((Mp, Cp), jnp.float32),
        grid=grid,
        in_specs=[
            pl.BlockSpec((tm, Cp), lambda i: (i, 0)),
            pl.BlockSpec((2, Cp), lambda i: (0, 0)),
            pl.BlockSpec((1, Cp), lambda i: (0, 0)),
            pl.BlockSpec((1, Cp), lambda i: (0, 0)),
        ],
        out_specs=pl.BlockSpec((tm, Cp), lambda i: (i, 0)),
        compiler_params=pltpu.CompilerParams(dimension_semantics=("parallel",)),
    )(x2, stats, g2, b2)

    if (Mp, Cp) != (M, C):
        y = y[:M, :C]
    return y.reshape(N, H, W, C)


# ---------------------------------------------------------------------------
# Conv2d(4,2,1) via space-to-depth + 2x2 stride-1 conv  (im2col only 4x, bf16)
# ---------------------------------------------------------------------------
def conv2d_s2_k4(x, w, bias=None, pre_act=None, post_act=None):
    """x NHWC, w (C_out, C_in, 4, 4). Optional fused pre/post activation."""
    N, H, W, C = x.shape
    C_out = w.shape[0]
    Ho, Wo = H // 2, W // 2

    xb = x.astype(jnp.bfloat16)
    xp = jnp.pad(xb, ((0, 0), (1, 1), (1, 1), (0, 0)))
    Hs, Ws = (H + 2) // 2, (W + 2) // 2
    # space-to-depth: channel order (dy, dx, c)
    xs = xp.reshape(N, Hs, 2, Ws, 2, C).transpose(0, 1, 3, 2, 4, 5)
    xs = xs.reshape(N, Hs, Ws, 4 * C)
    # 2x2 stride-1 valid conv taps, tap order (bh, bw)
    taps = [xs[:, bh:bh + Ho, bw:bw + Wo, :] for bh in range(2) for bw in range(2)]
    patches = jnp.stack(taps, axis=3).reshape(N * Ho * Wo, 16 * C)

    # weight rows ordered (bh, bw, dy, dx, c):  kh = 2*bh+dy, kw = 2*bw+dx
    wr = w.reshape(C_out, C, 2, 2, 2, 2)                  # (co, c, bh, dy, bw, dx)
    w2 = wr.transpose(2, 4, 3, 5, 1, 0).reshape(16 * C, C_out)

    if bias is None:
        bias = jnp.zeros((C_out,), jnp.float32)
    y = fused_gemm(patches, w2, bias, pre_act=pre_act, post_act=post_act)
    return y.reshape(N, Ho, Wo, C_out)


# ---------------------------------------------------------------------------
# ConvTranspose2d(4,2,1) via 3x3 stride-1 conv to 4*C_out phases + depth-to-space
# ---------------------------------------------------------------------------
_KSEL = [[3, 1, None],   # output parity 0: tap ty=0 -> ky=3, ty=1 -> ky=1
         [None, 2, 0]]   # output parity 1: tap ty=1 -> ky=2, ty=2 -> ky=0


def _deconv_weight_gemm(wt):
    """wt (C_in, C_out, 4, 4) -> (9*C_in, 4*C_out); rows (ty,tx,ci), cols (pr,pc,co)."""
    C_in, C_out = wt.shape[0], wt.shape[1]
    w2 = jnp.zeros((3, 3, C_in, 2, 2, C_out), jnp.float32)
    for pr in range(2):
        for pc in range(2):
            for ty in range(3):
                for tx in range(3):
                    ky, kx = _KSEL[pr][ty], _KSEL[pc][tx]
                    if ky is None or kx is None:
                        continue
                    w2 = w2.at[ty, tx, :, pr, pc, :].set(wt[:, :, ky, kx])
    return w2.reshape(9 * C_in, 4 * C_out)


def conv_transpose2d_s2_k4(x, wt, bias=None, pre_act=None, post_act=None):
    """x NHWC, wt (C_in, C_out, 4, 4). Output (N, 2H, 2W, C_out)."""
    N, H, W, C_in = x.shape
    C_out = wt.shape[1]

    xb = x.astype(jnp.bfloat16)
    xp = jnp.pad(xb, ((0, 0), (1, 1), (1, 1), (0, 0)))
    taps = [xp[:, ty:ty + H, tx:tx + W, :] for ty in range(3) for tx in range(3)]
    patches = jnp.stack(taps, axis=3).reshape(N * H * W, 9 * C_in)

    w2 = _deconv_weight_gemm(wt)
    if bias is None:
        bias_full = jnp.zeros((4 * C_out,), jnp.float32)
    else:
        bias_full = jnp.tile(bias.astype(jnp.float32), 4)

    y = fused_gemm(patches, w2, bias_full, pre_act=pre_act, post_act=post_act)
    # depth-to-space: columns ordered (pr, pc, co)
    y = y.reshape(N, H, W, 2, 2, C_out).transpose(0, 1, 3, 2, 4, 5)
    return y.reshape(N, 2 * H, 2 * W, C_out)


# ---------------------------------------------------------------------------
# UnetSkipConnectionBlock / UnetGenerator (parameters + apply)
# ---------------------------------------------------------------------------
def build_block(key, outer_nc, inner_nc, input_nc=None, submodule=None,
                outermost=False, innermost=False):
    if input_nc is None:
        input_nc = outer_nc
    k = jax.random.split(key, 3)
    p = {}
    # Conv2d(input_nc, inner_nc, 4, 2, 1, bias=False)  [BatchNorm2d -> use_bias=False]
    p["downconv_w"] = 0.02 * jax.random.normal(k[0], (inner_nc, input_nc, 4, 4), jnp.float32)
    if outermost:
        # ConvTranspose2d(inner_nc*2, outer_nc, 4, 2, 1)  (bias=True)
        p["upconv_w"] = 0.02 * jax.random.normal(k[1], (inner_nc * 2, outer_nc, 4, 4), jnp.float32)
        p["upconv_b"] = 0.02 * jax.random.normal(k[2], (outer_nc,), jnp.float32)
    elif innermost:
        # ConvTranspose2d(inner_nc, outer_nc, 4, 2, 1, bias=False) + BN(outer_nc)
        p["upconv_w"] = 0.02 * jax.random.normal(k[1], (inner_nc, outer_nc, 4, 4), jnp.float32)
        p["upnorm_g"] = jnp.ones((outer_nc,), jnp.float32)
        p["upnorm_b"] = jnp.zeros((outer_nc,), jnp.float32)
    else:
        p["downnorm_g"] = jnp.ones((inner_nc,), jnp.float32)
        p["downnorm_b"] = jnp.zeros((inner_nc,), jnp.float32)
        p["upconv_w"] = 0.02 * jax.random.normal(k[1], (inner_nc * 2, outer_nc, 4, 4), jnp.float32)
        p["upnorm_g"] = jnp.ones((outer_nc,), jnp.float32)
        p["upnorm_b"] = jnp.zeros((outer_nc,), jnp.float32)
    return {"outermost": outermost, "innermost": innermost,
            "submodule": submodule, "params": p}


def apply_block(blk, x):
    """x: NHWC. Mirrors UnetSkipConnectionBlock.forward (cat([x, model(x)], C)).

    All LeakyReLU/ReLU/Tanh are fused into the neighbouring conv GEMM epilogue.
    """
    p = blk["params"]
    if blk["outermost"]:
        h = conv2d_s2_k4(x, p["downconv_w"])                              # downconv
        h = apply_block(blk["submodule"], h)                              # submodule
        h = conv_transpose2d_s2_k4(h, p["upconv_w"], p["upconv_b"],
                                   pre_act="relu", post_act="tanh")       # uprelu+upconv+Tanh
        return h
    elif blk["innermost"]:
        h = conv2d_s2_k4(x, p["downconv_w"],
                         pre_act="leaky_relu", post_act="relu")           # downrelu+downconv+uprelu
        h = conv_transpose2d_s2_k4(h, p["upconv_w"])                      # upconv
        h = pallas_batchnorm(h, p["upnorm_g"], p["upnorm_b"])             # upnorm
        return jnp.concatenate([x, h], axis=-1)
    else:
        h = conv2d_s2_k4(x, p["downconv_w"], pre_act="leaky_relu")        # downrelu+downconv
        h = pallas_batchnorm(h, p["downnorm_g"], p["downnorm_b"])         # downnorm
        h = apply_block(blk["submodule"], h)                              # submodule
        h = conv_transpose2d_s2_k4(h, p["upconv_w"], pre_act="relu")      # uprelu+upconv
        h = pallas_batchnorm(h, p["upnorm_g"], p["upnorm_b"])             # upnorm
        # TODO(synk): Dropout(0.5) not implemented (use_dropout=False here).
        return jnp.concatenate([x, h], axis=-1)


def build_unet_generator(key, input_nc, output_nc, num_downs, ngf=64):
    keys = iter(jax.random.split(key, num_downs + 1))
    block = build_block(next(keys), ngf * 8, ngf * 8, innermost=True)
    for _ in range(num_downs - 5):
        block = build_block(next(keys), ngf * 8, ngf * 8, submodule=block)
    block = build_block(next(keys), ngf * 4, ngf * 8, submodule=block)
    block = build_block(next(keys), ngf * 2, ngf * 4, submodule=block)
    block = build_block(next(keys), ngf, ngf * 2, submodule=block)
    block = build_block(next(keys), output_nc, ngf, input_nc=input_nc,
                        submodule=block, outermost=True)
    return block


def unet_forward(block, x_nchw):
    x = jnp.transpose(x_nchw, (0, 2, 3, 1)).astype(jnp.float32)  # NCHW -> NHWC
    y = apply_block(block, x)
    return jnp.transpose(y, (0, 3, 1, 2))                        # NHWC -> NCHW


# ---------------------------------------------------------------------------
if __name__ == "__main__":
    key = jax.random.PRNGKey(0)
    kp, kx = jax.random.split(key)

    # Small config: num_downs=5 requires spatial >= 2^5 = 32.
    input_nc, output_nc, num_downs, ngf = 3, 3, 5, 8
    N, H, W = 2, 32, 32

    net = build_unet_generator(kp, input_nc, output_nc, num_downs, ngf)
    x = jax.random.normal(kx, (N, input_nc, H, W), jnp.float32)

    fwd = jax.jit(lambda xx: unet_forward(net, xx))
    y = jax.block_until_ready(fwd(x))
    assert y.shape == (N, output_nc, H, W), y.shape
    assert bool(jnp.all(jnp.isfinite(y)))
    print("KERNEL_OK")
</pallas_src>

<mosaic_0001>
module attributes {stable_mosaic.version = 11 : i64} {
  func.func @_gemm_kernel(%arg0: i32, %arg1: i32, %arg2: i32, %arg3: memref<256x128xbf16, #tpu.memory_space<vmem>>, %arg4: memref<128x128xbf16, #tpu.memory_space<vmem>>, %arg5: memref<1x128xf32, #tpu.memory_space<vmem>>, %arg6: memref<256x128xf32, #tpu.memory_space<vmem>>, %arg7: memref<256x128xf32, #tpu.memory_space<vmem>>) attributes {dimension_semantics = [#tpu.dimension_semantics<parallel>, #tpu.dimension_semantics<parallel>, #tpu.dimension_semantics<arbitrary>], iteration_bounds = array<i64: 2, 1, 1>, scalar_prefetch = 0 : i64, scratch_operands = 1 : i64, tpu.core_type = #tpu.core_type<tc>, window_params = [{transform_indices = @transform_0, window_bounds = array<i64: 256, 128>}, {transform_indices = @transform_1, window_bounds = array<i64: 128, 128>}, {transform_indices = @transform_2, window_bounds = array<i64: 1, 128>}, {transform_indices = @transform_3, window_bounds = array<i64: 256, 128>}]} {
    %c0_i32 = arith.constant 0 : i32
    %0 = arith.cmpi eq, %arg2, %c0_i32 : i32
    %1 = arith.extui %0 : i1 to i32
    %c0_i32_0 = arith.constant 0 : i32
    %2 = arith.cmpi ne, %1, %c0_i32_0 : i32
    scf.if %2 {
      %cst_10 = arith.constant 0.000000e+00 : f32
      %12 = vector.broadcast %cst_10 : f32 to vector<256x128xf32>
      %c0_11 = arith.constant 0 : index
      %c0_12 = arith.constant 0 : index
      %13 = vector.load %arg7[%c0_11, %c0_12] : memref<256x128xf32, #tpu.memory_space<vmem>>, vector<256x128xf32>
      tpu.vector_store %arg7[%c0_11, %c0_12], %12 {strides = array<i32>} : memref<256x128xf32, #tpu.memory_space<vmem>>, vector<256x128xf32>,
    } else {
    }
    %c0 = arith.constant 0 : index
    %c0_1 = arith.constant 0 : index
    %3 = vector.load %arg3[%c0, %c0_1] : memref<256x128xbf16, #tpu.memory_space<vmem>>, vector<256x128xbf16>
    %c0_2 = arith.constant 0 : index
    %c0_3 = arith.constant 0 : index
    %4 = vector.load %arg7[%c0_2, %c0_3] : memref<256x128xf32, #tpu.memory_space<vmem>>, vector<256x128xf32>
    %c0_4 = arith.constant 0 : index
    %c0_5 = arith.constant 0 : index
    %5 = vector.load %arg4[%c0_4, %c0_5] : memref<128x128xbf16, #tpu.memory_space<vmem>>, vector<128x128xbf16>
    %cst = arith.constant dense<0.000000e+00> : vector<256x128xf32>
    %6 = tpu.matmul %3, %5, %cst {dimension_numbers = #tpu.dot_dimension_numbers<[1], [0], [0], [1], [0, 0, 1, 1], [], []>} : vector<256x128xbf16>, vector<128x128xbf16>, vector<256x128xf32> -> vector<256x128xf32>
    %7 = arith.addf %4, %6 : vector<256x128xf32>
    %c0_6 = arith.constant 0 : index
    %c0_7 = arith.constant 0 : index
    %8 = vector.load %arg7[%c0_6, %c0_7] : memref<256x128xf32, #tpu.memory_space<vmem>>, vector<256x128xf32>
    tpu.vector_store %arg7[%c0_6, %c0_7], %7 {strides = array<i32>} : memref<256x128xf32, #tpu.memory_space<vmem>>, vector<256x128xf32>,
    %c0_i32_8 = arith.constant 0 : i32
    %9 = arith.cmpi eq, %arg2, %c0_i32_8 : i32
    %10 = arith.extui %9 : i1 to i32
    %c0_i32_9 = arith.constant 0 : i32
    %11 = arith.cmpi ne, %10, %c0_i32_9 : i32
    scf.if %11 {
      %c0_10 = arith.constant 0 : index
      %c0_11 = arith.constant 0 : index
      %12 = vector.load %arg7[%c0_10, %c0_11] : memref<256x128xf32, #tpu.memory_space<vmem>>, vector<256x128xf32>
      %c0_12 = arith.constant 0 : index
      %c0_13 = arith.constant 0 : index
      %13 = vector.load %arg5[%c0_12, %c0_13] : memref<1x128xf32, #tpu.memory_space<vmem>>, vector<1x128xf32>
      %14 = vector.broadcast %13 : vector<1x128xf32> to vector<256x128xf32>
      %15 = arith.addf %12, %14 : vector<256x128xf32>
      %c0_14 = arith.constant 0 : index
      %c0_15 = arith.constant 0 : index
      %16 = vector.load %arg6[%c0_14, %c0_15] : memref<256x128xf32, #tpu.memory_space<vmem>>, vector<256x128xf32>
      tpu.vector_store %arg6[%c0_14, %c0_15], %15 {strides = array<i32>} : memref<256x128xf32, #tpu.memory_space<vmem>>, vector<256x128xf32>,
    } else {
    }
    return
  }
  func.func @transform_0(%arg0: i32, %arg1: i32, %arg2: i32) -> (i32, i32) {
    %c0_i32 = arith.constant 0 : i32
    return %arg0, %arg2 : i32, i32
  }
  func.func @transform_1(%arg0: i32, %arg1: i32, %arg2: i32) -> (i32, i32) {
    %c0_i32 = arith.constant 0 : i32
    return %arg2, %arg1 : i32, i32
  }
  func.func @transform_2(%arg0: i32, %arg1: i32, %arg2: i32) -> (i32, i32) {
    %c0_i32 = arith.constant 0 : i32
    %c0_i32_0 = arith.constant 0 : i32
    return %c0_i32, %arg1 : i32, i32
  }
  func.func @transform_3(%arg0: i32, %arg1: i32, %arg2: i32) -> (i32, i32) {
    %c0_i32 = arith.constant 0 : i32
    return %arg0, %arg1 : i32, i32
  }
}

module attributes {stable_mosaic.version = 11 : i64} {
  func.func @_gemm_kernel(%arg0: i32, %arg1: i32, %arg2: i32, %arg3: memref<128x128xbf16, #tpu.memory_space<vmem>>, %arg4: memref<128x128xbf16, #tpu.memory_space<vmem>>, %arg5: memref<1x128xf32, #tpu.memory_space<vmem>>, %arg6: memref<128x128xf32, #tpu.memory_space<vmem>>, %arg7: memref<128x128xf32, #tpu.memory_space<vmem>>) attributes {dimension_semantics = [#tpu.dimension_semantics<parallel>, #tpu.dimension_semantics<parallel>, #tpu.dimension_semantics<arbitrary>], iteration_bounds = array<i64: 1, 1, 1>, scalar_prefetch = 0 : i64, scratch_operands = 1 : i64, tpu.core_type = #tpu.core_type<tc>, window_params = [{transform_indices = @transform_0, window_bounds = array<i64: 128, 128>}, {transform_indices = @transform_1, window_bounds = array<i64: 128, 128>}, {transform_indices = @transform_2, window_bounds = array<i64: 1, 128>}, {transform_indices = @transform_3, window_bounds = array<i64: 128, 128>}]} {
    %c0_i32 = arith.constant 0 : i32
    %0 = arith.cmpi eq, %arg2, %c0_i32 : i32
    %1 = arith.extui %0 : i1 to i32
    %c0_i32_0 = arith.constant 0 : i32
    %2 = arith.cmpi ne, %1, %c0_i32_0 : i32
    scf.if %2 {
      %cst_12 = arith.constant 0.000000e+00 : f32
      %17 = vector.broadcast %cst_12 : f32 to vector<128x128xf32>
      %c0_13 = arith.constant 0 : index
      %c0_14 = arith.constant 0 : index
      %18 = vector.load %arg7[%c0_13, %c0_14] : memref<128x128xf32, #tpu.memory_space<vmem>>, vector<128x128xf32>
      tpu.vector_store %arg7[%c0_13, %c0_14], %17 {strides = array<i32>} : memref<128x128xf32, #tpu.memory_space<vmem>>, vector<128x128xf32>,
    } else {
    }
    %c0 = arith.constant 0 : index
    %c0_1 = arith.constant 0 : index
    %3 = vector.load %arg3[%c0, %c0_1] : memref<128x128xbf16, #tpu.memory_space<vmem>>, vector<128x128xbf16>
    %cst = arith.constant 0.000000e+00 : bf16
    %4 = vector.broadcast %cst : bf16 to vector<128x128xbf16>
    %5 = arith.cmpf oge, %3, %4 : vector<128x128xbf16>
    %cst_2 = arith.constant 2.001950e-01 : bf16
    %6 = vector.broadcast %cst_2 : bf16 to vector<128x128xbf16>
    %7 = arith.mulf %3, %6 : vector<128x128xbf16>
    %8 = arith.select %5, %3, %7 : vector<128x128xi1>, vector<128x128xbf16>
    %c0_3 = arith.constant 0 : index
    %c0_4 = arith.constant 0 : index
    %9 = vector.load %arg7[%c0_3, %c0_4] : memref<128x128xf32, #tpu.memory_space<vmem>>, vector<128x128xf32>
    %c0_5 = arith.constant 0 : index
    %c0_6 = arith.constant 0 : index
    %10 = vector.load %arg4[%c0_5, %c0_6] : memref<128x128xbf16, #tpu.memory_space<vmem>>, vector<128x128xbf16>
    %cst_7 = arith.constant dense<0.000000e+00> : vector<128x128xf32>
    %11 = tpu.matmul %8, %10, %cst_7 {dimension_numbers = #tpu.dot_dimension_numbers<[1], [0], [0], [1], [0, 0, 1, 1], [], []>} : vector<128x128xbf16>, vector<128x128xbf16>, vector<128x128xf32> -> vector<128x128xf32>
    %12 = arith.addf %9, %11 : vector<128x128xf32>
    %c0_8 = arith.constant 0 : index
    %c0_9 = arith.constant 0 : index
    %13 = vector.load %arg7[%c0_8, %c0_9] : memref<128x128xf32, #tpu.memory_space<vmem>>, vector<128x128xf32>
    tpu.vector_store %arg7[%c0_8, %c0_9], %12 {strides = array<i32>} : memref<128x128xf32, #tpu.memory_space<vmem>>, vector<128x128xf32>,
    %c0_i32_10 = arith.constant 0 : i32
    %14 = arith.cmpi eq, %arg2, %c0_i32_10 : i32
    %15 = arith.extui %14 : i1 to i32
    %c0_i32_11 = arith.constant 0 : i32
    %16 = arith.cmpi ne, %15, %c0_i32_11 : i32
    scf.if %16 {
      %c0_12 = arith.constant 0 : index
      %c0_13 = arith.constant 0 : index
      %17 = vector.load %arg7[%c0_12, %c0_13] : memref<128x128xf32, #tpu.memory_space<vmem>>, vector<128x128xf32>
      %c0_14 = arith.constant 0 : index
      %c0_15 = arith.constant 0 : index
      %18 = vector.load %arg5[%c0_14, %c0_15] : memref<1x128xf32, #tpu.memory_space<vmem>>, vector<1x128xf32>
      %19 = vector.broadcast %18 : vector<1x128xf32> to vector<128x128xf32>
      %20 = arith.addf %17, %19 : vector<128x128xf32>
      %c0_16 = arith.constant 0 : index
      %c0_17 = arith.constant 0 : index
      %21 = vector.load %arg6[%c0_16, %c0_17] : memref<128x128xf32, #tpu.memory_space<vmem>>, vector<128x128xf32>
      tpu.vector_store %arg6[%c0_16, %c0_17], %20 {strides = array<i32>} : memref<128x128xf32, #tpu.memory_space<vmem>>, vector<128x128xf32>,
    } else {
    }
    return
  }
  func.func @transform_0(%arg0: i32, %arg1: i32, %arg2: i32) -> (i32, i32) {
    %c0_i32 = arith.constant 0 : i32
    return %arg0, %arg2 : i32, i32
  }
  func.func @transform_1(%arg0: i32, %arg1: i32, %arg2: i32) -> (i32, i32) {
    %c0_i32 = arith.constant 0 : i32
    return %arg2, %arg1 : i32, i32
  }
  func.func @transform_2(%arg0: i32, %arg1: i32, %arg2: i32) -> (i32, i32) {
    %c0_i32 = arith.constant 0 : i32
    %c0_i32_0 = arith.constant 0 : i32
    return %c0_i32, %arg1 : i32, i32
  }
  func.func @transform_3(%arg0: i32, %arg1: i32, %arg2: i32) -> (i32, i32) {
    %c0_i32 = arith.constant 0 : i32
    return %arg0, %arg1 : i32, i32
  }
}

module attributes {stable_mosaic.version = 11 : i64} {
  func.func @_bn_stats_kernel(%arg0: i32, %arg1: memref<128x128xf32, #tpu.memory_space<vmem>>, %arg2: memref<2x128xf32, #tpu.memory_space<vmem>>) attributes {dimension_semantics = [#tpu.dimension_semantics<arbitrary>], iteration_bounds = array<i64: 1>, scalar_prefetch = 0 : i64, scratch_operands = 0 : i64, tpu.core_type = #tpu.core_type<tc>, window_params = [{transform_indices = @transform_0, window_bounds = array<i64: 128, 128>}, {pipeline_mode = #tpu.pipeline_mode<synchronous>, transform_indices = @transform_1, window_bounds = array<i64: 2, 128>}]} {
    %c0_i32 = arith.constant 0 : i32
    %0 = arith.cmpi eq, %arg0, %c0_i32 : i32
    %1 = arith.extui %0 : i1 to i32
    %c0_i32_0 = arith.constant 0 : i32
    %2 = arith.cmpi ne, %1, %c0_i32_0 : i32
    scf.if %2 {
      %cst_7 = arith.constant 0.000000e+00 : f32
      %13 = vector.broadcast %cst_7 : f32 to vector<2x128xf32>
      %c0_8 = arith.constant 0 : index
      %c0_9 = arith.constant 0 : index
      %14 = vector.load %arg2[%c0_8, %c0_9] : memref<2x128xf32, #tpu.memory_space<vmem>>, vector<2x128xf32>
      tpu.vector_store %arg2[%c0_8, %c0_9], %13 {strides = array<i32>} : memref<2x128xf32, #tpu.memory_space<vmem>>, vector<2x128xf32>,
    } else {
    }
    %c0 = arith.constant 0 : index
    %c0_1 = arith.constant 0 : index
    %3 = vector.load %arg1[%c0, %c0_1] : memref<128x128xf32, #tpu.memory_space<vmem>>, vector<128x128xf32>
    %c0_2 = arith.constant 0 : index
    %c0_3 = arith.constant 0 : index
    %4 = vector.load %arg2[%c0_2, %c0_3] : memref<2x128xf32, #tpu.memory_space<vmem>>, vector<2x128xf32>
    %cst = arith.constant dense<0.000000e+00> : vector<128xf32>
    %5 = vector.multi_reduction <add>, %3, %cst [0] : vector<128x128xf32> to vector<128xf32>
    %6 = vector.shape_cast %5 : vector<128xf32> to vector<1x128xf32>
    %7 = arith.mulf %3, %3 : vector<128x128xf32>
    %cst_4 = arith.constant dense<0.000000e+00> : vector<128xf32>
    %8 = vector.multi_reduction <add>, %7, %cst_4 [0] : vector<128x128xf32> to vector<128xf32>
    %9 = vector.shape_cast %8 : vector<128xf32> to vector<1x128xf32>
    %10 = tpu.concatenate %6, %9 in 0 : vector<1x128xf32>, vector<1x128xf32> -> vector<2x128xf32>
    %11 = arith.addf %4, %10 : vector<2x128xf32>
    %c0_5 = arith.constant 0 : index
    %c0_6 = arith.constant 0 : index
    %12 = vector.load %arg2[%c0_5, %c0_6] : memref<2x128xf32, #tpu.memory_space<vmem>>, vector<2x128xf32>
    tpu.vector_store %arg2[%c0_5, %c0_6], %11 {strides = array<i32>} : memref<2x128xf32, #tpu.memory_space<vmem>>, vector<2x128xf32>,
    return
  }
  func.func @transform_0(%arg0: i32) -> (i32, i32) {
    %c0_i32 = arith.constant 0 : i32
    %c0_i32_0 = arith.constant 0 : i32
    return %arg0, %c0_i32 : i32, i32
  }
  func.func @transform_1(%arg0: i32) -> (i32, i32) {
    %c0_i32 = arith.constant 0 : i32
    %c0_i32_0 = arith.constant 0 : i32
    %c0_i32_1 = arith.constant 0 : i32
    return %c0_i32, %c0_i32_0 : i32, i32
  }
}

module attributes {stable_mosaic.version = 11 : i64} {
  func.func @_bn_apply_kernel(%arg0: i32, %arg1: memref<128x128xf32, #tpu.memory_space<vmem>>, %arg2: memref<2x128xf32, #tpu.memory_space<vmem>>, %arg3: memref<1x128xf32, #tpu.memory_space<vmem>>, %arg4: memref<1x128xf32, #tpu.memory_space<vmem>>, %arg5: memref<128x128xf32, #tpu.memory_space<vmem>>) attributes {dimension_semantics = [#tpu.dimension_semantics<parallel>], iteration_bounds = array<i64: 1>, scalar_prefetch = 0 : i64, scratch_operands = 0 : i64, tpu.core_type = #tpu.core_type<tc>, window_params = [{transform_indices = @transform_0, window_bounds = array<i64: 128, 128>}, {pipeline_mode = #tpu.pipeline_mode<synchronous>, transform_indices = @transform_1, window_bounds = array<i64: 2, 128>}, {pipeline_mode = #tpu.pipeline_mode<synchronous>, transform_indices = @transform_2, window_bounds = array<i64: 1, 128>}, {pipeline_mode = #tpu.pipeline_mode<synchronous>, transform_indices = @transform_3, window_bounds = array<i64: 1, 128>}, {transform_indices = @transform_4, window_bounds = array<i64: 128, 128>}]} {
    %c0 = arith.constant 0 : index
    %c0_0 = arith.constant 0 : index
    %0 = vector.load %arg1[%c0, %c0_0] : memref<128x128xf32, #tpu.memory_space<vmem>>, vector<128x128xf32>
    %c0_1 = arith.constant 0 : index
    %c0_2 = arith.constant 0 : index
    %1 = vector.load %arg2[%c0_1, %c0_2] : memref<2x128xf32, #tpu.memory_space<vmem>>, vector<2x128xf32>
    %2 = vector.extract_strided_slice %1 {offsets = [0, 0], sizes = [1, 128], strides = [1, 1]} : vector<2x128xf32> to vector<1x128xf32>
    %cst = arith.constant 7.812500e-03 : f32
    %3 = vector.broadcast %cst : f32 to vector<1x128xf32>
    %4 = arith.mulf %2, %3 : vector<1x128xf32>
    %5 = vector.extract_strided_slice %1 {offsets = [1, 0], sizes = [1, 128], strides = [1, 1]} : vector<2x128xf32> to vector<1x128xf32>
    %cst_3 = arith.constant 7.812500e-03 : f32
    %6 = vector.broadcast %cst_3 : f32 to vector<1x128xf32>
    %7 = arith.mulf %5, %6 : vector<1x128xf32>
    %8 = arith.mulf %4, %4 : vector<1x128xf32>
    %9 = arith.subf %7, %8 : vector<1x128xf32>
    %cst_4 = arith.constant 9.99999974E-6 : f32
    %10 = vector.broadcast %cst_4 : f32 to vector<1x128xf32>
    %11 = arith.addf %9, %10 : vector<1x128xf32>
    %12 = math.rsqrt %11 : vector<1x128xf32>
    %13 = vector.broadcast %4 : vector<1x128xf32> to vector<128x128xf32>
    %14 = arith.subf %0, %13 : vector<128x128xf32>
    %c0_5 = arith.constant 0 : index
    %c0_6 = arith.constant 0 : index
    %15 = vector.load %arg3[%c0_5, %c0_6] : memref<1x128xf32, #tpu.memory_space<vmem>>, vector<1x128xf32>
    %16 = arith.mulf %12, %15 : vector<1x128xf32>
    %17 = vector.broadcast %16 : vector<1x128xf32> to vector<128x128xf32>
    %18 = arith.mulf %14, %17 : vector<128x128xf32>
    %c0_7 = arith.constant 0 : index
    %c0_8 = arith.constant 0 : index
    %19 = vector.load %arg4[%c0_7, %c0_8] : memref<1x128xf32, #tpu.memory_space<vmem>>, vector<1x128xf32>
    %20 = vector.broadcast %19 : vector<1x128xf32> to vector<128x128xf32>
    %21 = arith.addf %18, %20 : vector<128x128xf32>
    %c0_9 = arith.constant 0 : index
    %c0_10 = arith.constant 0 : index
    %22 = vector.load %arg5[%c0_9, %c0_10] : memref<128x128xf32, #tpu.memory_space<vmem>>, vector<128x128xf32>
    tpu.vector_store %arg5[%c0_9, %c0_10], %21 {strides = array<i32>} : memref<128x128xf32, #tpu.memory_space<vmem>>, vector<128x128xf32>,
    return
  }
  func.func @transform_0(%arg0: i32) -> (i32, i32) {
    %c0_i32 = arith.constant 0 : i32
    %c0_i32_0 = arith.constant 0 : i32
    return %arg0, %c0_i32 : i32, i32
  }
  func.func @transform_1(%arg0: i32) -> (i32, i32) {
    %c0_i32 = arith.constant 0 : i32
    %c0_i32_0 = arith.constant 0 : i32
    %c0_i32_1 = arith.constant 0 : i32
    return %c0_i32, %c0_i32_0 : i32, i32
  }
  func.func @transform_2(%arg0: i32) -> (i32, i32) {
    %c0_i32 = arith.constant 0 : i32
    %c0_i32_0 = arith.constant 0 : i32
    %c0_i32_1 = arith.constant 0 : i32
    return %c0_i32, %c0_i32_0 : i32, i32
  }
  func.func @transform_3(%arg0: i32) -> (i32, i32) {
    %c0_i32 = arith.constant 0 : i32
    %c0_i32_0 = arith.constant 0 : i32
    %c0_i32_1 = arith.constant 0 : i32
    return %c0_i32, %c0_i32_0 : i32, i32
  }
  func.func @transform_4(%arg0: i32) -> (i32, i32) {
    %c0_i32 = arith.constant 0 : i32
    %c0_i32_0 = arith.constant 0 : i32
    return %arg0, %c0_i32 : i32, i32
  }
}

module attributes {stable_mosaic.version = 11 : i64} {
  func.func @_gemm_kernel(%arg0: i32, %arg1: i32, %arg2: i32, %arg3: memref<32x256xbf16, #tpu.memory_space<vmem>>, %arg4: memref<256x128xbf16, #tpu.memory_space<vmem>>, %arg5: memref<1x128xf32, #tpu.memory_space<vmem>>, %arg6: memref<32x128xf32, #tpu.memory_space<vmem>>, %arg7: memref<32x128xf32, #tpu.memory_space<vmem>>) attributes {dimension_semantics = [#tpu.dimension_semantics<parallel>, #tpu.dimension_semantics<parallel>, #tpu.dimension_semantics<arbitrary>], iteration_bounds = array<i64: 1, 1, 1>, scalar_prefetch = 0 : i64, scratch_operands = 1 : i64, tpu.core_type = #tpu.core_type<tc>, window_params = [{transform_indices = @transform_0, window_bounds = array<i64: 32, 256>}, {transform_indices = @transform_1, window_bounds = array<i64: 256, 128>}, {transform_indices = @transform_2, window_bounds = array<i64: 1, 128>}, {transform_indices = @transform_3, window_bounds = array<i64: 32, 128>}]} {
    %c0_i32 = arith.constant 0 : i32
    %0 = arith.cmpi eq, %arg2, %c0_i32 : i32
    %1 = arith.extui %0 : i1 to i32
    %c0_i32_0 = arith.constant 0 : i32
    %2 = arith.cmpi ne, %1, %c0_i32_0 : i32
    scf.if %2 {
      %cst_12 = arith.constant 0.000000e+00 : f32
      %17 = vector.broadcast %cst_12 : f32 to vector<32x128xf32>
      %c0_13 = arith.constant 0 : index
      %c0_14 = arith.constant 0 : index
      %18 = vector.load %arg7[%c0_13, %c0_14] : memref<32x128xf32, #tpu.memory_space<vmem>>, vector<32x128xf32>
      tpu.vector_store %arg7[%c0_13, %c0_14], %17 {strides = array<i32>} : memref<32x128xf32, #tpu.memory_space<vmem>>, vector<32x128xf32>,
    } else {
    }
    %c0 = arith.constant 0 : index
    %c0_1 = arith.constant 0 : index
    %3 = vector.load %arg3[%c0, %c0_1] : memref<32x256xbf16, #tpu.memory_space<vmem>>, vector<32x256xbf16>
    %cst = arith.constant 0.000000e+00 : bf16
    %4 = vector.broadcast %cst : bf16 to vector<32x256xbf16>
    %5 = arith.cmpf oge, %3, %4 : vector<32x256xbf16>
    %cst_2 = arith.constant 2.001950e-01 : bf16
    %6 = vector.broadcast %cst_2 : bf16 to vector<32x256xbf16>
    %7 = arith.mulf %3, %6 : vector<32x256xbf16>
    %8 = arith.select %5, %3, %7 : vector<32x256xi1>, vector<32x256xbf16>
    %c0_3 = arith.constant 0 : index
    %c0_4 = arith.constant 0 : index
    %9 = vector.load %arg7[%c0_3, %c0_4] : memref<32x128xf32, #tpu.memory_space<vmem>>, vector<32x128xf32>
    %c0_5 = arith.constant 0 : index
    %c0_6 = arith.constant 0 : index
    %10 = vector.load %arg4[%c0_5, %c0_6] : memref<256x128xbf16, #tpu.memory_space<vmem>>, vector<256x128xbf16>
    %cst_7 = arith.constant dense<0.000000e+00> : vector<32x128xf32>
    %11 = tpu.matmul %8, %10, %cst_7 {dimension_numbers = #tpu.dot_dimension_numbers<[1], [0], [0], [1], [0, 0, 1, 1], [], []>} : vector<32x256xbf16>, vector<256x128xbf16>, vector<32x128xf32> -> vector<32x128xf32>
    %12 = arith.addf %9, %11 : vector<32x128xf32>
    %c0_8 = arith.constant 0 : index
    %c0_9 = arith.constant 0 : index
    %13 = vector.load %arg7[%c0_8, %c0_9] : memref<32x128xf32, #tpu.memory_space<vmem>>, vector<32x128xf32>
    tpu.vector_store %arg7[%c0_8, %c0_9], %12 {strides = array<i32>} : memref<32x128xf32, #tpu.memory_space<vmem>>, vector<32x128xf32>,
    %c0_i32_10 = arith.constant 0 : i32
    %14 = arith.cmpi eq, %arg2, %c0_i32_10 : i32
    %15 = arith.extui %14 : i1 to i32
    %c0_i32_11 = arith.constant 0 : i32
    %16 = arith.cmpi ne, %15, %c0_i32_11 : i32
    scf.if %16 {
      %c0_12 = arith.constant 0 : index
      %c0_13 = arith.constant 0 : index
      %17 = vector.load %arg7[%c0_12, %c0_13] : memref<32x128xf32, #tpu.memory_space<vmem>>, vector<32x128xf32>
      %c0_14 = arith.constant 0 : index
      %c0_15 = arith.constant 0 : index
      %18 = vector.load %arg5[%c0_14, %c0_15] : memref<1x128xf32, #tpu.memory_space<vmem>>, vector<1x128xf32>
      %19 = vector.broadcast %18 : vector<1x128xf32> to vector<32x128xf32>
      %20 = arith.addf %17, %19 : vector<32x128xf32>
      %c0_16 = arith.constant 0 : index
      %c0_17 = arith.constant 0 : index
      %21 = vector.load %arg6[%c0_16, %c0_17] : memref<32x128xf32, #tpu.memory_space<vmem>>, vector<32x128xf32>
      tpu.vector_store %arg6[%c0_16, %c0_17], %20 {strides = array<i32>} : memref<32x128xf32, #tpu.memory_space<vmem>>, vector<32x128xf32>,
    } else {
    }
    return
  }
  func.func @transform_0(%arg0: i32, %arg1: i32, %arg2: i32) -> (i32, i32) {
    %c0_i32 = arith.constant 0 : i32
    return %arg0, %arg2 : i32, i32
  }
  func.func @transform_1(%arg0: i32, %arg1: i32, %arg2: i32) -> (i32, i32) {
    %c0_i32 = arith.constant 0 : i32
    return %arg2, %arg1 : i32, i32
  }
  func.func @transform_2(%arg0: i32, %arg1: i32, %arg2: i32) -> (i32, i32) {
    %c0_i32 = arith.constant 0 : i32
    %c0_i32_0 = arith.constant 0 : i32
    return %c0_i32, %arg1 : i32, i32
  }
  func.func @transform_3(%arg0: i32, %arg1: i32, %arg2: i32) -> (i32, i32) {
    %c0_i32 = arith.constant 0 : i32
    return %arg0, %arg1 : i32, i32
  }
}

module attributes {stable_mosaic.version = 11 : i64} {
  func.func @_bn_stats_kernel(%arg0: i32, %arg1: memref<32x128xf32, #tpu.memory_space<vmem>>, %arg2: memref<2x128xf32, #tpu.memory_space<vmem>>) attributes {dimension_semantics = [#tpu.dimension_semantics<arbitrary>], iteration_bounds = array<i64: 1>, scalar_prefetch = 0 : i64, scratch_operands = 0 : i64, tpu.core_type = #tpu.core_type<tc>, window_params = [{transform_indices = @transform_0, window_bounds = array<i64: 32, 128>}, {pipeline_mode = #tpu.pipeline_mode<synchronous>, transform_indices = @transform_1, window_bounds = array<i64: 2, 128>}]} {
    %c0_i32 = arith.constant 0 : i32
    %0 = arith.cmpi eq, %arg0, %c0_i32 : i32
    %1 = arith.extui %0 : i1 to i32
    %c0_i32_0 = arith.constant 0 : i32
    %2 = arith.cmpi ne, %1, %c0_i32_0 : i32
    scf.if %2 {
      %cst_7 = arith.constant 0.000000e+00 : f32
      %13 = vector.broadcast %cst_7 : f32 to vector<2x128xf32>
      %c0_8 = arith.constant 0 : index
      %c0_9 = arith.constant 0 : index
      %14 = vector.load %arg2[%c0_8, %c0_9] : memref<2x128xf32, #tpu.memory_space<vmem>>, vector<2x128xf32>
      tpu.vector_store %arg2[%c0_8, %c0_9], %13 {strides = array<i32>} : memref<2x128xf32, #tpu.memory_space<vmem>>, vector<2x128xf32>,
    } else {
    }
    %c0 = arith.constant 0 : index
    %c0_1 = arith.constant 0 : index
    %3 = vector.load %arg1[%c0, %c0_1] : memref<32x128xf32, #tpu.memory_space<vmem>>, vector<32x128xf32>
    %c0_2 = arith.constant 0 : index
    %c0_3 = arith.constant 0 : index
    %4 = vector.load %arg2[%c0_2, %c0_3] : memref<2x128xf32, #tpu.memory_space<vmem>>, vector<2x128xf32>
    %cst = arith.constant dense<0.000000e+00> : vector<128xf32>
    %5 = vector.multi_reduction <add>, %3, %cst [0] : vector<32x128xf32> to vector<128xf32>
    %6 = vector.shape_cast %5 : vector<128xf32> to vector<1x128xf32>
    %7 = arith.mulf %3, %3 : vector<32x128xf32>
    %cst_4 = arith.constant dense<0.000000e+00> : vector<128xf32>
    %8 = vector.multi_reduction <add>, %7, %cst_4 [0] : vector<32x128xf32> to vector<128xf32>
    %9 = vector.shape_cast %8 : vector<128xf32> to vector<1x128xf32>
    %10 = tpu.concatenate %6, %9 in 0 : vector<1x128xf32>, vector<1x128xf32> -> vector<2x128xf32>
    %11 = arith.addf %4, %10 : vector<2x128xf32>
    %c0_5 = arith.constant 0 : index
    %c0_6 = arith.constant 0 : index
    %12 = vector.load %arg2[%c0_5, %c0_6] : memref<2x128xf32, #tpu.memory_space<vmem>>, vector<2x128xf32>
    tpu.vector_store %arg2[%c0_5, %c0_6], %11 {strides = array<i32>} : memref<2x128xf32, #tpu.memory_space<vmem>>, vector<2x128xf32>,
    return
  }
  func.func @transform_0(%arg0: i32) -> (i32, i32) {
    %c0_i32 = arith.constant 0 : i32
    %c0_i32_0 = arith.constant 0 : i32
    return %arg0, %c0_i32 : i32, i32
  }
  func.func @transform_1(%arg0: i32) -> (i32, i32) {
    %c0_i32 = arith.constant 0 : i32
    %c0_i32_0 = arith.constant 0 : i32
    %c0_i32_1 = arith.constant 0 : i32
    return %c0_i32, %c0_i32_0 : i32, i32
  }
}

module attributes {stable_mosaic.version = 11 : i64} {
  func.func @_bn_apply_kernel(%arg0: i32, %arg1: memref<32x128xf32, #tpu.memory_space<vmem>>, %arg2: memref<2x128xf32, #tpu.memory_space<vmem>>, %arg3: memref<1x128xf32, #tpu.memory_space<vmem>>, %arg4: memref<1x128xf32, #tpu.memory_space<vmem>>, %arg5: memref<32x128xf32, #tpu.memory_space<vmem>>) attributes {dimension_semantics = [#tpu.dimension_semantics<parallel>], iteration_bounds = array<i64: 1>, scalar_prefetch = 0 : i64, scratch_operands = 0 : i64, tpu.core_type = #tpu.core_type<tc>, window_params = [{transform_indices = @transform_0, window_bounds = array<i64: 32, 128>}, {pipeline_mode = #tpu.pipeline_mode<synchronous>, transform_indices = @transform_1, window_bounds = array<i64: 2, 128>}, {pipeline_mode = #tpu.pipeline_mode<synchronous>, transform_indices = @transform_2, window_bounds = array<i64: 1, 128>}, {pipeline_mode = #tpu.pipeline_mode<synchronous>, transform_indices = @transform_3, window_bounds = array<i64: 1, 128>}, {transform_indices = @transform_4, window_bounds = array<i64: 32, 128>}]} {
    %c0 = arith.constant 0 : index
    %c0_0 = arith.constant 0 : index
    %0 = vector.load %arg1[%c0, %c0_0] : memref<32x128xf32, #tpu.memory_space<vmem>>, vector<32x128xf32>
    %c0_1 = arith.constant 0 : index
    %c0_2 = arith.constant 0 : index
    %1 = vector.load %arg2[%c0_1, %c0_2] : memref<2x128xf32, #tpu.memory_space<vmem>>, vector<2x128xf32>
    %2 = vector.extract_strided_slice %1 {offsets = [0, 0], sizes = [1, 128], strides = [1, 1]} : vector<2x128xf32> to vector<1x128xf32>
    %cst = arith.constant 3.125000e-02 : f32
    %3 = vector.broadcast %cst : f32 to vector<1x128xf32>
    %4 = arith.mulf %2, %3 : vector<1x128xf32>
    %5 = vector.extract_strided_slice %1 {offsets = [1, 0], sizes = [1, 128], strides = [1, 1]} : vector<2x128xf32> to vector<1x128xf32>
    %cst_3 = arith.constant 3.125000e-02 : f32
    %6 = vector.broadcast %cst_3 : f32 to vector<1x128xf32>
    %7 = arith.mulf %5, %6 : vector<1x128xf32>
    %8 = arith.mulf %4, %4 : vector<1x128xf32>
    %9 = arith.subf %7, %8 : vector<1x128xf32>
    %cst_4 = arith.constant 9.99999974E-6 : f32
    %10 = vector.broadcast %cst_4 : f32 to vector<1x128xf32>
    %11 = arith.addf %9, %10 : vector<1x128xf32>
    %12 = math.rsqrt %11 : vector<1x128xf32>
    %13 = vector.broadcast %4 : vector<1x128xf32> to vector<32x128xf32>
    %14 = arith.subf %0, %13 : vector<32x128xf32>
    %c0_5 = arith.constant 0 : index
    %c0_6 = arith.constant 0 : index
    %15 = vector.load %arg3[%c0_5, %c0_6] : memref<1x128xf32, #tpu.memory_space<vmem>>, vector<1x128xf32>
    %16 = arith.mulf %12, %15 : vector<1x128xf32>
    %17 = vector.broadcast %16 : vector<1x128xf32> to vector<32x128xf32>
    %18 = arith.mulf %14, %17 : vector<32x128xf32>
    %c0_7 = arith.constant 0 : index
    %c0_8 = arith.constant 0 : index
    %19 = vector.load %arg4[%c0_7, %c0_8] : memref<1x128xf32, #tpu.memory_space<vmem>>, vector<1x128xf32>
    %20 = vector.broadcast %19 : vector<1x128xf32> to vector<32x128xf32>
    %21 = arith.addf %18, %20 : vector<32x128xf32>
    %c0_9 = arith.constant 0 : index
    %c0_10 = arith.constant 0 : index
    %22 = vector.load %arg5[%c0_9, %c0_10] : memref<32x128xf32, #tpu.memory_space<vmem>>, vector<32x128xf32>
    tpu.vector_store %arg5[%c0_9, %c0_10], %21 {strides = array<i32>} : memref<32x128xf32, #tpu.memory_space<vmem>>, vector<32x128xf32>,
    return
  }
  func.func @transform_0(%arg0: i32) -> (i32, i32) {
    %c0_i32 = arith.constant 0 : i32
    %c0_i32_0 = arith.constant 0 : i32
    return %arg0, %c0_i32 : i32, i32
  }
  func.func @transform_1(%arg0: i32) -> (i32, i32) {
    %c0_i32 = arith.constant 0 : i32
    %c0_i32_0 = arith.constant 0 : i32
    %c0_i32_1 = arith.constant 0 : i32
    return %c0_i32, %c0_i32_0 : i32, i32
  }
  func.func @transform_2(%arg0: i32) -> (i32, i32) {
    %c0_i32 = arith.constant 0 : i32
    %c0_i32_0 = arith.constant 0 : i32
    %c0_i32_1 = arith.constant 0 : i32
    return %c0_i32, %c0_i32_0 : i32, i32
  }
  func.func @transform_3(%arg0: i32) -> (i32, i32) {
    %c0_i32 = arith.constant 0 : i32
    %c0_i32_0 = arith.constant 0 : i32
    %c0_i32_1 = arith.constant 0 : i32
    return %c0_i32, %c0_i32_0 : i32, i32
  }
  func.func @transform_4(%arg0: i32) -> (i32, i32) {
    %c0_i32 = arith.constant 0 : i32
    %c0_i32_0 = arith.constant 0 : i32
    return %arg0, %c0_i32 : i32, i32
  }
}

module attributes {stable_mosaic.version = 11 : i64} {
  func.func @_gemm_kernel(%arg0: i32, %arg1: i32, %arg2: i32, %arg3: memref<8x512xbf16, #tpu.memory_space<vmem>>, %arg4: memref<512x128xbf16, #tpu.memory_space<vmem>>, %arg5: memref<1x128xf32, #tpu.memory_space<vmem>>, %arg6: memref<8x128xf32, #tpu.memory_space<vmem>>, %arg7: memref<8x128xf32, #tpu.memory_space<vmem>>) attributes {dimension_semantics = [#tpu.dimension_semantics<parallel>, #tpu.dimension_semantics<parallel>, #tpu.dimension_semantics<arbitrary>], iteration_bounds = array<i64: 1, 1, 1>, scalar_prefetch = 0 : i64, scratch_operands = 1 : i64, tpu.core_type = #tpu.core_type<tc>, window_params = [{transform_indices = @transform_0, window_bounds = array<i64: 8, 512>}, {transform_indices = @transform_1, window_bounds = array<i64: 512, 128>}, {transform_indices = @transform_2, window_bounds = array<i64: 1, 128>}, {transform_indices = @transform_3, window_bounds = array<i64: 8, 128>}]} {
    %c0_i32 = arith.constant 0 : i32
    %0 = arith.cmpi eq, %arg2, %c0_i32 : i32
    %1 = arith.extui %0 : i1 to i32
    %c0_i32_0 = arith.constant 0 : i32
    %2 = arith.cmpi ne, %1, %c0_i32_0 : i32
    scf.if %2 {
      %cst_12 = arith.constant 0.000000e+00 : f32
      %17 = vector.broadcast %cst_12 : f32 to vector<8x128xf32>
      %c0_13 = arith.constant 0 : index
      %c0_14 = arith.constant 0 : index
      %18 = vector.load %arg7[%c0_13, %c0_14] : memref<8x128xf32, #tpu.memory_space<vmem>>, vector<8x128xf32>
      tpu.vector_store %arg7[%c0_13, %c0_14], %17 {strides = array<i32>} : memref<8x128xf32, #tpu.memory_space<vmem>>, vector<8x128xf32>,
    } else {
    }
    %c0 = arith.constant 0 : index
    %c0_1 = arith.constant 0 : index
    %3 = vector.load %arg3[%c0, %c0_1] : memref<8x512xbf16, #tpu.memory_space<vmem>>, vector<8x512xbf16>
    %cst = arith.constant 0.000000e+00 : bf16
    %4 = vector.broadcast %cst : bf16 to vector<8x512xbf16>
    %5 = arith.cmpf oge, %3, %4 : vector<8x512xbf16>
    %cst_2 = arith.constant 2.001950e-01 : bf16
    %6 = vector.broadcast %cst_2 : bf16 to vector<8x512xbf16>
    %7 = arith.mulf %3, %6 : vector<8x512xbf16>
    %8 = arith.select %5, %3, %7 : vector<8x512xi1>, vector<8x512xbf16>
    %c0_3 = arith.constant 0 : index
    %c0_4 = arith.constant 0 : index
    %9 = vector.load %arg7[%c0_3, %c0_4] : memref<8x128xf32, #tpu.memory_space<vmem>>, vector<8x128xf32>
    %c0_5 = arith.constant 0 : index
    %c0_6 = arith.constant 0 : index
    %10 = vector.load %arg4[%c0_5, %c0_6] : memref<512x128xbf16, #tpu.memory_space<vmem>>, vector<512x128xbf16>
    %cst_7 = arith.constant dense<0.000000e+00> : vector<8x128xf32>
    %11 = tpu.matmul %8, %10, %cst_7 {dimension_numbers = #tpu.dot_dimension_numbers<[1], [0], [0], [1], [0, 0, 1, 1], [], []>} : vector<8x512xbf16>, vector<512x128xbf16>, vector<8x128xf32> -> vector<8x128xf32>
    %12 = arith.addf %9, %11 : vector<8x128xf32>
    %c0_8 = arith.constant 0 : index
    %c0_9 = arith.constant 0 : index
    %13 = vector.load %arg7[%c0_8, %c0_9] : memref<8x128xf32, #tpu.memory_space<vmem>>, vector<8x128xf32>
    tpu.vector_store %arg7[%c0_8, %c0_9], %12 {strides = array<i32>} : memref<8x128xf32, #tpu.memory_space<vmem>>, vector<8x128xf32>,
    %c0_i32_10 = arith.constant 0 : i32
    %14 = arith.cmpi eq, %arg2, %c0_i32_10 : i32
    %15 = arith.extui %14 : i1 to i32
    %c0_i32_11 = arith.constant 0 : i32
    %16 = arith.cmpi ne, %15, %c0_i32_11 : i32
    scf.if %16 {
      %c0_12 = arith.constant 0 : index
      %c0_13 = arith.constant 0 : index
      %17 = vector.load %arg7[%c0_12, %c0_13] : memref<8x128xf32, #tpu.memory_space<vmem>>, vector<8x128xf32>
      %c0_14 = arith.constant 0 : index
      %c0_15 = arith.constant 0 : index
      %18 = vector.load %arg5[%c0_14, %c0_15] : memref<1x128xf32, #tpu.memory_space<vmem>>, vector<1x128xf32>
      %19 = vector.broadcast %18 : vector<1x128xf32> to vector<8x128xf32>
      %20 = arith.addf %17, %19 : vector<8x128xf32>
      %c0_16 = arith.constant 0 : index
      %c0_17 = arith.constant 0 : index
      %21 = vector.load %arg6[%c0_16, %c0_17] : memref<8x128xf32, #tpu.memory_space<vmem>>, vector<8x128xf32>
      tpu.vector_store %arg6[%c0_16, %c0_17], %20 {strides = array<i32>} : memref<8x128xf32, #tpu.memory_space<vmem>>, vector<8x128xf32>,
    } else {
    }
    return
  }
  func.func @transform_0(%arg0: i32, %arg1: i32, %arg2: i32) -> (i32, i32) {
    %c0_i32 = arith.constant 0 : i32
    return %arg0, %arg2 : i32, i32
  }
  func.func @transform_1(%arg0: i32, %arg1: i32, %arg2: i32) -> (i32, i32) {
    %c0_i32 = arith.constant 0 : i32
    return %arg2, %arg1 : i32, i32
  }
  func.func @transform_2(%arg0: i32, %arg1: i32, %arg2: i32) -> (i32, i32) {
    %c0_i32 = arith.constant 0 : i32
    %c0_i32_0 = arith.constant 0 : i32
    return %c0_i32, %arg1 : i32, i32
  }
  func.func @transform_3(%arg0: i32, %arg1: i32, %arg2: i32) -> (i32, i32) {
    %c0_i32 = arith.constant 0 : i32
    return %arg0, %arg1 : i32, i32
  }
}

module attributes {stable_mosaic.version = 11 : i64} {
  func.func @_bn_stats_kernel(%arg0: i32, %arg1: memref<8x128xf32, #tpu.memory_space<vmem>>, %arg2: memref<2x128xf32, #tpu.memory_space<vmem>>) attributes {dimension_semantics = [#tpu.dimension_semantics<arbitrary>], iteration_bounds = array<i64: 1>, scalar_prefetch = 0 : i64, scratch_operands = 0 : i64, tpu.core_type = #tpu.core_type<tc>, window_params = [{transform_indices = @transform_0, window_bounds = array<i64: 8, 128>}, {pipeline_mode = #tpu.pipeline_mode<synchronous>, transform_indices = @transform_1, window_bounds = array<i64: 2, 128>}]} {
    %c0_i32 = arith.constant 0 : i32
    %0 = arith.cmpi eq, %arg0, %c0_i32 : i32
    %1 = arith.extui %0 : i1 to i32
    %c0_i32_0 = arith.constant 0 : i32
    %2 = arith.cmpi ne, %1, %c0_i32_0 : i32
    scf.if %2 {
      %cst_7 = arith.constant 0.000000e+00 : f32
      %13 = vector.broadcast %cst_7 : f32 to vector<2x128xf32>
      %c0_8 = arith.constant 0 : index
      %c0_9 = arith.constant 0 : index
      %14 = vector.load %arg2[%c0_8, %c0_9] : memref<2x128xf32, #tpu.memory_space<vmem>>, vector<2x128xf32>
      tpu.vector_store %arg2[%c0_8, %c0_9], %13 {strides = array<i32>} : memref<2x128xf32, #tpu.memory_space<vmem>>, vector<2x128xf32>,
    } else {
    }
    %c0 = arith.constant 0 : index
    %c0_1 = arith.constant 0 : index
    %3 = vector.load %arg1[%c0, %c0_1] : memref<8x128xf32, #tpu.memory_space<vmem>>, vector<8x128xf32>
    %c0_2 = arith.constant 0 : index
    %c0_3 = arith.constant 0 : index
    %4 = vector.load %arg2[%c0_2, %c0_3] : memref<2x128xf32, #tpu.memory_space<vmem>>, vector<2x128xf32>
    %cst = arith.constant dense<0.000000e+00> : vector<128xf32>
    %5 = vector.multi_reduction <add>, %3, %cst [0] : vector<8x128xf32> to vector<128xf32>
    %6 = vector.shape_cast %5 : vector<128xf32> to vector<1x128xf32>
    %7 = arith.mulf %3, %3 : vector<8x128xf32>
    %cst_4 = arith.constant dense<0.000000e+00> : vector<128xf32>
    %8 = vector.multi_reduction <add>, %7, %cst_4 [0] : vector<8x128xf32> to vector<128xf32>
    %9 = vector.shape_cast %8 : vector<128xf32> to vector<1x128xf32>
    %10 = tpu.concatenate %6, %9 in 0 : vector<1x128xf32>, vector<1x128xf32> -> vector<2x128xf32>
    %11 = arith.addf %4, %10 : vector<2x128xf32>
    %c0_5 = arith.constant 0 : index
    %c0_6 = arith.constant 0 : index
    %12 = vector.load %arg2[%c0_5, %c0_6] : memref<2x128xf32, #tpu.memory_space<vmem>>, vector<2x128xf32>
    tpu.vector_store %arg2[%c0_5, %c0_6], %11 {strides = array<i32>} : memref<2x128xf32, #tpu.memory_space<vmem>>, vector<2x128xf32>,
    return
  }
  func.func @transform_0(%arg0: i32) -> (i32, i32) {
    %c0_i32 = arith.constant 0 : i32
    %c0_i32_0 = arith.constant 0 : i32
    return %arg0, %c0_i32 : i32, i32
  }
  func.func @transform_1(%arg0: i32) -> (i32, i32) {
    %c0_i32 = arith.constant 0 : i32
    %c0_i32_0 = arith.constant 0 : i32
    %c0_i32_1 = arith.constant 0 : i32
    return %c0_i32, %c0_i32_0 : i32, i32
  }
}

module attributes {stable_mosaic.version = 11 : i64} {
  func.func @_bn_apply_kernel(%arg0: i32, %arg1: memref<8x128xf32, #tpu.memory_space<vmem>>, %arg2: memref<2x128xf32, #tpu.memory_space<vmem>>, %arg3: memref<1x128xf32, #tpu.memory_space<vmem>>, %arg4: memref<1x128xf32, #tpu.memory_space<vmem>>, %arg5: memref<8x128xf32, #tpu.memory_space<vmem>>) attributes {dimension_semantics = [#tpu.dimension_semantics<parallel>], iteration_bounds = array<i64: 1>, scalar_prefetch = 0 : i64, scratch_operands = 0 : i64, tpu.core_type = #tpu.core_type<tc>, window_params = [{transform_indices = @transform_0, window_bounds = array<i64: 8, 128>}, {pipeline_mode = #tpu.pipeline_mode<synchronous>, transform_indices = @transform_1, window_bounds = array<i64: 2, 128>}, {pipeline_mode = #tpu.pipeline_mode<synchronous>, transform_indices = @transform_2, window_bounds = array<i64: 1, 128>}, {pipeline_mode = #tpu.pipeline_mode<synchronous>, transform_indices = @transform_3, window_bounds = array<i64: 1, 128>}, {transform_indices = @transform_4, window_bounds = array<i64: 8, 128>}]} {
    %c0 = arith.constant 0 : index
    %c0_0 = arith.constant 0 : index
    %0 = vector.load %arg1[%c0, %c0_0] : memref<8x128xf32, #tpu.memory_space<vmem>>, vector<8x128xf32>
    %c0_1 = arith.constant 0 : index
    %c0_2 = arith.constant 0 : index
    %1 = vector.load %arg2[%c0_1, %c0_2] : memref<2x128xf32, #tpu.memory_space<vmem>>, vector<2x128xf32>
    %2 = vector.extract_strided_slice %1 {offsets = [0, 0], sizes = [1, 128], strides = [1, 1]} : vector<2x128xf32> to vector<1x128xf32>
    %cst = arith.constant 1.250000e-01 : f32
    %3 = vector.broadcast %cst : f32 to vector<1x128xf32>
    %4 = arith.mulf %2, %3 : vector<1x128xf32>
    %5 = vector.extract_strided_slice %1 {offsets = [1, 0], sizes = [1, 128], strides = [1, 1]} : vector<2x128xf32> to vector<1x128xf32>
    %cst_3 = arith.constant 1.250000e-01 : f32
    %6 = vector.broadcast %cst_3 : f32 to vector<1x128xf32>
    %7 = arith.mulf %5, %6 : vector<1x128xf32>
    %8 = arith.mulf %4, %4 : vector<1x128xf32>
    %9 = arith.subf %7, %8 : vector<1x128xf32>
    %cst_4 = arith.constant 9.99999974E-6 : f32
    %10 = vector.broadcast %cst_4 : f32 to vector<1x128xf32>
    %11 = arith.addf %9, %10 : vector<1x128xf32>
    %12 = math.rsqrt %11 : vector<1x128xf32>
    %13 = vector.broadcast %4 : vector<1x128xf32> to vector<8x128xf32>
    %14 = arith.subf %0, %13 : vector<8x128xf32>
    %c0_5 = arith.constant 0 : index
    %c0_6 = arith.constant 0 : index
    %15 = vector.load %arg3[%c0_5, %c0_6] : memref<1x128xf32, #tpu.memory_space<vmem>>, vector<1x128xf32>
    %16 = arith.mulf %12, %15 : vector<1x128xf32>
    %17 = vector.broadcast %16 : vector<1x128xf32> to vector<8x128xf32>
    %18 = arith.mulf %14, %17 : vector<8x128xf32>
    %c0_7 = arith.constant 0 : index
    %c0_8 = arith.constant 0 : index
    %19 = vector.load %arg4[%c0_7, %c0_8] : memref<1x128xf32, #tpu.memory_space<vmem>>, vector<1x128xf32>
    %20 = vector.broadcast %19 : vector<1x128xf32> to vector<8x128xf32>
    %21 = arith.addf %18, %20 : vector<8x128xf32>
    %c0_9 = arith.constant 0 : index
    %c0_10 = arith.constant 0 : index
    %22 = vector.load %arg5[%c0_9, %c0_10] : memref<8x128xf32, #tpu.memory_space<vmem>>, vector<8x128xf32>
    tpu.vector_store %arg5[%c0_9, %c0_10], %21 {strides = array<i32>} : memref<8x128xf32, #tpu.memory_space<vmem>>, vector<8x128xf32>,
    return
  }
  func.func @transform_0(%arg0: i32) -> (i32, i32) {
    %c0_i32 = arith.constant 0 : i32
    %c0_i32_0 = arith.constant 0 : i32
    return %arg0, %c0_i32 : i32, i32
  }
  func.func @transform_1(%arg0: i32) -> (i32, i32) {
    %c0_i32 = arith.constant 0 : i32
    %c0_i32_0 = arith.constant 0 : i32
    %c0_i32_1 = arith.constant 0 : i32
    return %c0_i32, %c0_i32_0 : i32, i32
  }
  func.func @transform_2(%arg0: i32) -> (i32, i32) {
    %c0_i32 = arith.constant 0 : i32
    %c0_i32_0 = arith.constant 0 : i32
    %c0_i32_1 = arith.constant 0 : i32
    return %c0_i32, %c0_i32_0 : i32, i32
  }
  func.func @transform_3(%arg0: i32) -> (i32, i32) {
    %c0_i32 = arith.constant 0 : i32
    %c0_i32_0 = arith.constant 0 : i32
    %c0_i32_1 = arith.constant 0 : i32
    return %c0_i32, %c0_i32_0 : i32, i32
  }
  func.func @transform_4(%arg0: i32) -> (i32, i32) {
    %c0_i32 = arith.constant 0 : i32
    %c0_i32_0 = arith.constant 0 : i32
    return %arg0, %c0_i32 : i32, i32
  }
}

module attributes {stable_mosaic.version = 11 : i64} {
  func.func @_gemm_kernel(%arg0: i32, %arg1: i32, %arg2: i32, %arg3: memref<8x512xbf16, #tpu.memory_space<vmem>>, %arg4: memref<512x128xbf16, #tpu.memory_space<vmem>>, %arg5: memref<1x128xf32, #tpu.memory_space<vmem>>, %arg6: memref<8x128xf32, #tpu.memory_space<vmem>>, %arg7: memref<8x128xf32, #tpu.memory_space<vmem>>) attributes {dimension_semantics = [#tpu.dimension_semantics<parallel>, #tpu.dimension_semantics<parallel>, #tpu.dimension_semantics<arbitrary>], iteration_bounds = array<i64: 1, 1, 2>, scalar_prefetch = 0 : i64, scratch_operands = 1 : i64, tpu.core_type = #tpu.core_type<tc>, window_params = [{transform_indices = @transform_0, window_bounds = array<i64: 8, 512>}, {transform_indices = @transform_1, window_bounds = array<i64: 512, 128>}, {transform_indices = @transform_2, window_bounds = array<i64: 1, 128>}, {transform_indices = @transform_3, window_bounds = array<i64: 8, 128>}]} {
    %c0_i32 = arith.constant 0 : i32
    %0 = arith.cmpi eq, %arg2, %c0_i32 : i32
    %1 = arith.extui %0 : i1 to i32
    %c0_i32_0 = arith.constant 0 : i32
    %2 = arith.cmpi ne, %1, %c0_i32_0 : i32
    scf.if %2 {
      %cst_11 = arith.constant 0.000000e+00 : f32
      %17 = vector.broadcast %cst_11 : f32 to vector<8x128xf32>
      %c0_12 = arith.constant 0 : index
      %c0_13 = arith.constant 0 : index
      %18 = vector.load %arg7[%c0_12, %c0_13] : memref<8x128xf32, #tpu.memory_space<vmem>>, vector<8x128xf32>
      tpu.vector_store %arg7[%c0_12, %c0_13], %17 {strides = array<i32>} : memref<8x128xf32, #tpu.memory_space<vmem>>, vector<8x128xf32>,
    } else {
    }
    %c0 = arith.constant 0 : index
    %c0_1 = arith.constant 0 : index
    %3 = vector.load %arg3[%c0, %c0_1] : memref<8x512xbf16, #tpu.memory_space<vmem>>, vector<8x512xbf16>
    %cst = arith.constant 0.000000e+00 : bf16
    %4 = vector.broadcast %cst : bf16 to vector<8x512xbf16>
    %5 = arith.cmpf oge, %3, %4 : vector<8x512xbf16>
    %cst_2 = arith.constant 2.001950e-01 : bf16
    %6 = vector.broadcast %cst_2 : bf16 to vector<8x512xbf16>
    %7 = arith.mulf %3, %6 : vector<8x512xbf16>
    %8 = arith.select %5, %3, %7 : vector<8x512xi1>, vector<8x512xbf16>
    %c0_3 = arith.constant 0 : index
    %c0_4 = arith.constant 0 : index
    %9 = vector.load %arg7[%c0_3, %c0_4] : memref<8x128xf32, #tpu.memory_space<vmem>>, vector<8x128xf32>
    %c0_5 = arith.constant 0 : index
    %c0_6 = arith.constant 0 : index
    %10 = vector.load %arg4[%c0_5, %c0_6] : memref<512x128xbf16, #tpu.memory_space<vmem>>, vector<512x128xbf16>
    %cst_7 = arith.constant dense<0.000000e+00> : vector<8x128xf32>
    %11 = tpu.matmul %8, %10, %cst_7 {dimension_numbers = #tpu.dot_dimension_numbers<[1], [0], [0], [1], [0, 0, 1, 1], [], []>} : vector<8x512xbf16>, vector<512x128xbf16>, vector<8x128xf32> -> vector<8x128xf32>
    %12 = arith.addf %9, %11 : vector<8x128xf32>
    %c0_8 = arith.constant 0 : index
    %c0_9 = arith.constant 0 : index
    %13 = vector.load %arg7[%c0_8, %c0_9] : memref<8x128xf32, #tpu.memory_space<vmem>>, vector<8x128xf32>
    tpu.vector_store %arg7[%c0_8, %c0_9], %12 {strides = array<i32>} : memref<8x128xf32, #tpu.memory_space<vmem>>, vector<8x128xf32>,
    %c1_i32 = arith.constant 1 : i32
    %14 = arith.cmpi eq, %arg2, %c1_i32 : i32
    %15 = arith.extui %14 : i1 to i32
    %c0_i32_10 = arith.constant 0 : i32
    %16 = arith.cmpi ne, %15, %c0_i32_10 : i32
    scf.if %16 {
      %c0_11 = arith.constant 0 : index
      %c0_12 = arith.constant 0 : index
      %17 = vector.load %arg7[%c0_11, %c0_12] : memref<8x128xf32, #tpu.memory_space<vmem>>, vector<8x128xf32>
      %c0_13 = arith.constant 0 : index
      %c0_14 = arith.constant 0 : index
      %18 = vector.load %arg5[%c0_13, %c0_14] : memref<1x128xf32, #tpu.memory_space<vmem>>, vector<1x128xf32>
      %19 = vector.broadcast %18 : vector<1x128xf32> to vector<8x128xf32>
      %20 = arith.addf %17, %19 : vector<8x128xf32>
      %cst_15 = arith.constant 0.000000e+00 : f32
      %21 = vector.broadcast %cst_15 : f32 to vector<8x128xf32>
      %22 = arith.maximumf %20, %21 : vector<8x128xf32>
      %c0_16 = arith.constant 0 : index
      %c0_17 = arith.constant 0 : index
      %23 = vector.load %arg6[%c0_16, %c0_17] : memref<8x128xf32, #tpu.memory_space<vmem>>, vector<8x128xf32>
      tpu.vector_store %arg6[%c0_16, %c0_17], %22 {strides = array<i32>} : memref<8x128xf32, #tpu.memory_space<vmem>>, vector<8x128xf32>,
    } else {
    }
    return
  }
  func.func @transform_0(%arg0: i32, %arg1: i32, %arg2: i32) -> (i32, i32) {
    %c0_i32 = arith.constant 0 : i32
    return %arg0, %arg2 : i32, i32
  }
  func.func @transform_1(%arg0: i32, %arg1: i32, %arg2: i32) -> (i32, i32) {
    %c0_i32 = arith.constant 0 : i32
    return %arg2, %arg1 : i32, i32
  }
  func.func @transform_2(%arg0: i32, %arg1: i32, %arg2: i32) -> (i32, i32) {
    %c0_i32 = arith.constant 0 : i32
    %c0_i32_0 = arith.constant 0 : i32
    return %c0_i32, %arg1 : i32, i32
  }
  func.func @transform_3(%arg0: i32, %arg1: i32, %arg2: i32) -> (i32, i32) {
    %c0_i32 = arith.constant 0 : i32
    return %arg0, %arg1 : i32, i32
  }
}

module attributes {stable_mosaic.version = 11 : i64} {
  func.func @_gemm_kernel(%arg0: i32, %arg1: i32, %arg2: i32, %arg3: memref<8x512xbf16, #tpu.memory_space<vmem>>, %arg4: memref<512x256xbf16, #tpu.memory_space<vmem>>, %arg5: memref<1x256xf32, #tpu.memory_space<vmem>>, %arg6: memref<8x256xf32, #tpu.memory_space<vmem>>, %arg7: memref<8x256xf32, #tpu.memory_space<vmem>>) attributes {dimension_semantics = [#tpu.dimension_semantics<parallel>, #tpu.dimension_semantics<parallel>, #tpu.dimension_semantics<arbitrary>], iteration_bounds = array<i64: 1, 1, 2>, scalar_prefetch = 0 : i64, scratch_operands = 1 : i64, tpu.core_type = #tpu.core_type<tc>, window_params = [{transform_indices = @transform_0, window_bounds = array<i64: 8, 512>}, {transform_indices = @transform_1, window_bounds = array<i64: 512, 256>}, {transform_indices = @transform_2, window_bounds = array<i64: 1, 256>}, {transform_indices = @transform_3, window_bounds = array<i64: 8, 256>}]} {
    %c0_i32 = arith.constant 0 : i32
    %0 = arith.cmpi eq, %arg2, %c0_i32 : i32
    %1 = arith.extui %0 : i1 to i32
    %c0_i32_0 = arith.constant 0 : i32
    %2 = arith.cmpi ne, %1, %c0_i32_0 : i32
    scf.if %2 {
      %cst_9 = arith.constant 0.000000e+00 : f32
      %12 = vector.broadcast %cst_9 : f32 to vector<8x256xf32>
      %c0_10 = arith.constant 0 : index
      %c0_11 = arith.constant 0 : index
      %13 = vector.load %arg7[%c0_10, %c0_11] : memref<8x256xf32, #tpu.memory_space<vmem>>, vector<8x256xf32>
      tpu.vector_store %arg7[%c0_10, %c0_11], %12 {strides = array<i32>} : memref<8x256xf32, #tpu.memory_space<vmem>>, vector<8x256xf32>,
    } else {
    }
    %c0 = arith.constant 0 : index
    %c0_1 = arith.constant 0 : index
    %3 = vector.load %arg3[%c0, %c0_1] : memref<8x512xbf16, #tpu.memory_space<vmem>>, vector<8x512xbf16>
    %c0_2 = arith.constant 0 : index
    %c0_3 = arith.constant 0 : index
    %4 = vector.load %arg7[%c0_2, %c0_3] : memref<8x256xf32, #tpu.memory_space<vmem>>, vector<8x256xf32>
    %c0_4 = arith.constant 0 : index
    %c0_5 = arith.constant 0 : index
    %5 = vector.load %arg4[%c0_4, %c0_5] : memref<512x256xbf16, #tpu.memory_space<vmem>>, vector<512x256xbf16>
    %cst = arith.constant dense<0.000000e+00> : vector<8x256xf32>
    %6 = tpu.matmul %3, %5, %cst {dimension_numbers = #tpu.dot_dimension_numbers<[1], [0], [0], [1], [0, 0, 1, 1], [], []>} : vector<8x512xbf16>, vector<512x256xbf16>, vector<8x256xf32> -> vector<8x256xf32>
    %7 = arith.addf %4, %6 : vector<8x256xf32>
    %c0_6 = arith.constant 0 : index
    %c0_7 = arith.constant 0 : index
    %8 = vector.load %arg7[%c0_6, %c0_7] : memref<8x256xf32, #tpu.memory_space<vmem>>, vector<8x256xf32>
    tpu.vector_store %arg7[%c0_6, %c0_7], %7 {strides = array<i32>} : memref<8x256xf32, #tpu.memory_space<vmem>>, vector<8x256xf32>,
    %c1_i32 = arith.constant 1 : i32
    %9 = arith.cmpi eq, %arg2, %c1_i32 : i32
    %10 = arith.extui %9 : i1 to i32
    %c0_i32_8 = arith.constant 0 : i32
    %11 = arith.cmpi ne, %10, %c0_i32_8 : i32
    scf.if %11 {
      %c0_9 = arith.constant 0 : index
      %c0_10 = arith.constant 0 : index
      %12 = vector.load %arg7[%c0_9, %c0_10] : memref<8x256xf32, #tpu.memory_space<vmem>>, vector<8x256xf32>
      %c0_11 = arith.constant 0 : index
      %c0_12 = arith.constant 0 : index
      %13 = vector.load %arg5[%c0_11, %c0_12] : memref<1x256xf32, #tpu.memory_space<vmem>>, vector<1x256xf32>
      %14 = vector.broadcast %13 : vector<1x256xf32> to vector<8x256xf32>
      %15 = arith.addf %12, %14 : vector<8x256xf32>
      %c0_13 = arith.constant 0 : index
      %c0_14 = arith.constant 0 : index
      %16 = vector.load %arg6[%c0_13, %c0_14] : memref<8x256xf32, #tpu.memory_space<vmem>>, vector<8x256xf32>
      tpu.vector_store %arg6[%c0_13, %c0_14], %15 {strides = array<i32>} : memref<8x256xf32, #tpu.memory_space<vmem>>, vector<8x256xf32>,
    } else {
    }
    return
  }
  func.func @transform_0(%arg0: i32, %arg1: i32, %arg2: i32) -> (i32, i32) {
    %c0_i32 = arith.constant 0 : i32
    return %arg0, %arg2 : i32, i32
  }
  func.func @transform_1(%arg0: i32, %arg1: i32, %arg2: i32) -> (i32, i32) {
    %c0_i32 = arith.constant 0 : i32
    return %arg2, %arg1 : i32, i32
  }
  func.func @transform_2(%arg0: i32, %arg1: i32, %arg2: i32) -> (i32, i32) {
    %c0_i32 = arith.constant 0 : i32
    %c0_i32_0 = arith.constant 0 : i32
    return %c0_i32, %arg1 : i32, i32
  }
  func.func @transform_3(%arg0: i32, %arg1: i32, %arg2: i32) -> (i32, i32) {
    %c0_i32 = arith.constant 0 : i32
    return %arg0, %arg1 : i32, i32
  }
}

module attributes {stable_mosaic.version = 11 : i64} {
  func.func @_gemm_kernel(%arg0: i32, %arg1: i32, %arg2: i32, %arg3: memref<8x512xbf16, #tpu.memory_space<vmem>>, %arg4: memref<512x128xbf16, #tpu.memory_space<vmem>>, %arg5: memref<1x128xf32, #tpu.memory_space<vmem>>, %arg6: memref<8x128xf32, #tpu.memory_space<vmem>>, %arg7: memref<8x128xf32, #tpu.memory_space<vmem>>) attributes {dimension_semantics = [#tpu.dimension_semantics<parallel>, #tpu.dimension_semantics<parallel>, #tpu.dimension_semantics<arbitrary>], iteration_bounds = array<i64: 1, 1, 3>, scalar_prefetch = 0 : i64, scratch_operands = 1 : i64, tpu.core_type = #tpu.core_type<tc>, window_params = [{transform_indices = @transform_0, window_bounds = array<i64: 8, 512>}, {transform_indices = @transform_1, window_bounds = array<i64: 512, 128>}, {transform_indices = @transform_2, window_bounds = array<i64: 1, 128>}, {transform_indices = @transform_3, window_bounds = array<i64: 8, 128>}]} {
    %c0_i32 = arith.constant 0 : i32
    %0 = arith.cmpi eq, %arg2, %c0_i32 : i32
    %1 = arith.extui %0 : i1 to i32
    %c0_i32_0 = arith.constant 0 : i32
    %2 = arith.cmpi ne, %1, %c0_i32_0 : i32
    scf.if %2 {
      %cst_10 = arith.constant 0.000000e+00 : f32
      %14 = vector.broadcast %cst_10 : f32 to vector<8x128xf32>
      %c0_11 = arith.constant 0 : index
      %c0_12 = arith.constant 0 : index
      %15 = vector.load %arg7[%c0_11, %c0_12] : memref<8x128xf32, #tpu.memory_space<vmem>>, vector<8x128xf32>
      tpu.vector_store %arg7[%c0_11, %c0_12], %14 {strides = array<i32>} : memref<8x128xf32, #tpu.memory_space<vmem>>, vector<8x128xf32>,
    } else {
    }
    %c0 = arith.constant 0 : index
    %c0_1 = arith.constant 0 : index
    %3 = vector.load %arg3[%c0, %c0_1] : memref<8x512xbf16, #tpu.memory_space<vmem>>, vector<8x512xbf16>
    %cst = arith.constant 0.000000e+00 : bf16
    %4 = vector.broadcast %cst : bf16 to vector<8x512xbf16>
    %5 = arith.maximumf %3, %4 : vector<8x512xbf16>
    %c0_2 = arith.constant 0 : index
    %c0_3 = arith.constant 0 : index
    %6 = vector.load %arg7[%c0_2, %c0_3] : memref<8x128xf32, #tpu.memory_space<vmem>>, vector<8x128xf32>
    %c0_4 = arith.constant 0 : index
    %c0_5 = arith.constant 0 : index
    %7 = vector.load %arg4[%c0_4, %c0_5] : memref<512x128xbf16, #tpu.memory_space<vmem>>, vector<512x128xbf16>
    %cst_6 = arith.constant dense<0.000000e+00> : vector<8x128xf32>
    %8 = tpu.matmul %5, %7, %cst_6 {dimension_numbers = #tpu.dot_dimension_numbers<[1], [0], [0], [1], [0, 0, 1, 1], [], []>} : vector<8x512xbf16>, vector<512x128xbf16>, vector<8x128xf32> -> vector<8x128xf32>
    %9 = arith.addf %6, %8 : vector<8x128xf32>
    %c0_7 = arith.constant 0 : index
    %c0_8 = arith.constant 0 : index
    %10 = vector.load %arg7[%c0_7, %c0_8] : memref<8x128xf32, #tpu.memory_space<vmem>>, vector<8x128xf32>
    tpu.vector_store %arg7[%c0_7, %c0_8], %9 {strides = array<i32>} : memref<8x128xf32, #tpu.memory_space<vmem>>, vector<8x128xf32>,
    %c2_i32 = arith.constant 2 : i32
    %11 = arith.cmpi eq, %arg2, %c2_i32 : i32
    %12 = arith.extui %11 : i1 to i32
    %c0_i32_9 = arith.constant 0 : i32
    %13 = arith.cmpi ne, %12, %c0_i32_9 : i32
    scf.if %13 {
      %c0_10 = arith.constant 0 : index
      %c0_11 = arith.constant 0 : index
      %14 = vector.load %arg7[%c0_10, %c0_11] : memref<8x128xf32, #tpu.memory_space<vmem>>, vector<8x128xf32>
      %c0_12 = arith.constant 0 : index
      %c0_13 = arith.constant 0 : index
      %15 = vector.load %arg5[%c0_12, %c0_13] : memref<1x128xf32, #tpu.memory_space<vmem>>, vector<1x128xf32>
      %16 = vector.broadcast %15 : vector<1x128xf32> to vector<8x128xf32>
      %17 = arith.addf %14, %16 : vector<8x128xf32>
      %c0_14 = arith.constant 0 : index
      %c0_15 = arith.constant 0 : index
      %18 = vector.load %arg6[%c0_14, %c0_15] : memref<8x128xf32, #tpu.memory_space<vmem>>, vector<8x128xf32>
      tpu.vector_store %arg6[%c0_14, %c0_15], %17 {strides = array<i32>} : memref<8x128xf32, #tpu.memory_space<vmem>>, vector<8x128xf32>,
    } else {
    }
    return
  }
  func.func @transform_0(%arg0: i32, %arg1: i32, %arg2: i32) -> (i32, i32) {
    %c0_i32 = arith.constant 0 : i32
    return %arg0, %arg2 : i32, i32
  }
  func.func @transform_1(%arg0: i32, %arg1: i32, %arg2: i32) -> (i32, i32) {
    %c0_i32 = arith.constant 0 : i32
    return %arg2, %arg1 : i32, i32
  }
  func.func @transform_2(%arg0: i32, %arg1: i32, %arg2: i32) -> (i32, i32) {
    %c0_i32 = arith.constant 0 : i32
    %c0_i32_0 = arith.constant 0 : i32
    return %c0_i32, %arg1 : i32, i32
  }
  func.func @transform_3(%arg0: i32, %arg1: i32, %arg2: i32) -> (i32, i32) {
    %c0_i32 = arith.constant 0 : i32
    return %arg0, %arg1 : i32, i32
  }
}

module attributes {stable_mosaic.version = 11 : i64} {
  func.func @_gemm_kernel(%arg0: i32, %arg1: i32, %arg2: i32, %arg3: memref<32x512xbf16, #tpu.memory_space<vmem>>, %arg4: memref<512x128xbf16, #tpu.memory_space<vmem>>, %arg5: memref<1x128xf32, #tpu.memory_space<vmem>>, %arg6: memref<32x128xf32, #tpu.memory_space<vmem>>, %arg7: memref<32x128xf32, #tpu.memory_space<vmem>>) attributes {dimension_semantics = [#tpu.dimension_semantics<parallel>, #tpu.dimension_semantics<parallel>, #tpu.dimension_semantics<arbitrary>], iteration_bounds = array<i64: 1, 1, 2>, scalar_prefetch = 0 : i64, scratch_operands = 1 : i64, tpu.core_type = #tpu.core_type<tc>, window_params = [{transform_indices = @transform_0, window_bounds = array<i64: 32, 512>}, {transform_indices = @transform_1, window_bounds = array<i64: 512, 128>}, {transform_indices = @transform_2, window_bounds = array<i64: 1, 128>}, {transform_indices = @transform_3, window_bounds = array<i64: 32, 128>}]} {
    %c0_i32 = arith.constant 0 : i32
    %0 = arith.cmpi eq, %arg2, %c0_i32 : i32
    %1 = arith.extui %0 : i1 to i32
    %c0_i32_0 = arith.constant 0 : i32
    %2 = arith.cmpi ne, %1, %c0_i32_0 : i32
    scf.if %2 {
      %cst_10 = arith.constant 0.000000e+00 : f32
      %14 = vector.broadcast %cst_10 : f32 to vector<32x128xf32>
      %c0_11 = arith.constant 0 : index
      %c0_12 = arith.constant 0 : index
      %15 = vector.load %arg7[%c0_11, %c0_12] : memref<32x128xf32, #tpu.memory_space<vmem>>, vector<32x128xf32>
      tpu.vector_store %arg7[%c0_11, %c0_12], %14 {strides = array<i32>} : memref<32x128xf32, #tpu.memory_space<vmem>>, vector<32x128xf32>,
    } else {
    }
    %c0 = arith.constant 0 : index
    %c0_1 = arith.constant 0 : index
    %3 = vector.load %arg3[%c0, %c0_1] : memref<32x512xbf16, #tpu.memory_space<vmem>>, vector<32x512xbf16>
    %cst = arith.constant 0.000000e+00 : bf16
    %4 = vector.broadcast %cst : bf16 to vector<32x512xbf16>
    %5 = arith.maximumf %3, %4 : vector<32x512xbf16>
    %c0_2 = arith.constant 0 : index
    %c0_3 = arith.constant 0 : index
    %6 = vector.load %arg7[%c0_2, %c0_3] : memref<32x128xf32, #tpu.memory_space<vmem>>, vector<32x128xf32>
    %c0_4 = arith.constant 0 : index
    %c0_5 = arith.constant 0 : index
    %7 = vector.load %arg4[%c0_4, %c0_5] : memref<512x128xbf16, #tpu.memory_space<vmem>>, vector<512x128xbf16>
    %cst_6 = arith.constant dense<0.000000e+00> : vector<32x128xf32>
    %8 = tpu.matmul %5, %7, %cst_6 {dimension_numbers = #tpu.dot_dimension_numbers<[1], [0], [0], [1], [0, 0, 1, 1], [], []>} : vector<32x512xbf16>, vector<512x128xbf16>, vector<32x128xf32> -> vector<32x128xf32>
    %9 = arith.addf %6, %8 : vector<32x128xf32>
    %c0_7 = arith.constant 0 : index
    %c0_8 = arith.constant 0 : index
    %10 = vector.load %arg7[%c0_7, %c0_8] : memref<32x128xf32, #tpu.memory_space<vmem>>, vector<32x128xf32>
    tpu.vector_store %arg7[%c0_7, %c0_8], %9 {strides = array<i32>} : memref<32x128xf32, #tpu.memory_space<vmem>>, vector<32x128xf32>,
    %c1_i32 = arith.constant 1 : i32
    %11 = arith.cmpi eq, %arg2, %c1_i32 : i32
    %12 = arith.extui %11 : i1 to i32
    %c0_i32_9 = arith.constant 0 : i32
    %13 = arith.cmpi ne, %12, %c0_i32_9 : i32
    scf.if %13 {
      %c0_10 = arith.constant 0 : index
      %c0_11 = arith.constant 0 : index
      %14 = vector.load %arg7[%c0_10, %c0_11] : memref<32x128xf32, #tpu.memory_space<vmem>>, vector<32x128xf32>
      %c0_12 = arith.constant 0 : index
      %c0_13 = arith.constant 0 : index
      %15 = vector.load %arg5[%c0_12, %c0_13] : memref<1x128xf32, #tpu.memory_space<vmem>>, vector<1x128xf32>
      %16 = vector.broadcast %15 : vector<1x128xf32> to vector<32x128xf32>
      %17 = arith.addf %14, %16 : vector<32x128xf32>
      %c0_14 = arith.constant 0 : index
      %c0_15 = arith.constant 0 : index
      %18 = vector.load %arg6[%c0_14, %c0_15] : memref<32x128xf32, #tpu.memory_space<vmem>>, vector<32x128xf32>
      tpu.vector_store %arg6[%c0_14, %c0_15], %17 {strides = array<i32>} : memref<32x128xf32, #tpu.memory_space<vmem>>, vector<32x128xf32>,
    } else {
    }
    return
  }
  func.func @transform_0(%arg0: i32, %arg1: i32, %arg2: i32) -> (i32, i32) {
    %c0_i32 = arith.constant 0 : i32
    return %arg0, %arg2 : i32, i32
  }
  func.func @transform_1(%arg0: i32, %arg1: i32, %arg2: i32) -> (i32, i32) {
    %c0_i32 = arith.constant 0 : i32
    return %arg2, %arg1 : i32, i32
  }
  func.func @transform_2(%arg0: i32, %arg1: i32, %arg2: i32) -> (i32, i32) {
    %c0_i32 = arith.constant 0 : i32
    %c0_i32_0 = arith.constant 0 : i32
    return %c0_i32, %arg1 : i32, i32
  }
  func.func @transform_3(%arg0: i32, %arg1: i32, %arg2: i32) -> (i32, i32) {
    %c0_i32 = arith.constant 0 : i32
    return %arg0, %arg1 : i32, i32
  }
}

module attributes {stable_mosaic.version = 11 : i64} {
  func.func @_gemm_kernel(%arg0: i32, %arg1: i32, %arg2: i32, %arg3: memref<128x384xbf16, #tpu.memory_space<vmem>>, %arg4: memref<384x128xbf16, #tpu.memory_space<vmem>>, %arg5: memref<1x128xf32, #tpu.memory_space<vmem>>, %arg6: memref<128x128xf32, #tpu.memory_space<vmem>>, %arg7: memref<128x128xf32, #tpu.memory_space<vmem>>) attributes {dimension_semantics = [#tpu.dimension_semantics<parallel>, #tpu.dimension_semantics<parallel>, #tpu.dimension_semantics<arbitrary>], iteration_bounds = array<i64: 1, 1, 1>, scalar_prefetch = 0 : i64, scratch_operands = 1 : i64, tpu.core_type = #tpu.core_type<tc>, window_params = [{transform_indices = @transform_0, window_bounds = array<i64: 128, 384>}, {transform_indices = @transform_1, window_bounds = array<i64: 384, 128>}, {transform_indices = @transform_2, window_bounds = array<i64: 1, 128>}, {transform_indices = @transform_3, window_bounds = array<i64: 128, 128>}]} {
    %c0_i32 = arith.constant 0 : i32
    %0 = arith.cmpi eq, %arg2, %c0_i32 : i32
    %1 = arith.extui %0 : i1 to i32
    %c0_i32_0 = arith.constant 0 : i32
    %2 = arith.cmpi ne, %1, %c0_i32_0 : i32
    scf.if %2 {
      %cst_11 = arith.constant 0.000000e+00 : f32
      %14 = vector.broadcast %cst_11 : f32 to vector<128x128xf32>
      %c0_12 = arith.constant 0 : index
      %c0_13 = arith.constant 0 : index
      %15 = vector.load %arg7[%c0_12, %c0_13] : memref<128x128xf32, #tpu.memory_space<vmem>>, vector<128x128xf32>
      tpu.vector_store %arg7[%c0_12, %c0_13], %14 {strides = array<i32>} : memref<128x128xf32, #tpu.memory_space<vmem>>, vector<128x128xf32>,
    } else {
    }
    %c0 = arith.constant 0 : index
    %c0_1 = arith.constant 0 : index
    %3 = vector.load %arg3[%c0, %c0_1] : memref<128x384xbf16, #tpu.memory_space<vmem>>, vector<128x384xbf16>
    %cst = arith.constant 0.000000e+00 : bf16
    %4 = vector.broadcast %cst : bf16 to vector<128x384xbf16>
    %5 = arith.maximumf %3, %4 : vector<128x384xbf16>
    %c0_2 = arith.constant 0 : index
    %c0_3 = arith.constant 0 : index
    %6 = vector.load %arg7[%c0_2, %c0_3] : memref<128x128xf32, #tpu.memory_space<vmem>>, vector<128x128xf32>
    %c0_4 = arith.constant 0 : index
    %c0_5 = arith.constant 0 : index
    %7 = vector.load %arg4[%c0_4, %c0_5] : memref<384x128xbf16, #tpu.memory_space<vmem>>, vector<384x128xbf16>
    %cst_6 = arith.constant dense<0.000000e+00> : vector<128x128xf32>
    %8 = tpu.matmul %5, %7, %cst_6 {dimension_numbers = #tpu.dot_dimension_numbers<[1], [0], [0], [1], [0, 0, 1, 1], [], []>} : vector<128x384xbf16>, vector<384x128xbf16>, vector<128x128xf32> -> vector<128x128xf32>
    %9 = arith.addf %6, %8 : vector<128x128xf32>
    %c0_7 = arith.constant 0 : index
    %c0_8 = arith.constant 0 : index
    %10 = vector.load %arg7[%c0_7, %c0_8] : memref<128x128xf32, #tpu.memory_space<vmem>>, vector<128x128xf32>
    tpu.vector_store %arg7[%c0_7, %c0_8], %9 {strides = array<i32>} : memref<128x128xf32, #tpu.memory_space<vmem>>, vector<128x128xf32>,
    %c0_i32_9 = arith.constant 0 : i32
    %11 = arith.cmpi eq, %arg2, %c0_i32_9 : i32
    %12 = arith.extui %11 : i1 to i32
    %c0_i32_10 = arith.constant 0 : i32
    %13 = arith.cmpi ne, %12, %c0_i32_10 : i32
    scf.if %13 {
      %c0_11 = arith.constant 0 : index
      %c0_12 = arith.constant 0 : index
      %14 = vector.load %arg7[%c0_11, %c0_12] : memref<128x128xf32, #tpu.memory_space<vmem>>, vector<128x128xf32>
      %c0_13 = arith.constant 0 : index
      %c0_14 = arith.constant 0 : index
      %15 = vector.load %arg5[%c0_13, %c0_14] : memref<1x128xf32, #tpu.memory_space<vmem>>, vector<1x128xf32>
      %16 = vector.broadcast %15 : vector<1x128xf32> to vector<128x128xf32>
      %17 = arith.addf %14, %16 : vector<128x128xf32>
      %c0_15 = arith.constant 0 : index
      %c0_16 = arith.constant 0 : index
      %18 = vector.load %arg6[%c0_15, %c0_16] : memref<128x128xf32, #tpu.memory_space<vmem>>, vector<128x128xf32>
      tpu.vector_store %arg6[%c0_15, %c0_16], %17 {strides = array<i32>} : memref<128x128xf32, #tpu.memory_space<vmem>>, vector<128x128xf32>,
    } else {
    }
    return
  }
  func.func @transform_0(%arg0: i32, %arg1: i32, %arg2: i32) -> (i32, i32) {
    %c0_i32 = arith.constant 0 : i32
    return %arg0, %arg2 : i32, i32
  }
  func.func @transform_1(%arg0: i32, %arg1: i32, %arg2: i32) -> (i32, i32) {
    %c0_i32 = arith.constant 0 : i32
    return %arg2, %arg1 : i32, i32
  }
  func.func @transform_2(%arg0: i32, %arg1: i32, %arg2: i32) -> (i32, i32) {
    %c0_i32 = arith.constant 0 : i32
    %c0_i32_0 = arith.constant 0 : i32
    return %c0_i32, %arg1 : i32, i32
  }
  func.func @transform_3(%arg0: i32, %arg1: i32, %arg2: i32) -> (i32, i32) {
    %c0_i32 = arith.constant 0 : i32
    return %arg0, %arg1 : i32, i32
  }
}

module attributes {stable_mosaic.version = 11 : i64} {
  func.func @_bn_stats_kernel(%arg0: i32, %arg1: memref<512x128xf32, #tpu.memory_space<vmem>>, %arg2: memref<2x128xf32, #tpu.memory_space<vmem>>) attributes {dimension_semantics = [#tpu.dimension_semantics<arbitrary>], iteration_bounds = array<i64: 1>, scalar_prefetch = 0 : i64, scratch_operands = 0 : i64, tpu.core_type = #tpu.core_type<tc>, window_params = [{transform_indices = @transform_0, window_bounds = array<i64: 512, 128>}, {pipeline_mode = #tpu.pipeline_mode<synchronous>, transform_indices = @transform_1, window_bounds = array<i64: 2, 128>}]} {
    %c0_i32 = arith.constant 0 : i32
    %0 = arith.cmpi eq, %arg0, %c0_i32 : i32
    %1 = arith.extui %0 : i1 to i32
    %c0_i32_0 = arith.constant 0 : i32
    %2 = arith.cmpi ne, %1, %c0_i32_0 : i32
    scf.if %2 {
      %cst_7 = arith.constant 0.000000e+00 : f32
      %13 = vector.broadcast %cst_7 : f32 to vector<2x128xf32>
      %c0_8 = arith.constant 0 : index
      %c0_9 = arith.constant 0 : index
      %14 = vector.load %arg2[%c0_8, %c0_9] : memref<2x128xf32, #tpu.memory_space<vmem>>, vector<2x128xf32>
      tpu.vector_store %arg2[%c0_8, %c0_9], %13 {strides = array<i32>} : memref<2x128xf32, #tpu.memory_space<vmem>>, vector<2x128xf32>,
    } else {
    }
    %c0 = arith.constant 0 : index
    %c0_1 = arith.constant 0 : index
    %3 = vector.load %arg1[%c0, %c0_1] : memref<512x128xf32, #tpu.memory_space<vmem>>, vector<512x128xf32>
    %c0_2 = arith.constant 0 : index
    %c0_3 = arith.constant 0 : index
    %4 = vector.load %arg2[%c0_2, %c0_3] : memref<2x128xf32, #tpu.memory_space<vmem>>, vector<2x128xf32>
    %cst = arith.constant dense<0.000000e+00> : vector<128xf32>
    %5 = vector.multi_reduction <add>, %3, %cst [0] : vector<512x128xf32> to vector<128xf32>
    %6 = vector.shape_cast %5 : vector<128xf32> to vector<1x128xf32>
    %7 = arith.mulf %3, %3 : vector<512x128xf32>
    %cst_4 = arith.constant dense<0.000000e+00> : vector<128xf32>
    %8 = vector.multi_reduction <add>, %7, %cst_4 [0] : vector<512x128xf32> to vector<128xf32>
    %9 = vector.shape_cast %8 : vector<128xf32> to vector<1x128xf32>
    %10 = tpu.concatenate %6, %9 in 0 : vector<1x128xf32>, vector<1x128xf32> -> vector<2x128xf32>
    %11 = arith.addf %4, %10 : vector<2x128xf32>
    %c0_5 = arith.constant 0 : index
    %c0_6 = arith.constant 0 : index
    %12 = vector.load %arg2[%c0_5, %c0_6] : memref<2x128xf32, #tpu.memory_space<vmem>>, vector<2x128xf32>
    tpu.vector_store %arg2[%c0_5, %c0_6], %11 {strides = array<i32>} : memref<2x128xf32, #tpu.memory_space<vmem>>, vector<2x128xf32>,
    return
  }
  func.func @transform_0(%arg0: i32) -> (i32, i32) {
    %c0_i32 = arith.constant 0 : i32
    %c0_i32_0 = arith.constant 0 : i32
    return %arg0, %c0_i32 : i32, i32
  }
  func.func @transform_1(%arg0: i32) -> (i32, i32) {
    %c0_i32 = arith.constant 0 : i32
    %c0_i32_0 = arith.constant 0 : i32
    %c0_i32_1 = arith.constant 0 : i32
    return %c0_i32, %c0_i32_0 : i32, i32
  }
}

module attributes {stable_mosaic.version = 11 : i64} {
  func.func @_bn_apply_kernel(%arg0: i32, %arg1: memref<512x128xf32, #tpu.memory_space<vmem>>, %arg2: memref<2x128xf32, #tpu.memory_space<vmem>>, %arg3: memref<1x128xf32, #tpu.memory_space<vmem>>, %arg4: memref<1x128xf32, #tpu.memory_space<vmem>>, %arg5: memref<512x128xf32, #tpu.memory_space<vmem>>) attributes {dimension_semantics = [#tpu.dimension_semantics<parallel>], iteration_bounds = array<i64: 1>, scalar_prefetch = 0 : i64, scratch_operands = 0 : i64, tpu.core_type = #tpu.core_type<tc>, window_params = [{transform_indices = @transform_0, window_bounds = array<i64: 512, 128>}, {pipeline_mode = #tpu.pipeline_mode<synchronous>, transform_indices = @transform_1, window_bounds = array<i64: 2, 128>}, {pipeline_mode = #tpu.pipeline_mode<synchronous>, transform_indices = @transform_2, window_bounds = array<i64: 1, 128>}, {pipeline_mode = #tpu.pipeline_mode<synchronous>, transform_indices = @transform_3, window_bounds = array<i64: 1, 128>}, {transform_indices = @transform_4, window_bounds = array<i64: 512, 128>}]} {
    %c0 = arith.constant 0 : index
    %c0_0 = arith.constant 0 : index
    %0 = vector.load %arg1[%c0, %c0_0] : memref<512x128xf32, #tpu.memory_space<vmem>>, vector<512x128xf32>
    %c0_1 = arith.constant 0 : index
    %c0_2 = arith.constant 0 : index
    %1 = vector.load %arg2[%c0_1, %c0_2] : memref<2x128xf32, #tpu.memory_space<vmem>>, vector<2x128xf32>
    %2 = vector.extract_strided_slice %1 {offsets = [0, 0], sizes = [1, 128], strides = [1, 1]} : vector<2x128xf32> to vector<1x128xf32>
    %cst = arith.constant 0.001953125 : f32
    %3 = vector.broadcast %cst : f32 to vector<1x128xf32>
    %4 = arith.mulf %2, %3 : vector<1x128xf32>
    %5 = vector.extract_strided_slice %1 {offsets = [1, 0], sizes = [1, 128], strides = [1, 1]} : vector<2x128xf32> to vector<1x128xf32>
    %cst_3 = arith.constant 0.001953125 : f32
    %6 = vector.broadcast %cst_3 : f32 to vector<1x128xf32>
    %7 = arith.mulf %5, %6 : vector<1x128xf32>
    %8 = arith.mulf %4, %4 : vector<1x128xf32>
    %9 = arith.subf %7, %8 : vector<1x128xf32>
    %cst_4 = arith.constant 9.99999974E-6 : f32
    %10 = vector.broadcast %cst_4 : f32 to vector<1x128xf32>
    %11 = arith.addf %9, %10 : vector<1x128xf32>
    %12 = math.rsqrt %11 : vector<1x128xf32>
    %13 = vector.broadcast %4 : vector<1x128xf32> to vector<512x128xf32>
    %14 = arith.subf %0, %13 : vector<512x128xf32>
    %c0_5 = arith.constant 0 : index
    %c0_6 = arith.constant 0 : index
    %15 = vector.load %arg3[%c0_5, %c0_6] : memref<1x128xf32, #tpu.memory_space<vmem>>, vector<1x128xf32>
    %16 = arith.mulf %12, %15 : vector<1x128xf32>
    %17 = vector.broadcast %16 : vector<1x128xf32> to vector<512x128xf32>
    %18 = arith.mulf %14, %17 : vector<512x128xf32>
    %c0_7 = arith.constant 0 : index
    %c0_8 = arith.constant 0 : index
    %19 = vector.load %arg4[%c0_7, %c0_8] : memref<1x128xf32, #tpu.memory_space<vmem>>, vector<1x128xf32>
    %20 = vector.broadcast %19 : vector<1x128xf32> to vector<512x128xf32>
    %21 = arith.addf %18, %20 : vector<512x128xf32>
    %c0_9 = arith.constant 0 : index
    %c0_10 = arith.constant 0 : index
    %22 = vector.load %arg5[%c0_9, %c0_10] : memref<512x128xf32, #tpu.memory_space<vmem>>, vector<512x128xf32>
    tpu.vector_store %arg5[%c0_9, %c0_10], %21 {strides = array<i32>} : memref<512x128xf32, #tpu.memory_space<vmem>>, vector<512x128xf32>,
    return
  }
  func.func @transform_0(%arg0: i32) -> (i32, i32) {
    %c0_i32 = arith.constant 0 : i32
    %c0_i32_0 = arith.constant 0 : i32
    return %arg0, %c0_i32 : i32, i32
  }
  func.func @transform_1(%arg0: i32) -> (i32, i32) {
    %c0_i32 = arith.constant 0 : i32
    %c0_i32_0 = arith.constant 0 : i32
    %c0_i32_1 = arith.constant 0 : i32
    return %c0_i32, %c0_i32_0 : i32, i32
  }
  func.func @transform_2(%arg0: i32) -> (i32, i32) {
    %c0_i32 = arith.constant 0 : i32
    %c0_i32_0 = arith.constant 0 : i32
    %c0_i32_1 = arith.constant 0 : i32
    return %c0_i32, %c0_i32_0 : i32, i32
  }
  func.func @transform_3(%arg0: i32) -> (i32, i32) {
    %c0_i32 = arith.constant 0 : i32
    %c0_i32_0 = arith.constant 0 : i32
    %c0_i32_1 = arith.constant 0 : i32
    return %c0_i32, %c0_i32_0 : i32, i32
  }
  func.func @transform_4(%arg0: i32) -> (i32, i32) {
    %c0_i32 = arith.constant 0 : i32
    %c0_i32_0 = arith.constant 0 : i32
    return %arg0, %c0_i32 : i32, i32
  }
}

module attributes {stable_mosaic.version = 11 : i64} {
  func.func @_gemm_kernel(%arg0: i32, %arg1: i32, %arg2: i32, %arg3: memref<256x256xbf16, #tpu.memory_space<vmem>>, %arg4: memref<256x128xbf16, #tpu.memory_space<vmem>>, %arg5: memref<1x128xf32, #tpu.memory_space<vmem>>, %arg6: memref<256x128xf32, #tpu.memory_space<vmem>>, %arg7: memref<256x128xf32, #tpu.memory_space<vmem>>) attributes {dimension_semantics = [#tpu.dimension_semantics<parallel>, #tpu.dimension_semantics<parallel>, #tpu.dimension_semantics<arbitrary>], iteration_bounds = array<i64: 2, 1, 1>, scalar_prefetch = 0 : i64, scratch_operands = 1 : i64, tpu.core_type = #tpu.core_type<tc>, window_params = [{transform_indices = @transform_0, window_bounds = array<i64: 256, 256>}, {transform_indices = @transform_1, window_bounds = array<i64: 256, 128>}, {transform_indices = @transform_2, window_bounds = array<i64: 1, 128>}, {transform_indices = @transform_3, window_bounds = array<i64: 256, 128>}]} {
    %c0_i32 = arith.constant 0 : i32
    %0 = arith.cmpi eq, %arg2, %c0_i32 : i32
    %1 = arith.extui %0 : i1 to i32
    %c0_i32_0 = arith.constant 0 : i32
    %2 = arith.cmpi ne, %1, %c0_i32_0 : i32
    scf.if %2 {
      %cst_11 = arith.constant 0.000000e+00 : f32
      %14 = vector.broadcast %cst_11 : f32 to vector<256x128xf32>
      %c0_12 = arith.constant 0 : index
      %c0_13 = arith.constant 0 : index
      %15 = vector.load %arg7[%c0_12, %c0_13] : memref<256x128xf32, #tpu.memory_space<vmem>>, vector<256x128xf32>
      tpu.vector_store %arg7[%c0_12, %c0_13], %14 {strides = array<i32>} : memref<256x128xf32, #tpu.memory_space<vmem>>, vector<256x128xf32>,
    } else {
    }
    %c0 = arith.constant 0 : index
    %c0_1 = arith.constant 0 : index
    %3 = vector.load %arg3[%c0, %c0_1] : memref<256x256xbf16, #tpu.memory_space<vmem>>, vector<256x256xbf16>
    %cst = arith.constant 0.000000e+00 : bf16
    %4 = vector.broadcast %cst : bf16 to vector<256x256xbf16>
    %5 = arith.maximumf %3, %4 : vector<256x256xbf16>
    %c0_2 = arith.constant 0 : index
    %c0_3 = arith.constant 0 : index
    %6 = vector.load %arg7[%c0_2, %c0_3] : memref<256x128xf32, #tpu.memory_space<vmem>>, vector<256x128xf32>
    %c0_4 = arith.constant 0 : index
    %c0_5 = arith.constant 0 : index
    %7 = vector.load %arg4[%c0_4, %c0_5] : memref<256x128xbf16, #tpu.memory_space<vmem>>, vector<256x128xbf16>
    %cst_6 = arith.constant dense<0.000000e+00> : vector<256x128xf32>
    %8 = tpu.matmul %5, %7, %cst_6 {dimension_numbers = #tpu.dot_dimension_numbers<[1], [0], [0], [1], [0, 0, 1, 1], [], []>} : vector<256x256xbf16>, vector<256x128xbf16>, vector<256x128xf32> -> vector<256x128xf32>
    %9 = arith.addf %6, %8 : vector<256x128xf32>
    %c0_7 = arith.constant 0 : index
    %c0_8 = arith.constant 0 : index
    %10 = vector.load %arg7[%c0_7, %c0_8] : memref<256x128xf32, #tpu.memory_space<vmem>>, vector<256x128xf32>
    tpu.vector_store %arg7[%c0_7, %c0_8], %9 {strides = array<i32>} : memref<256x128xf32, #tpu.memory_space<vmem>>, vector<256x128xf32>,
    %c0_i32_9 = arith.constant 0 : i32
    %11 = arith.cmpi eq, %arg2, %c0_i32_9 : i32
    %12 = arith.extui %11 : i1 to i32
    %c0_i32_10 = arith.constant 0 : i32
    %13 = arith.cmpi ne, %12, %c0_i32_10 : i32
    scf.if %13 {
      %c0_11 = arith.constant 0 : index
      %c0_12 = arith.constant 0 : index
      %14 = vector.load %arg7[%c0_11, %c0_12] : memref<256x128xf32, #tpu.memory_space<vmem>>, vector<256x128xf32>
      %c0_13 = arith.constant 0 : index
      %c0_14 = arith.constant 0 : index
      %15 = vector.load %arg5[%c0_13, %c0_14] : memref<1x128xf32, #tpu.memory_space<vmem>>, vector<1x128xf32>
      %16 = vector.broadcast %15 : vector<1x128xf32> to vector<256x128xf32>
      %17 = arith.addf %14, %16 : vector<256x128xf32>
      %18 = math.tanh %17 : vector<256x128xf32>
      %c0_15 = arith.constant 0 : index
      %c0_16 = arith.constant 0 : index
      %19 = vector.load %arg6[%c0_15, %c0_16] : memref<256x128xf32, #tpu.memory_space<vmem>>, vector<256x128xf32>
      tpu.vector_store %arg6[%c0_15, %c0_16], %18 {strides = array<i32>} : memref<256x128xf32, #tpu.memory_space<vmem>>, vector<256x128xf32>,
    } else {
    }
    return
  }
  func.func @transform_0(%arg0: i32, %arg1: i32, %arg2: i32) -> (i32, i32) {
    %c0_i32 = arith.constant 0 : i32
    return %arg0, %arg2 : i32, i32
  }
  func.func @transform_1(%arg0: i32, %arg1: i32, %arg2: i32) -> (i32, i32) {
    %c0_i32 = arith.constant 0 : i32
    return %arg2, %arg1 : i32, i32
  }
  func.func @transform_2(%arg0: i32, %arg1: i32, %arg2: i32) -> (i32, i32) {
    %c0_i32 = arith.constant 0 : i32
    %c0_i32_0 = arith.constant 0 : i32
    return %c0_i32, %arg1 : i32, i32
  }
  func.func @transform_3(%arg0: i32, %arg1: i32, %arg2: i32) -> (i32, i32) {
    %c0_i32 = arith.constant 0 : i32
    return %arg0, %arg1 : i32, i32
  }
}

</mosaic_0001>

<bundles_post_ra>
// kernel: _lambda_.24
= control target key start
LH: loop header
LB: loop body
LE: loop exit
PB: predicated region body
PF: predicated region fallthrough
CT: control target
= control target key end

     0   :  { %s1180_s12 = smov 0   ;;  %s1182_s13 = smov 0   ;;  %s1330_s0 = inlined_call_operand.vmem [shape: bf16[512,128], index: 0, kind: input, shape index: {}]   ;;  %s1331_s1 = inlined_call_operand.vmem [shape: bf16[128,128], index: 1, kind: input, shape index: {}]   ;;  %s1332_s2 = inlined_call_operand.vmem [shape: f32[1,128], index: 2, kind: input, shape index: {}]   ;;  %s1333_s3 = inlined_call_operand.vmem [shape: f32[512,128], index: 3, kind: output, shape index: {}]  }
   0x1   :  { %s1184_s14 = smov 0  }
   0x2 LB: > { %s32_s15 = sadd.s32 1, %s1154_s13  ;;  %p968_p0 = scmp.ge.s32.totalorder %s1158_s14, 1  ;;  %s1158_s14 = sphi %s1184_s14, %s13_s14   ;;  %s1154_s13 = sphi %s1182_s13, %s1335_s13   ;;  %s1150_s12 = sphi %s1180_s12, %s1334_s12  }
   0x3   : > { %p34_p1 = scmp.ge.s32.totalorder %s32_s15, 2  ;;  %p188_p2 = scmp.lt.s32.totalorder %s1158_s14, 3 }
   0x5   : > { %s1337_s15 = smov (%p34_p1, %s32_s15), 0  ;;  %p189_p3 = pnand %p968_p0, %p188_p2 }
   0x6   : > { %v1112_v0 = vld [vmem:[%s1331_s1] sm:$0xff] (!%p189_p3)   ;;  %s969_s18 = sshll.u32 (!%p189_p3), %s1150_s12, 5  ;;  %v1113_v1 = vld [vmem:[%s1331_s1 + $0x8] sm:$0xff] (!%p189_p3)   ;;  %v1114_v2 = vld [vmem:[%s1331_s1 + $0x10] sm:$0xff] (!%p189_p3)  }
   0x7   : > { %192 = sbr.rel (%p189_p3) target bundleno = 281 (0x119), region = 32  ;;  %p230_p4 = scmp.lt.s32.totalorder (!%p189_p3), %s969_s18, 63  ;;  %1024 = vmatprep.subr.bf16.mxu0 (!%p189_p3), %v1112_v0  ;;  %1072 = vmatprep.subr.bf16.mxu1 (!%p189_p3), %v1112_v0  ;;  %v1115_v3 = vld [vmem:[%s1331_s1 + $0x18] sm:$0xff] (!%p189_p3)   ;;  %v1116_v6 = vld [vmem:[%s1331_s1 + $0x20] sm:$0xff] (!%p189_p3)   ;;  %v1117_v7 = vld [vmem:[%s1331_s1 + $0x28] sm:$0xff] (!%p189_p3)  }
   0x8   : > { %1025 = vmatpush3.bf16.msra.mxu0 (!%p189_p3), %v1112_v0  ;;  %1080 = vmatpush3.bf16.msra.mxu1 (!%p189_p3), %v1112_v0  ;;  %v1118_v8 = vld [vmem:[%s1331_s1 + $0x30] sm:$0xff] (!%p189_p3)   ;;  %v1119_v9 = vld [vmem:[%s1331_s1 + $0x38] sm:$0xff] (!%p189_p3)   ;;  %v1250_v24 = vld [vmem:[%s1332_s2] ss:$0 sm:$0xff] (!%p189_p3) }
   0x9   : > { %1026 = vmatprep.subr.bf16.mxu0 (!%p189_p3), %v1113_v1  ;;  %1073 = vmatprep.subr.bf16.mxu1 (!%p189_p3), %v1113_v1 }
   0xc   : > { %1027 = vmatpush3.bf16.msra.mxu0 (!%p189_p3), %v1113_v1  ;;  %1081 = vmatpush3.bf16.msra.mxu1 (!%p189_p3), %v1113_v1 }
   0xd   : > { %1028 = vmatprep.subr.bf16.mxu0 (!%p189_p3), %v1114_v2  ;;  %1074 = vmatprep.subr.bf16.mxu1 (!%p189_p3), %v1114_v2 }
   0xe   : > { %s1339_s18 = smov (!%p230_p4, %s969_s18), 63 }
   0xf   : > { %s970_s23 = sshll.u32 %s1339_s18, 2  ;;  %s972_s10 = sshll.u32 %s1339_s18, 3 }
  0x10   : > { %s1213_s26 = scalar_lea.vmem %s1330_s0, %s970_s23  ;;  %1029 = vmatpush3.bf16.msra.mxu0 %v1114_v2  ;;  %1082 = vmatpush3.bf16.msra.mxu1 %v1114_v2  ;;  %s1255_s19 = scalar_lea.vmem %s1333_s3, %s972_s10 }
  0x11   : > { %v1120_v4 = vld [vmem:[%s1213_s26] sm:$0xff]   ;;  %1030 = vmatprep.subr.bf16.mxu0 %v1115_v3  ;;  %1075 = vmatprep.subr.bf16.mxu1 %v1115_v3  ;;  %v1122_v10 = vld [vmem:[%s1213_s26 + $0x8] sm:$0xff]   ;;  %v1124_v12 = vld [vmem:[%s1213_s26 + $0x10] sm:$0xff]  }
  0x12   : > { %v1121_v5 = vld [vmem:[%s1213_s26 + $0x40] sm:$0xff]   ;;  %1040 = vmatprep.mubr.bf16.mxu0 %v1120_v4  ;;  %v1123_v11 = vld [vmem:[%s1213_s26 + $0x48] sm:$0xff]   ;;  %v1125_v13 = vld [vmem:[%s1213_s26 + $0x50] sm:$0xff]  }
  0x13   : > { %1056 = vmatprep.mubr.bf16.mxu1 %v1121_v5  ;;  %v1126_v14 = vld [vmem:[%s1213_s26 + $0x18] sm:$0xff]   ;;  %v1128_v16 = vld [vmem:[%s1213_s26 + $0x20] sm:$0xff]   ;;  %v1130_v18 = vld [vmem:[%s1213_s26 + $0x28] sm:$0xff]  }
  0x14   : > { %1031 = vmatpush3.bf16.msra.mxu0 %v1115_v3  ;;  %1083 = vmatpush3.bf16.msra.mxu1 %v1115_v3  ;;  %v1127_v15 = vld [vmem:[%s1213_s26 + $0x58] sm:$0xff]   ;;  %v1129_v17 = vld [vmem:[%s1213_s26 + $0x60] sm:$0xff]   ;;  %v1131_v19 = vld [vmem:[%s1213_s26 + $0x68] sm:$0xff]  }
  0x15   : > { %1032 = vmatprep.subr.bf16.mxu0 %v1116_v6  ;;  %1076 = vmatprep.subr.bf16.mxu1 %v1116_v6  ;;  %v1132_v20 = vld [vmem:[%s1213_s26 + $0x30] sm:$0xff]   ;;  %v1134_v22 = vld [vmem:[%s1213_s26 + $0x38] sm:$0xff]  }
  0x16   : > { %v1133_v21 = vld [vmem:[%s1213_s26 + $0x70] sm:$0xff]   ;;  %v1135_v23 = vld [vmem:[%s1213_s26 + $0x78] sm:$0xff]  }
  0x18   : > { %1033 = vmatpush3.bf16.msra.mxu0 %v1116_v6  ;;  %1084 = vmatpush3.bf16.msra.mxu1 %v1116_v6 }
  0x19   : > { %1034 = vmatprep.subr.bf16.mxu0 %v1117_v7  ;;  %1077 = vmatprep.subr.bf16.mxu1 %v1117_v7 }
  0x1c   : > { %1035 = vmatpush3.bf16.msra.mxu0 %v1117_v7  ;;  %1085 = vmatpush3.bf16.msra.mxu1 %v1117_v7 }
  0x1d   : > { %1036 = vmatprep.subr.bf16.mxu0 %v1118_v8  ;;  %1078 = vmatprep.subr.bf16.mxu1 %v1118_v8 }
  0x20   : > { %1037 = vmatpush3.bf16.msra.mxu0 %v1118_v8  ;;  %1086 = vmatpush3.bf16.msra.mxu1 %v1118_v8 }
  0x21   : > { %1038 = vmatprep.subr.bf16.mxu0 %v1119_v9  ;;  %1079 = vmatprep.subr.bf16.mxu1 %v1119_v9 }
  0x24   : > { %1039 = vmatpush3.bf16.msra.mxu0 %v1119_v9  ;;  %1087 = vmatpush3.bf16.msra.mxu1 %v1119_v9 }
  0x27   : > { %1041 = vmatmul.mubr.bf16.vlgmr.msra.gmra.mrb[0].mxu0 %v1122_v10  ;;  %1057 = vmatmul.mubr.bf16.vlgmr.msra.gmra.mrb[0].mxu1 %v1123_v11 }
  0x28   : > { %1044 = vmatprep.mubr.bf16.mxu0 %v1124_v12  ;;  %1060 = vmatprep.mubr.bf16.mxu1 %v1125_v13 }
  0x2f   : > { %1045 = vmatmul.mubr.bf16.gmra.mrb[4].mxu0 %v1126_v14  ;;  %1061 = vmatmul.mubr.bf16.gmra.mrb[4].mxu1 %v1127_v15 }
  0x30   : > { %1048 = vmatprep.mubr.bf16.mxu0 %v1128_v16  ;;  %1064 = vmatprep.mubr.bf16.mxu1 %v1129_v17 }
  0x37   : > { %1049 = vmatmul.mubr.bf16.gmra.mrb[8].mxu0 %v1130_v18  ;;  %1065 = vmatmul.mubr.bf16.gmra.mrb[8].mxu1 %v1131_v19 }
  0x38   : > { %1052 = vmatprep.mubr.bf16.mxu0 %v1132_v20  ;;  %1068 = vmatprep.mubr.bf16.mxu1 %v1133_v21 }
  0x3f   : > { %1053 = vmatmul.mubr.bf16.gmra.mrb[12].mxu0 %v1134_v22  ;;  %1069 = vmatmul.mubr.bf16.gmra.mrb[12].mxu1 %v1135_v23 }
  0xfa   : > { %v1042_v25 = vpop.f32.mrb[0].mxu0  ;;  %v1058_v26 = vpop.f32.mrb[0].mxu1 }
  0xfb   : > { %v789_v27 = vadd.f32 %v1042_v25, %v1250_v24  ;;  %v805_v28 = vadd.f32 %v1058_v26, %v1250_v24  ;;  %v554_v29 = vpop.f32.mrb[1].mxu0  ;;  %v618_v30 = vpop.f32.mrb[1].mxu1 }
  0xfc   : > { %v787_v31 = vadd.f32 %v1250_v24, %v554_v29  ;;  %v803_v32 = vadd.f32 %v1250_v24, %v618_v30  ;;  %v1043_v33 = vpop.f32.mrb[2].mxu0  ;;  %v1059_v34 = vpop.f32.mrb[2].mxu1 }
  0xfd   : > { %821 = vst [vmem:[%s1255_s19 + $0x10] sm:$0xff] %v789_v27  ;;  %837 = vst [vmem:[%s1255_s19 + $0x90] sm:$0xff] %v805_v28  ;;  %v790_v35 = vadd.f32 %v1043_v33, %v1250_v24  ;;  %v806_v36 = vadd.f32 %v1059_v34, %v1250_v24  ;;  %v557_v37 = vpop.f32.mrb[3].mxu0  ;;  %v621_v38 = vpop.f32.mrb[3].mxu1 }
  0xfe   : > { %819 = vst [vmem:[%s1255_s19] sm:$0xff] %v787_v31  ;;  %835 = vst [vmem:[%s1255_s19 + $0x80] sm:$0xff] %v803_v32  ;;  %v788_v39 = vadd.f32 %v1250_v24, %v557_v37  ;;  %v804_v40 = vadd.f32 %v1250_v24, %v621_v38 }
  0xff   : > { %822 = vst [vmem:[%s1255_s19 + $0x18] sm:$0xff] %v790_v35  ;;  %838 = vst [vmem:[%s1255_s19 + $0x98] sm:$0xff] %v806_v36 }
 0x100   : > { %820 = vst [vmem:[%s1255_s19 + $0x8] sm:$0xff] %v788_v39  ;;  %836 = vst [vmem:[%s1255_s19 + $0x88] sm:$0xff] %v804_v40 }
 0x102   : > { %v1046_v41 = vpop.f32.mrb[4].mxu0  ;;  %v1062_v42 = vpop.f32.mrb[4].mxu1 }
 0x103   : > { %v793_v43 = vadd.f32 %v1046_v41, %v1250_v24  ;;  %v809_v44 = vadd.f32 %v1062_v42, %v1250_v24  ;;  %v570_v45 = vpop.f32.mrb[5].mxu0  ;;  %v634_v46 = vpop.f32.mrb[5].mxu1 }
 0x104   : > { %v791_v47 = vadd.f32 %v1250_v24, %v570_v45  ;;  %v807_v48 = vadd.f32 %v1250_v24, %v634_v46  ;;  %v1047_v49 = vpop.f32.mrb[6].mxu0  ;;  %v1063_v50 = vpop.f32.mrb[6].mxu1 }
 0x105   : > { %825 = vst [vmem:[%s1255_s19 + $0x30] sm:$0xff] %v793_v43  ;;  %841 = vst [vmem:[%s1255_s19 + $0xb0] sm:$0xff] %v809_v44  ;;  %v794_v51 = vadd.f32 %v1047_v49, %v1250_v24  ;;  %v810_v52 = vadd.f32 %v1063_v50, %v1250_v24  ;;  %v573_v53 = vpop.f32.mrb[7].mxu0  ;;  %v637_v54 = vpop.f32.mrb[7].mxu1 }
 0x106   : > { %823 = vst [vmem:[%s1255_s19 + $0x20] sm:$0xff] %v791_v47  ;;  %839 = vst [vmem:[%s1255_s19 + $0xa0] sm:$0xff] %v807_v48  ;;  %v792_v55 = vadd.f32 %v1250_v24, %v573_v53  ;;  %v808_v56 = vadd.f32 %v1250_v24, %v637_v54 }
 0x107   : > { %826 = vst [vmem:[%s1255_s19 + $0x38] sm:$0xff] %v794_v51  ;;  %842 = vst [vmem:[%s1255_s19 + $0xb8] sm:$0xff] %v810_v52 }
 0x108   : > { %824 = vst [vmem:[%s1255_s19 + $0x28] sm:$0xff] %v792_v55  ;;  %840 = vst [vmem:[%s1255_s19 + $0xa8] sm:$0xff] %v808_v56 }
 0x10a   : > { %v1050_v57 = vpop.f32.mrb[8].mxu0  ;;  %v1066_v58 = vpop.f32.mrb[8].mxu1 }
 0x10b   : > { %v797_v59 = vadd.f32 %v1050_v57, %v1250_v24  ;;  %v813_v60 = vadd.f32 %v1066_v58, %v1250_v24  ;;  %v586_v61 = vpop.f32.mrb[9].mxu0  ;;  %v650_v62 = vpop.f32.mrb[9].mxu1 }
 0x10c   : > { %v795_v63 = vadd.f32 %v1250_v24, %v586_v61  ;;  %v811_v0 = vadd.f32 %v1250_v24, %v650_v62  ;;  %v1051_v1 = vpop.f32.mrb[10].mxu0  ;;  %v1067_v2 = vpop.f32.mrb[10].mxu1 }
 0x10d   : > { %829 = vst [vmem:[%s1255_s19 + $0x50] sm:$0xff] %v797_v59  ;;  %845 = vst [vmem:[%s1255_s19 + $0xd0] sm:$0xff] %v813_v60  ;;  %v798_v3 = vadd.f32 %v1051_v1, %v1250_v24  ;;  %v814_v4 = vadd.f32 %v1067_v2, %v1250_v24  ;;  %v589_v5 = vpop.f32.mrb[11].mxu0  ;;  %v653_v6 = vpop.f32.mrb[11].mxu1 }
 0x10e   : > { %827 = vst [vmem:[%s1255_s19 + $0x40] sm:$0xff] %v795_v63  ;;  %843 = vst [vmem:[%s1255_s19 + $0xc0] sm:$0xff] %v811_v0  ;;  %v796_v7 = vadd.f32 %v1250_v24, %v589_v5  ;;  %v812_v8 = vadd.f32 %v1250_v24, %v653_v6 }
 0x10f   : > { %830 = vst [vmem:[%s1255_s19 + $0x58] sm:$0xff] %v798_v3  ;;  %846 = vst [vmem:[%s1255_s19 + $0xd8] sm:$0xff] %v814_v4 }
 0x110   : > { %828 = vst [vmem:[%s1255_s19 + $0x48] sm:$0xff] %v796_v7  ;;  %844 = vst [vmem:[%s1255_s19 + $0xc8] sm:$0xff] %v812_v8 }
 0x112   : > { %v1054_v9 = vpop.f32.mrb[12].mxu0  ;;  %v1070_v10 = vpop.f32.mrb[12].mxu1 }
 0x113   : > { %v801_v11 = vadd.f32 %v1054_v9, %v1250_v24  ;;  %v817_v12 = vadd.f32 %v1070_v10, %v1250_v24  ;;  %v602_v13 = vpop.f32.mrb[13].mxu0  ;;  %v666_v14 = vpop.f32.mrb[13].mxu1 }
 0x114   : > { %v799_v15 = vadd.f32 %v1250_v24, %v602_v13  ;;  %v815_v16 = vadd.f32 %v1250_v24, %v666_v14  ;;  %v1055_v17 = vpop.f32.mrb[14].mxu0  ;;  %v1071_v18 = vpop.f32.mrb[14].mxu1 }
 0x115   : > { %833 = vst [vmem:[%s1255_s19 + $0x70] sm:$0xff] %v801_v11  ;;  %849 = vst [vmem:[%s1255_s19 + $0xf0] sm:$0xff] %v817_v12  ;;  %v802_v19 = vadd.f32 %v1055_v17, %v1250_v24  ;;  %v818_v20 = vadd.f32 %v1071_v18, %v1250_v24  ;;  %v605_v21 = vpop.f32.mrb[15].mxu0  ;;  %v669_v22 = vpop.f32.mrb[15].mxu1 }
 0x116   : > { %831 = vst [vmem:[%s1255_s19 + $0x60] sm:$0xff] %v799_v15  ;;  %847 = vst [vmem:[%s1255_s19 + $0xe0] sm:$0xff] %v815_v16  ;;  %v800_v23 = vadd.f32 %v1250_v24, %v605_v21  ;;  %v816_v25 = vadd.f32 %v1250_v24, %v669_v22 }
 0x117   : > { %834 = vst [vmem:[%s1255_s19 + $0x78] sm:$0xff] %v802_v19  ;;  %850 = vst [vmem:[%s1255_s19 + $0xf8] sm:$0xff] %v818_v20 }
 0x118   : > { %832 = vst [vmem:[%s1255_s19 + $0x68] sm:$0xff] %v800_v23  ;;  %848 = vst [vmem:[%s1255_s19 + $0xe8] sm:$0xff] %v816_v25 }
 0x119 PF: > { %s13_s14 = sadd.s32 1, %s1158_s14   ;;  %s1334_s12 = smov %s1154_s13 }
 0x11a   : > { %p10_p5 = scmp.ge.s32.totalorder %s13_s14, 4   ;;  %s1335_s13 = smov %s1337_s15 }
 0x11c   :  { %12 = sbr.rel (!%p10_p5) target bundleno = 2 (0x2), region = 76 }

// kernel: _lambda_.26
= control target key start
LH: loop header
LB: loop body
LE: loop exit
PB: predicated region body
PF: predicated region fallthrough
CT: control target
= control target key end

     0   :  { %v97_v0 = vmov 0.0   ;;  %vm88_vm0 = vcmask 1040384   ;;  %s165_s1 = inlined_call_operand.vmem [shape: f32[2,128], index: 1, kind: output, shape index: {}]   ;;  %s166_s0 = inlined_call_operand.vmem [shape: f32[128,128], index: 0, kind: input, shape index: {}]  }
   0x1   :  { %12 = vst [vmem:[%s165_s1] sm:$0x3] %v97_v0  ;;  %v13_v1 = vld [vmem:[%s166_s0] sm:$0xff]  ;;  %v14_v2 = vld [vmem:[%s166_s0 + $0x8] sm:$0xff]  ;;  %v15_v3 = vld [vmem:[%s166_s0 + $0x10] sm:$0xff] }
   0x2   :  { %v16_v4 = vld [vmem:[%s166_s0 + $0x18] sm:$0xff]  ;;  %v30_v5 = vadd.f32 %v14_v2, %v13_v1  ;;  %v51_v6 = vmul.f32 %v13_v1, %v13_v1  ;;  %v52_v7 = vmul.f32 %v14_v2, %v14_v2  ;;  %v53_v8 = vmul.f32 %v15_v3, %v15_v3  ;;  %v17_v9 = vld [vmem:[%s166_s0 + $0x20] sm:$0xff]  ;;  %v18_v13 = vld [vmem:[%s166_s0 + $0x28] sm:$0xff] }
   0x3   :  { %v54_v11 = vmul.f32 %v16_v4, %v16_v4  ;;  %v55_v15 = vmul.f32 %v17_v9, %v17_v9  ;;  %v19_v17 = vld [vmem:[%s166_s0 + $0x30] sm:$0xff]  ;;  %v56_v19 = vmul.f32 %v18_v13, %v18_v13  ;;  %v20_v21 = vld [vmem:[%s166_s0 + $0x38] sm:$0xff]  ;;  %v21_v25 = vld [vmem:[%s166_s0 + $0x40] sm:$0xff] }
   0x4   :  { %v31_v10 = vadd.f32 %v30_v5, %v15_v3  ;;  %v67_v12 = vadd.f32 %v52_v7, %v51_v6  ;;  %v57_v23 = vmul.f32 %v19_v17, %v19_v17  ;;  %v58_v27 = vmul.f32 %v20_v21, %v20_v21  ;;  %v22_v29 = vld [vmem:[%s166_s0 + $0x48] sm:$0xff]  ;;  %v23_v33 = vld [vmem:[%s166_s0 + $0x50] sm:$0xff]  ;;  %v24_v37 = vld [vmem:[%s166_s0 + $0x58] sm:$0xff] }
   0x5   :  { %v59_v31 = vmul.f32 %v21_v25, %v21_v25  ;;  %v60_v35 = vmul.f32 %v22_v29, %v22_v29  ;;  %v61_v39 = vmul.f32 %v23_v33, %v23_v33  ;;  %v25_v41 = vld [vmem:[%s166_s0 + $0x60] sm:$0xff]  ;;  %v62_v43 = vmul.f32 %v24_v37, %v24_v37  ;;  %v26_v45 = vld [vmem:[%s166_s0 + $0x68] sm:$0xff]  ;;  %v27_v49 = vld [vmem:[%s166_s0 + $0x70] sm:$0xff] }
   0x6   :  { %v32_v14 = vadd.f32 %v31_v10, %v16_v4  ;;  %v68_v16 = vadd.f32 %v67_v12, %v53_v8  ;;  %v63_v47 = vmul.f32 %v25_v41, %v25_v41  ;;  %v64_v51 = vmul.f32 %v26_v45, %v26_v45  ;;  %v28_v53 = vld [vmem:[%s166_s0 + $0x78] sm:$0xff] }
   0x7   :  { %v65_v55 = vmul.f32 %v27_v49, %v27_v49  ;;  %v66_v58 = vmul.f32 %v28_v53, %v28_v53 }
   0x8   :  { %v33_v18 = vadd.f32 %v32_v14, %v17_v9  ;;  %v69_v20 = vadd.f32 %v68_v16, %v54_v11  ;;  %v29_v10 = vld [vmem:[%s165_s1] sm:$0x3] }
   0xa   :  { %v34_v22 = vadd.f32 %v33_v18, %v18_v13  ;;  %v70_v24 = vadd.f32 %v69_v20, %v55_v15 }
   0xc   :  { %v35_v26 = vadd.f32 %v34_v22, %v19_v17  ;;  %v71_v28 = vadd.f32 %v70_v24, %v56_v19 }
   0xe   :  { %v36_v30 = vadd.f32 %v35_v26, %v20_v21  ;;  %v72_v32 = vadd.f32 %v71_v28, %v57_v23 }
  0x10   :  { %v37_v34 = vadd.f32 %v36_v30, %v21_v25  ;;  %v73_v36 = vadd.f32 %v72_v32, %v58_v27 }
  0x12   :  { %v38_v38 = vadd.f32 %v37_v34, %v22_v29  ;;  %v74_v40 = vadd.f32 %v73_v36, %v59_v31 }
  0x14   :  { %v39_v42 = vadd.f32 %v38_v38, %v23_v33  ;;  %v75_v44 = vadd.f32 %v74_v40, %v60_v35 }
  0x16   :  { %v40_v46 = vadd.f32 %v39_v42, %v24_v37  ;;  %v76_v48 = vadd.f32 %v75_v44, %v61_v39 }
  0x18   :  { %v41_v50 = vadd.f32 %v40_v46, %v25_v41  ;;  %v77_v52 = vadd.f32 %v76_v48, %v62_v43 }
  0x1a   :  { %v42_v54 = vadd.f32 %v41_v50, %v26_v45  ;;  %v78_v56 = vadd.f32 %v77_v52, %v63_v47 }
  0x1c   :  { %v43_v57 = vadd.f32 %v42_v54, %v27_v49  ;;  %v79_v59 = vadd.f32 %v78_v56, %v64_v51 }
  0x1e   :  { %v44_v60 = vadd.f32 %v43_v57, %v28_v53  ;;  %v80_v61 = vadd.f32 %v79_v59, %v65_v55 }
  0x20   :  { %v45_v62 = vrot.slane %v44_v60, 4  ;;  %v81_v63 = vadd.f32 %v80_v61, %v66_v58 }
  0x22   :  { %v46_v0 = vadd.f32 %v45_v62, %v44_v60  ;;  %v82_v1 = vrot.slane %v81_v63, 4 }
  0x24   :  { %v47_v2 = vrot.slane %v46_v0, 2  ;;  %v83_v3 = vadd.f32 %v82_v1, %v81_v63 }
  0x26   :  { %v48_v4 = vadd.f32 %v47_v2, %v46_v0  ;;  %v84_v5 = vrot.slane %v83_v3, 2 }
  0x28   :  { %v49_v6 = vrot.slane %v48_v4, 1  ;;  %v85_v7 = vadd.f32 %v84_v5, %v83_v3 }
  0x2a   :  { %v50_v8 = vadd.f32 %v49_v6, %v48_v4  ;;  %v86_v9 = vrot.slane %v85_v7, 1 }
  0x2c   :  { %v87_v11 = vadd.f32 %v86_v9, %v85_v7 }
  0x2e   :  { %v89_v12 = vsel %vm88_vm0, %v50_v8, %v87_v11 }
  0x2f   :  { %v90_v13 = vadd.f32 %v89_v12, %v29_v10 }
  0x31   :  { %91 = vst [vmem:[%s165_s1] sm:$0x3] %v90_v13 }

// kernel: _lambda_.25
= control target key start
LH: loop header
LB: loop body
LE: loop exit
PB: predicated region body
PF: predicated region fallthrough
CT: control target
= control target key end

     0   :  { %s655_s1 = inlined_call_operand.vmem [shape: bf16[128,128], index: 1, kind: input, shape index: {}]   ;;  %s656_s0 = inlined_call_operand.vmem [shape: bf16[128,128], index: 0, kind: input, shape index: {}]   ;;  %s657_s2 = inlined_call_operand.vmem [shape: f32[1,128], index: 2, kind: input, shape index: {}]   ;;  %s658_s3 = inlined_call_operand.vmem [shape: f32[128,128], index: 3, kind: output, shape index: {}]  }
   0x1   :  { %v500_v0 = vld [vmem:[%s655_s1] sm:$0xff]   ;;  %v501_v1 = vld [vmem:[%s655_s1 + $0x8] sm:$0xff]   ;;  %v502_v2 = vld [vmem:[%s655_s1 + $0x10] sm:$0xff]  }
   0x2   :  { %452 = vmatprep.subr.bf16.mxu0 %v500_v0  ;;  %484 = vmatprep.subr.bf16.mxu1 %v500_v0  ;;  %v503_v3 = vld [vmem:[%s655_s1 + $0x18] sm:$0xff]   ;;  %v36_v4 = vld [vmem:[%s656_s0] sm:$0xf]  ;;  %v37_v5 = vld [vmem:[%s656_s0 + $0x4] sm:$0xf] }
   0x3   :  { %453 = vmatpush3.bf16.msra.mxu0 %v500_v0  ;;  %492 = vmatpush3.bf16.msra.mxu1 %v500_v0  ;;  %v44_v6 = vld [vmem:[%s656_s0 + $0x20] sm:$0xf]  ;;  %vm52_vm0 = vcmp.ge.bf16.partialorder %v36_v4, 0  ;;  %vm53_vm1 = vcmp.ge.bf16.partialorder %v37_v5, 0  ;;  %v68_v7 = vmul.bf16 1045249613, %v36_v4 }
   0x4   :  { %454 = vmatprep.subr.bf16.mxu0 %v501_v1  ;;  %485 = vmatprep.subr.bf16.mxu1 %v501_v1  ;;  %v69_v8 = vmul.bf16 1045249613, %v37_v5  ;;  %v45_v9 = vld [vmem:[%s656_s0 + $0x24] sm:$0xf]  ;;  %vm60_vm2 = vcmp.ge.bf16.partialorder %v44_v6, 0  ;;  %v505_v19 = vld [vmem:[%s655_s1 + $0x28] sm:$0xff]  }
   0x5   :  { %v76_v10 = vmul.bf16 1045249613, %v44_v6  ;;  %v84_v11 = vsel %vm52_vm0, %v36_v4, %v68_v7  ;;  %vm61_vm3 = vcmp.ge.bf16.partialorder %v45_v9, 0  ;;  %v77_v13 = vmul.bf16 1045249613, %v45_v9  ;;  %v504_v14 = vld [vmem:[%s655_s1 + $0x20] sm:$0xff]  }
   0x6   :  { %v85_v12 = vsel %vm53_vm1, %v37_v5, %v69_v8  ;;  %v38_v20 = vld [vmem:[%s656_s0 + $0x8] sm:$0xf]  ;;  %v39_v21 = vld [vmem:[%s656_s0 + $0xc] sm:$0xf]  ;;  %v506_v22 = vld [vmem:[%s655_s1 + $0x30] sm:$0xff]  }
   0x7   :  { %455 = vmatpush3.bf16.msra.mxu0 %v501_v1  ;;  %493 = vmatpush3.bf16.msra.mxu1 %v501_v1  ;;  %v419_v15 = vcombine.low %v84_v11, %v85_v12  ;;  %v92_v16 = vsel %vm60_vm2, %v44_v6, %v76_v10  ;;  %v93_v17 = vsel %vm61_vm3, %v45_v9, %v77_v13  ;;  %v46_v23 = vld [vmem:[%s656_s0 + $0x28] sm:$0xf]  ;;  %v47_v24 = vld [vmem:[%s656_s0 + $0x2c] sm:$0xf]  ;;  %v70_v25 = vmul.bf16 1045249613, %v38_v20 }
   0x8   :  { %456 = vmatprep.subr.bf16.mxu0 %v502_v2  ;;  %486 = vmatprep.subr.bf16.mxu1 %v502_v2  ;;  %v423_v18 = vcombine.low %v92_v16, %v93_v17  ;;  %v40_v26 = vld [vmem:[%s656_s0 + $0x10] sm:$0xf]  ;;  %v41_v27 = vld [vmem:[%s656_s0 + $0x14] sm:$0xf]  ;;  %vm54_vm4 = vcmp.ge.bf16.partialorder %v38_v20, 0  ;;  %vm55_vm5 = vcmp.ge.bf16.partialorder %v39_v21, 0 }
   0x9   :  { %468 = vmatprep.mubr.bf16.mxu0 %v419_v15  ;;  %v48_v28 = vld [vmem:[%s656_s0 + $0x30] sm:$0xf]  ;;  %v49_v29 = vld [vmem:[%s656_s0 + $0x34] sm:$0xf]  ;;  %v507_v30 = vld [vmem:[%s655_s1 + $0x38] sm:$0xff]   ;;  %vm62_vm6 = vcmp.ge.bf16.partialorder %v46_v23, 0  ;;  %v86_v38 = vsel %vm54_vm4, %v38_v20, %v70_v25 }
   0xa   :  { %476 = vmatprep.mubr.bf16.mxu1 %v423_v18  ;;  %v71_v31 = vmul.bf16 1045249613, %v39_v21  ;;  %vm63_vm7 = vcmp.ge.bf16.partialorder %v47_v24, 0  ;;  %v78_v32 = vmul.bf16 1045249613, %v46_v23  ;;  %vm56_vm8 = vcmp.ge.bf16.partialorder %v40_v26, 0 }
   0xb   :  { %457 = vmatpush3.bf16.msra.mxu0 %v502_v2  ;;  %494 = vmatpush3.bf16.msra.mxu1 %v502_v2  ;;  %v79_v33 = vmul.bf16 1045249613, %v47_v24  ;;  %v72_v34 = vmul.bf16 1045249613, %v40_v26  ;;  %v73_v35 = vmul.bf16 1045249613, %v41_v27 }
   0xc   :  { %458 = vmatprep.subr.bf16.mxu0 %v503_v3  ;;  %487 = vmatprep.subr.bf16.mxu1 %v503_v3  ;;  %vm57_vm9 = vcmp.ge.bf16.partialorder %v41_v27, 0  ;;  %v80_v36 = vmul.bf16 1045249613, %v48_v28  ;;  %v81_v37 = vmul.bf16 1045249613, %v49_v29  ;;  %vm64_vm10 = vcmp.ge.bf16.partialorder %v48_v28, 0 }
   0xd   :  { %vm65_vm11 = vcmp.ge.bf16.partialorder %v49_v29, 0  ;;  %v87_v39 = vsel %vm55_vm5, %v39_v21, %v71_v31  ;;  %v94_v40 = vsel %vm62_vm6, %v46_v23, %v78_v32  ;;  %v95_v41 = vsel %vm63_vm7, %v47_v24, %v79_v33  ;;  %v42_v44 = vld [vmem:[%s656_s0 + $0x18] sm:$0xf]  ;;  %v43_v47 = vld [vmem:[%s656_s0 + $0x1c] sm:$0xf] }
   0xe   :  { %v88_v42 = vsel %vm56_vm8, %v40_v26, %v72_v34  ;;  %v89_v43 = vsel %vm57_vm9, %v41_v27, %v73_v35  ;;  %v96_v45 = vsel %vm64_vm10, %v48_v28, %v80_v36  ;;  %v97_v46 = vsel %vm65_vm11, %v49_v29, %v81_v37  ;;  %v50_v48 = vld [vmem:[%s656_s0 + $0x38] sm:$0xf]  ;;  %v51_v49 = vld [vmem:[%s656_s0 + $0x3c] sm:$0xf]  ;;  %v435_v0 = vld [vmem:[%s657_s2] ss:$0 sm:$0xff] }
   0xf   :  { %459 = vmatpush3.bf16.msra.mxu0 %v503_v3  ;;  %495 = vmatpush3.bf16.msra.mxu1 %v503_v3  ;;  %v420_v50 = vcombine.low %v86_v38, %v87_v39  ;;  %v424_v51 = vcombine.low %v94_v40, %v95_v41  ;;  %v421_v52 = vcombine.low %v88_v42, %v89_v43  ;;  %vm58_vm12 = vcmp.ge.bf16.partialorder %v42_v44, 0 }
  0x10   :  { %460 = vmatprep.subr.bf16.mxu0 %v504_v14  ;;  %488 = vmatprep.subr.bf16.mxu1 %v504_v14  ;;  %v74_v53 = vmul.bf16 1045249613, %v42_v44  ;;  %v425_v54 = vcombine.low %v96_v45, %v97_v46  ;;  %v75_v55 = vmul.bf16 1045249613, %v43_v47  ;;  %v82_v56 = vmul.bf16 1045249613, %v50_v48 }
  0x11   :  { %v83_v57 = vmul.bf16 1045249613, %v51_v49  ;;  %vm59_vm13 = vcmp.ge.bf16.partialorder %v43_v47, 0  ;;  %vm66_vm14 = vcmp.ge.bf16.partialorder %v50_v48, 0  ;;  %vm67_vm15 = vcmp.ge.bf16.partialorder %v51_v49, 0 }
  0x12   :  { %v90_v58 = vsel %vm58_vm12, %v42_v44, %v74_v53  ;;  %v91_v59 = vsel %vm59_vm13, %v43_v47, %v75_v55  ;;  %v98_v60 = vsel %vm66_vm14, %v50_v48, %v82_v56 }
  0x13   :  { %461 = vmatpush3.bf16.msra.mxu0 %v504_v14  ;;  %496 = vmatpush3.bf16.msra.mxu1 %v504_v14  ;;  %v99_v61 = vsel %vm67_vm15, %v51_v49, %v83_v57  ;;  %v422_v62 = vcombine.low %v90_v58, %v91_v59 }
  0x14   :  { %462 = vmatprep.subr.bf16.mxu0 %v505_v19  ;;  %489 = vmatprep.subr.bf16.mxu1 %v505_v19  ;;  %v426_v63 = vcombine.low %v98_v60, %v99_v61 }
  0x17   :  { %463 = vmatpush3.bf16.msra.mxu0 %v505_v19  ;;  %497 = vmatpush3.bf16.msra.mxu1 %v505_v19 }
  0x18   :  { %464 = vmatprep.subr.bf16.mxu0 %v506_v22  ;;  %490 = vmatprep.subr.bf16.mxu1 %v506_v22 }
  0x1b   :  { %465 = vmatpush3.bf16.msra.mxu0 %v506_v22  ;;  %498 = vmatpush3.bf16.msra.mxu1 %v506_v22 }
  0x1c   :  { %466 = vmatprep.subr.bf16.mxu0 %v507_v30  ;;  %491 = vmatprep.subr.bf16.mxu1 %v507_v30 }
  0x1f   :  { %467 = vmatpush3.bf16.msra.mxu0 %v507_v30  ;;  %499 = vmatpush3.bf16.msra.mxu1 %v507_v30 }
  0x22   :  { %469 = vmatmul.mubr.bf16.vlgmr.msra.gmra.mrb[0].mxu0 %v420_v50  ;;  %477 = vmatmul.mubr.bf16.vlgmr.msra.gmra.mrb[0].mxu1 %v424_v51 }
  0x23   :  { %472 = vmatprep.mubr.bf16.mxu0 %v421_v52  ;;  %480 = vmatprep.mubr.bf16.mxu1 %v425_v54 }
  0x2a   :  { %473 = vmatmul.mubr.bf16.gmra.mrb[4].mxu0 %v422_v62  ;;  %481 = vmatmul.mubr.bf16.gmra.mrb[4].mxu1 %v426_v63 }
  0xf5   :  { %v470_v1 = vpop.f32.mrb[0].mxu0  ;;  %v478_v2 = vpop.f32.mrb[0].mxu1 }
  0xf6   :  { %v385_v3 = vadd.f32 %v470_v1, %v435_v0  ;;  %v393_v4 = vadd.f32 %v478_v2, %v435_v0  ;;  %v262_v5 = vpop.f32.mrb[1].mxu0  ;;  %v294_v6 = vpop.f32.mrb[1].mxu1 }
  0xf7   :  { %v383_v7 = vadd.f32 %v435_v0, %v262_v5  ;;  %v391_v8 = vadd.f32 %v435_v0, %v294_v6  ;;  %v471_v9 = vpop.f32.mrb[2].mxu0  ;;  %v479_v10 = vpop.f32.mrb[2].mxu1 }
  0xf8   :  { %401 = vst [vmem:[%s658_s3 + $0x10] sm:$0xff] %v385_v3  ;;  %409 = vst [vmem:[%s658_s3 + $0x50] sm:$0xff] %v393_v4  ;;  %v386_v11 = vadd.f32 %v471_v9, %v435_v0  ;;  %v394_v12 = vadd.f32 %v479_v10, %v435_v0  ;;  %v265_v13 = vpop.f32.mrb[3].mxu0  ;;  %v297_v14 = vpop.f32.mrb[3].mxu1 }
  0xf9   :  { %399 = vst [vmem:[%s658_s3] sm:$0xff] %v383_v7  ;;  %407 = vst [vmem:[%s658_s3 + $0x40] sm:$0xff] %v391_v8  ;;  %v384_v15 = vadd.f32 %v435_v0, %v265_v13  ;;  %v392_v16 = vadd.f32 %v435_v0, %v297_v14 }
  0xfa   :  { %402 = vst [vmem:[%s658_s3 + $0x18] sm:$0xff] %v386_v11  ;;  %410 = vst [vmem:[%s658_s3 + $0x58] sm:$0xff] %v394_v12 }
  0xfb   :  { %400 = vst [vmem:[%s658_s3 + $0x8] sm:$0xff] %v384_v15  ;;  %408 = vst [vmem:[%s658_s3 + $0x48] sm:$0xff] %v392_v16 }
  0xfd   :  { %v474_v17 = vpop.f32.mrb[4].mxu0  ;;  %v482_v18 = vpop.f32.mrb[4].mxu1 }
  0xfe   :  { %v389_v19 = vadd.f32 %v474_v17, %v435_v0  ;;  %v397_v20 = vadd.f32 %v482_v18, %v435_v0  ;;  %v278_v21 = vpop.f32.mrb[5].mxu0  ;;  %v310_v22 = vpop.f32.mrb[5].mxu1 }
  0xff   :  { %v387_v23 = vadd.f32 %v435_v0, %v278_v21  ;;  %v395_v24 = vadd.f32 %v435_v0, %v310_v22  ;;  %v475_v25 = vpop.f32.mrb[6].mxu0  ;;  %v483_v26 = vpop.f32.mrb[6].mxu1 }
 0x100   :  { %405 = vst [vmem:[%s658_s3 + $0x30] sm:$0xff] %v389_v19  ;;  %413 = vst [vmem:[%s658_s3 + $0x70] sm:$0xff] %v397_v20  ;;  %v390_v27 = vadd.f32 %v475_v25, %v435_v0  ;;  %v398_v28 = vadd.f32 %v483_v26, %v435_v0  ;;  %v281_v29 = vpop.f32.mrb[7].mxu0  ;;  %v313_v30 = vpop.f32.mrb[7].mxu1 }
 0x101   :  { %403 = vst [vmem:[%s658_s3 + $0x20] sm:$0xff] %v387_v23  ;;  %411 = vst [vmem:[%s658_s3 + $0x60] sm:$0xff] %v395_v24  ;;  %v388_v31 = vadd.f32 %v435_v0, %v281_v29  ;;  %v396_v32 = vadd.f32 %v435_v0, %v313_v30 }
 0x102   :  { %406 = vst [vmem:[%s658_s3 + $0x38] sm:$0xff] %v390_v27  ;;  %414 = vst [vmem:[%s658_s3 + $0x78] sm:$0xff] %v398_v28 }
 0x103   :  { %404 = vst [vmem:[%s658_s3 + $0x28] sm:$0xff] %v388_v31  ;;  %412 = vst [vmem:[%s658_s3 + $0x68] sm:$0xff] %v396_v32 }

// kernel: _lambda_.27
= control target key start
LH: loop header
LB: loop body
LE: loop exit
PB: predicated region body
PF: predicated region fallthrough
CT: control target
= control target key end

     0   :  { %v42_v4 = vlaneseq  ;;  %s285_s1 = inlined_call_operand.vmem [shape: f32[2,128], index: 1, kind: input, shape index: {}]   ;;  %s286_s0 = inlined_call_operand.vmem [shape: f32[128,128], index: 0, kind: input, shape index: {}]   ;;  %s287_s2 = inlined_call_operand.vmem [shape: f32[1,128], index: 2, kind: input, shape index: {}]   ;;  %s288_s3 = inlined_call_operand.vmem [shape: f32[1,128], index: 3, kind: input, shape index: {}]   ;;  %s289_s4 = inlined_call_operand.vmem [shape: f32[128,128], index: 4, kind: output, shape index: {}]  }
   0x1   :  { %v33_v0 = vld [vmem:[%s285_s1] sm:$0x3]  ;;  %v18_v12 = vld [vmem:[%s286_s0 + $0x8] sm:$0xff]  ;;  %v19_v13 = vld [vmem:[%s286_s0 + $0x10] sm:$0xff] }
   0x2   :  { %v34_v1 = vmul.f32 0.0078125, %v33_v0  ;;  %v43_v7 = vshrl.u32 %v42_v4, 7  ;;  %v17_v9 = vld [vmem:[%s286_s0] sm:$0xff]  ;;  %v20_v14 = vld [vmem:[%s286_s0 + $0x18] sm:$0xff]  ;;  %v22_v16 = vld [vmem:[%s286_s0 + $0x28] sm:$0xff] }
   0x3   :  { %v133_v11 = vld [vmem:[%s287_s2] ss:$0 sm:$0xff]  ;;  %v23_v17 = vld [vmem:[%s286_s0 + $0x30] sm:$0xff]  ;;  %v24_v19 = vld [vmem:[%s286_s0 + $0x38] sm:$0xff] }
   0x4   :  { %v35_v2 = vmul.f32 %v34_v1, %v34_v1  ;;  %v44_v8 = vsub.s32 0, %v43_v7  ;;  %v21_v15 = vld [vmem:[%s286_s0 + $0x20] sm:$0xff]  ;;  %v72_v18 = vsub.s32 1, %v43_v7  ;;  %v26_v21 = vld [vmem:[%s286_s0 + $0x48] sm:$0xff]  ;;  %v27_v25 = vld [vmem:[%s286_s0 + $0x50] sm:$0xff] }
   0x5   :  { %v25_v20 = vld [vmem:[%s286_s0 + $0x40] sm:$0xff]  ;;  %v28_v26 = vld [vmem:[%s286_s0 + $0x58] sm:$0xff]  ;;  %v30_v32 = vld [vmem:[%s286_s0 + $0x68] sm:$0xff] }
   0x6   :  { %v37_v3 = vrot.slane %v35_v2, 7  ;;  %v168_v10 = vrot.slane %v34_v1, %v44_v8  ;;  %v29_v27 = vld [vmem:[%s286_s0 + $0x60] sm:$0xff]  ;;  %v31_v33 = vld [vmem:[%s286_s0 + $0x70] sm:$0xff]  ;;  %v32_v34 = vld [vmem:[%s286_s0 + $0x78] sm:$0xff] }
   0x7   :  { %v134_v43 = vld [vmem:[%s288_s3] ss:$0 sm:$0xff] }
   0x8   :  { %v39_v5 = vsub.f32 %v34_v1, %v37_v3  ;;  %v46_v23 = vsub.f32 %v17_v9, %v168_v10  ;;  %v47_v24 = vsub.f32 %v18_v12, %v168_v10  ;;  %v48_v29 = vsub.f32 %v19_v13, %v168_v10 }
   0x9   :  { %v49_v30 = vsub.f32 %v20_v14, %v168_v10  ;;  %v50_v31 = vsub.f32 %v21_v15, %v168_v10  ;;  %v51_v35 = vsub.f32 %v22_v16, %v168_v10  ;;  %v52_v36 = vsub.f32 %v23_v17, %v168_v10 }
   0xa   :  { %v40_v6 = vadd.f32 1e-05, %v39_v5  ;;  %v53_v37 = vsub.f32 %v24_v19, %v168_v10  ;;  %v54_v38 = vsub.f32 %v25_v20, %v168_v10  ;;  %v55_v40 = vsub.f32 %v26_v21, %v168_v10 }
   0xb   :  { %v56_v41 = vsub.f32 %v27_v25, %v168_v10  ;;  %v57_v42 = vsub.f32 %v28_v26, %v168_v10  ;;  %v58_v44 = vsub.f32 %v29_v27, %v168_v10  ;;  %v59_v45 = vsub.f32 %v30_v32, %v168_v10 }
   0xc   :  { %135 = vrsqrt.f32 %v40_v6  ;;  %v60_v46 = vsub.f32 %v31_v33, %v168_v10  ;;  %v61_v47 = vsub.f32 %v32_v34, %v168_v10 }
  0x16   :  { %v136_v22 = vpop.eup %135 }
  0x17   :  { %v69_v28 = vmul.f32 %v136_v22, %v133_v11 }
  0x19   :  { %v73_v39 = vrot.slane %v69_v28, %v72_v18 }
  0x1b   :  { %v74_v48 = vmul.f32 %v73_v39, %v46_v23  ;;  %v75_v49 = vmul.f32 %v73_v39, %v47_v24  ;;  %v76_v50 = vmul.f32 %v73_v39, %v48_v29  ;;  %v77_v51 = vmul.f32 %v73_v39, %v49_v30 }
  0x1c   :  { %v78_v52 = vmul.f32 %v73_v39, %v50_v31  ;;  %v79_v53 = vmul.f32 %v73_v39, %v51_v35  ;;  %v80_v54 = vmul.f32 %v73_v39, %v52_v36  ;;  %v81_v55 = vmul.f32 %v73_v39, %v53_v37 }
  0x1d   :  { %v97_v56 = vadd.f32 %v134_v43, %v74_v48  ;;  %v98_v57 = vadd.f32 %v134_v43, %v75_v49  ;;  %v99_v58 = vadd.f32 %v134_v43, %v76_v50  ;;  %v100_v59 = vadd.f32 %v134_v43, %v77_v51 }
  0x1e   :  { %v101_v60 = vadd.f32 %v134_v43, %v78_v52  ;;  %v102_v61 = vadd.f32 %v134_v43, %v79_v53  ;;  %v103_v62 = vadd.f32 %v134_v43, %v80_v54  ;;  %v104_v63 = vadd.f32 %v134_v43, %v81_v55 }
  0x1f   :  { %113 = vst [vmem:[%s289_s4] sm:$0xff] %v97_v56  ;;  %114 = vst [vmem:[%s289_s4 + $0x8] sm:$0xff] %v98_v57  ;;  %v82_v0 = vmul.f32 %v73_v39, %v54_v38  ;;  %v83_v1 = vmul.f32 %v73_v39, %v55_v40  ;;  %v84_v2 = vmul.f32 %v73_v39, %v56_v41 }
  0x20   :  { %115 = vst [vmem:[%s289_s4 + $0x10] sm:$0xff] %v99_v58  ;;  %116 = vst [vmem:[%s289_s4 + $0x18] sm:$0xff] %v100_v59  ;;  %v85_v3 = vmul.f32 %v73_v39, %v57_v42  ;;  %v86_v4 = vmul.f32 %v73_v39, %v58_v44  ;;  %v87_v5 = vmul.f32 %v73_v39, %v59_v45 }
  0x21   :  { %117 = vst [vmem:[%s289_s4 + $0x20] sm:$0xff] %v101_v60  ;;  %118 = vst [vmem:[%s289_s4 + $0x28] sm:$0xff] %v102_v61  ;;  %v88_v6 = vmul.f32 %v73_v39, %v60_v46  ;;  %v89_v7 = vmul.f32 %v73_v39, %v61_v47  ;;  %v105_v8 = vadd.f32 %v134_v43, %v82_v0 }
  0x22   :  { %119 = vst [vmem:[%s289_s4 + $0x30] sm:$0xff] %v103_v62  ;;  %120 = vst [vmem:[%s289_s4 + $0x38] sm:$0xff] %v104_v63  ;;  %v106_v9 = vadd.f32 %v134_v43, %v83_v1  ;;  %v107_v10 = vadd.f32 %v134_v43, %v84_v2  ;;  %v108_v11 = vadd.f32 %v134_v43, %v85_v3 }
  0x23   :  { %v109_v12 = vadd.f32 %v134_v43, %v86_v4  ;;  %v110_v13 = vadd.f32 %v134_v43, %v87_v5  ;;  %v111_v14 = vadd.f32 %v134_v43, %v88_v6  ;;  %v112_v15 = vadd.f32 %v134_v43, %v89_v7  ;;  %121 = vst [vmem:[%s289_s4 + $0x40] sm:$0xff] %v105_v8 }
  0x24   :  { %122 = vst [vmem:[%s289_s4 + $0x48] sm:$0xff] %v106_v9  ;;  %123 = vst [vmem:[%s289_s4 + $0x50] sm:$0xff] %v107_v10 }
  0x25   :  { %124 = vst [vmem:[%s289_s4 + $0x58] sm:$0xff] %v108_v11  ;;  %125 = vst [vmem:[%s289_s4 + $0x60] sm:$0xff] %v109_v12 }
  0x26   :  { %126 = vst [vmem:[%s289_s4 + $0x68] sm:$0xff] %v110_v13  ;;  %127 = vst [vmem:[%s289_s4 + $0x70] sm:$0xff] %v111_v14 }
  0x27   :  { %128 = vst [vmem:[%s289_s4 + $0x78] sm:$0xff] %v112_v15 }

// kernel: _lambda_.28
= control target key start
LH: loop header
LB: loop body
LE: loop exit
PB: predicated region body
PF: predicated region fallthrough
CT: control target
= control target key end

     0   :  { %s451_s1 = inlined_call_operand.vmem [shape: bf16[256,128], index: 1, kind: input, shape index: {}]   ;;  %s452_s0 = inlined_call_operand.vmem [shape: bf16[32,256], index: 0, kind: input, shape index: {}]   ;;  %s453_s2 = inlined_call_operand.vmem [shape: f32[1,128], index: 2, kind: input, shape index: {}]   ;;  %s454_s3 = inlined_call_operand.vmem [shape: f32[32,128], index: 3, kind: output, shape index: {}]  }
   0x1   :  { %v340_v0 = vld [vmem:[%s451_s1 + $0x40] sm:$0xff]   ;;  %v342_v2 = vld [vmem:[%s451_s1 + $0x48] sm:$0xff]   ;;  %v344_v4 = vld [vmem:[%s451_s1 + $0x50] sm:$0xff]  }
   0x2   :  { %v341_v1 = vld [vmem:[%s451_s1] sm:$0xff]   ;;  %296 = vmatprep.subr.bf16.mxu0 %v340_v0  ;;  %324 = vmatprep.subr.bf16.mxu1 %v340_v0  ;;  %v343_v3 = vld [vmem:[%s451_s1 + $0x8] sm:$0xff]   ;;  %v345_v5 = vld [vmem:[%s451_s1 + $0x10] sm:$0xff]  }
   0x3   :  { %297 = vmatpush3.bf16.msra.mxu0 %v341_v1  ;;  %332 = vmatpush3.bf16.msra.mxu1 %v341_v1  ;;  %v346_v6 = vld [vmem:[%s451_s1 + $0x58] sm:$0xff]   ;;  %v348_v8 = vld [vmem:[%s451_s1 + $0x60] sm:$0xff]   ;;  %v350_v10 = vld [vmem:[%s451_s1 + $0x68] sm:$0xff]  }
   0x4   :  { %298 = vmatprep.subr.bf16.mxu0 %v342_v2  ;;  %325 = vmatprep.subr.bf16.mxu1 %v342_v2  ;;  %v347_v7 = vld [vmem:[%s451_s1 + $0x18] sm:$0xff]   ;;  %v349_v9 = vld [vmem:[%s451_s1 + $0x20] sm:$0xff]   ;;  %v25_v12 = vld [vmem:[%s452_s0 + $0x8] sm:$0xff] }
   0x5   :  { %v24_v11 = vld [vmem:[%s452_s0] sm:$0xff]  ;;  %v26_v13 = vld [vmem:[%s452_s0 + $0x10] sm:$0xff]  ;;  %vm29_vm1 = vcmp.ge.bf16.partialorder %v25_v12, 0  ;;  %v33_v15 = vmul.bf16 1045249613, %v25_v12  ;;  %v27_v16 = vld [vmem:[%s452_s0 + $0x18] sm:$0xff] }
   0x6   :  { %vm28_vm0 = vcmp.ge.bf16.partialorder %v24_v11, 0  ;;  %v32_v14 = vmul.bf16 1045249613, %v24_v11  ;;  %vm30_vm2 = vcmp.ge.bf16.partialorder %v26_v13, 0  ;;  %v34_v17 = vmul.bf16 1045249613, %v26_v13 }
   0x7   :  { %299 = vmatpush3.bf16.msra.mxu0 %v343_v3  ;;  %333 = vmatpush3.bf16.msra.mxu1 %v343_v3  ;;  %v351_v18 = vld [vmem:[%s451_s1 + $0x28] sm:$0xff]   ;;  %v37_v20 = vsel %vm29_vm1, %v25_v12, %v33_v15  ;;  %vm31_vm3 = vcmp.ge.bf16.partialorder %v27_v16, 0  ;;  %v35_v21 = vmul.bf16 1045249613, %v27_v16  ;;  %v352_v22 = vld [vmem:[%s451_s1 + $0x70] sm:$0xff]   ;;  %v354_v28 = vld [vmem:[%s451_s1 + $0x78] sm:$0xff]  }
   0x8   :  { %300 = vmatprep.subr.bf16.mxu0 %v344_v4  ;;  %326 = vmatprep.subr.bf16.mxu1 %v344_v4  ;;  %v36_v19 = vsel %vm28_vm0, %v24_v11, %v32_v14  ;;  %v38_v24 = vsel %vm30_vm2, %v26_v13, %v34_v17  ;;  %v353_v27 = vld [vmem:[%s451_s1 + $0x30] sm:$0xff]   ;;  %v355_v29 = vld [vmem:[%s451_s1 + $0x38] sm:$0xff]   ;;  %v295_v35 = vld [vmem:[%s453_s2] ss:$0 sm:$0xff] }
   0x9   :  { %v276_v23 = vcombine.high %v36_v19, %v37_v20  ;;  %v39_v25 = vsel %vm31_vm3, %v27_v16, %v35_v21  ;;  %v275_v30 = vcombine.low %v36_v19, %v37_v20 }
   0xa   :  { %v278_v26 = vcombine.high %v38_v24, %v39_v25  ;;  %v277_v31 = vcombine.low %v38_v24, %v39_v25 }
   0xb   :  { %301 = vmatpush3.bf16.msra.mxu0 %v345_v5  ;;  %334 = vmatpush3.bf16.msra.mxu1 %v345_v5 }
   0xc   :  { %302 = vmatprep.subr.bf16.mxu0 %v346_v6  ;;  %327 = vmatprep.subr.bf16.mxu1 %v346_v6 }
   0xd   :  { %224 = vmatprep.mubr.bf16.mxu0 %v276_v23  ;;  %232 = vmatprep.mubr.bf16.mxu1 %v278_v26 }
   0xf   :  { %303 = vmatpush3.bf16.msra.mxu0 %v347_v7  ;;  %335 = vmatpush3.bf16.msra.mxu1 %v347_v7 }
  0x10   :  { %304 = vmatprep.subr.bf16.mxu0 %v348_v8  ;;  %328 = vmatprep.subr.bf16.mxu1 %v348_v8 }
  0x13   :  { %305 = vmatpush3.bf16.msra.mxu0 %v349_v9  ;;  %336 = vmatpush3.bf16.msra.mxu1 %v349_v9 }
  0x14   :  { %306 = vmatprep.subr.bf16.mxu0 %v350_v10  ;;  %329 = vmatprep.subr.bf16.mxu1 %v350_v10 }
  0x17   :  { %307 = vmatpush3.bf16.msra.mxu0 %v351_v18  ;;  %337 = vmatpush3.bf16.msra.mxu1 %v351_v18 }
  0x18   :  { %308 = vmatprep.subr.bf16.mxu0 %v352_v22  ;;  %330 = vmatprep.subr.bf16.mxu1 %v352_v22 }
  0x1b   :  { %309 = vmatpush3.bf16.msra.mxu0 %v353_v27  ;;  %338 = vmatpush3.bf16.msra.mxu1 %v353_v27 }
  0x1c   :  { %310 = vmatprep.subr.bf16.mxu0 %v354_v28  ;;  %331 = vmatprep.subr.bf16.mxu1 %v354_v28 }
  0x1f   :  { %311 = vmatpush3.bf16.msra.mxu0 %v355_v29  ;;  %339 = vmatpush3.bf16.msra.mxu1 %v355_v29 }
  0x22   :  { %225 = vmatmul.mubr.bf16.vlgmr.msra.gmra.mrb[0].mxu0 %v275_v30  ;;  %233 = vmatmul.mubr.bf16.vlgmr.msra.gmra.mrb[0].mxu1 %v277_v31 }
  0xf5   :  { %v312_v32 = vpop.f32.mrb[0].mxu0  ;;  %v318_v33 = vpop.f32.mrb[0].mxu1 }
  0xf6   :  { %v313_v34 = vpop.f32.mrb[1].mxu0  ;;  %v319_v36 = vpop.f32.mrb[1].mxu1 }
  0xf7   :  { %v314_v37 = vadd.f32 %v313_v34, %v312_v32  ;;  %v320_v38 = vadd.f32 %v319_v36, %v318_v33  ;;  %v315_v39 = vpop.f32.mrb[2].mxu0  ;;  %v321_v40 = vpop.f32.mrb[2].mxu1 }
  0xf8   :  { %v316_v41 = vpop.f32.mrb[3].mxu0  ;;  %v322_v42 = vpop.f32.mrb[3].mxu1 }
  0xf9   :  { %v263_v43 = vadd.f32 %v314_v37, %v295_v35  ;;  %v265_v44 = vadd.f32 %v320_v38, %v295_v35  ;;  %v317_v45 = vadd.f32 %v316_v41, %v315_v39  ;;  %v323_v46 = vadd.f32 %v322_v42, %v321_v40 }
  0xfb   :  { %267 = vst [vmem:[%s454_s3] sm:$0xff] %v263_v43  ;;  %269 = vst [vmem:[%s454_s3 + $0x10] sm:$0xff] %v265_v44  ;;  %v264_v47 = vadd.f32 %v317_v45, %v295_v35  ;;  %v266_v48 = vadd.f32 %v323_v46, %v295_v35 }
  0xfd   :  { %268 = vst [vmem:[%s454_s3 + $0x8] sm:$0xff] %v264_v47  ;;  %270 = vst [vmem:[%s454_s3 + $0x18] sm:$0xff] %v266_v48 }

// kernel: _lambda_.29
= control target key start
LH: loop header
LB: loop body
LE: loop exit
PB: predicated region body
PF: predicated region fallthrough
CT: control target
= control target key end

     0   :  { %v49_v0 = vmov 0.0   ;;  %vm40_vm0 = vcmask 1040384   ;;  %s81_s1 = inlined_call_operand.vmem [shape: f32[2,128], index: 1, kind: output, shape index: {}]   ;;  %s82_s0 = inlined_call_operand.vmem [shape: f32[32,128], index: 0, kind: input, shape index: {}]  }
   0x1   :  { %12 = vst [vmem:[%s81_s1] sm:$0x3] %v49_v0  ;;  %v13_v1 = vld [vmem:[%s82_s0] sm:$0xff]  ;;  %v14_v2 = vld [vmem:[%s82_s0 + $0x8] sm:$0xff]  ;;  %v15_v3 = vld [vmem:[%s82_s0 + $0x10] sm:$0xff] }
   0x2   :  { %v16_v4 = vld [vmem:[%s82_s0 + $0x18] sm:$0xff]  ;;  %v18_v5 = vadd.f32 %v14_v2, %v13_v1  ;;  %v27_v6 = vmul.f32 %v13_v1, %v13_v1  ;;  %v28_v7 = vmul.f32 %v14_v2, %v14_v2  ;;  %v29_v8 = vmul.f32 %v15_v3, %v15_v3 }
   0x3   :  { %v30_v10 = vmul.f32 %v16_v4, %v16_v4 }
   0x4   :  { %v19_v9 = vadd.f32 %v18_v5, %v15_v3  ;;  %v31_v11 = vadd.f32 %v28_v7, %v27_v6 }
   0x6   :  { %v20_v12 = vadd.f32 %v19_v9, %v16_v4  ;;  %v32_v13 = vadd.f32 %v31_v11, %v29_v8 }
   0x8   :  { %v21_v14 = vrot.slane %v20_v12, 4  ;;  %v33_v15 = vadd.f32 %v32_v13, %v30_v10  ;;  %v17_v26 = vld [vmem:[%s81_s1] sm:$0x3] }
   0xa   :  { %v22_v16 = vadd.f32 %v21_v14, %v20_v12  ;;  %v34_v17 = vrot.slane %v33_v15, 4 }
   0xc   :  { %v23_v18 = vrot.slane %v22_v16, 2  ;;  %v35_v19 = vadd.f32 %v34_v17, %v33_v15 }
   0xe   :  { %v24_v20 = vadd.f32 %v23_v18, %v22_v16  ;;  %v36_v21 = vrot.slane %v35_v19, 2 }
  0x10   :  { %v25_v22 = vrot.slane %v24_v20, 1  ;;  %v37_v23 = vadd.f32 %v36_v21, %v35_v19 }
  0x12   :  { %v26_v24 = vadd.f32 %v25_v22, %v24_v20  ;;  %v38_v25 = vrot.slane %v37_v23, 1 }
  0x14   :  { %v39_v27 = vadd.f32 %v38_v25, %v37_v23 }
  0x16   :  { %v41_v28 = vsel %vm40_vm0, %v26_v24, %v39_v27 }
  0x17   :  { %v42_v29 = vadd.f32 %v41_v28, %v17_v26 }
  0x19   :  { %43 = vst [vmem:[%s81_s1] sm:$0x3] %v42_v29 }

// kernel: _lambda_.30
= control target key start
LH: loop header
LB: loop body
LE: loop exit
PB: predicated region body
PF: predicated region fallthrough
CT: control target
= control target key end

     0   :  { %v30_v4 = vlaneseq  ;;  %s135_s1 = inlined_call_operand.vmem [shape: f32[2,128], index: 1, kind: input, shape index: {}]   ;;  %s136_s0 = inlined_call_operand.vmem [shape: f32[32,128], index: 0, kind: input, shape index: {}]   ;;  %s137_s2 = inlined_call_operand.vmem [shape: f32[1,128], index: 2, kind: input, shape index: {}]   ;;  %s138_s3 = inlined_call_operand.vmem [shape: f32[1,128], index: 3, kind: input, shape index: {}]   ;;  %s139_s4 = inlined_call_operand.vmem [shape: f32[32,128], index: 4, kind: output, shape index: {}]  }
   0x1   :  { %v21_v0 = vld [vmem:[%s135_s1] sm:$0x3]  ;;  %v18_v12 = vld [vmem:[%s136_s0 + $0x8] sm:$0xff]  ;;  %v19_v13 = vld [vmem:[%s136_s0 + $0x10] sm:$0xff] }
   0x2   :  { %v22_v1 = vmul.f32 0.03125, %v21_v0  ;;  %v31_v7 = vshrl.u32 %v30_v4, 7  ;;  %v17_v10 = vld [vmem:[%s136_s0] sm:$0xff]  ;;  %v20_v14 = vld [vmem:[%s136_s0 + $0x18] sm:$0xff] }
   0x3   :  { %v73_v11 = vld [vmem:[%s137_s2] ss:$0 sm:$0xff] }
   0x4   :  { %v23_v2 = vmul.f32 %v22_v1, %v22_v1  ;;  %v32_v8 = vsub.s32 0, %v31_v7  ;;  %v48_v15 = vsub.s32 1, %v31_v7  ;;  %v74_v23 = vld [vmem:[%s138_s3] ss:$0 sm:$0xff] }
   0x6   :  { %v25_v3 = vrot.slane %v23_v2, 7  ;;  %v33_v9 = vrot.slane %v22_v1, %v32_v8 }
   0x8   :  { %v27_v5 = vsub.f32 %v22_v1, %v25_v3  ;;  %v34_v17 = vsub.f32 %v17_v10, %v33_v9  ;;  %v35_v19 = vsub.f32 %v18_v12, %v33_v9  ;;  %v36_v20 = vsub.f32 %v19_v13, %v33_v9 }
   0x9   :  { %v37_v21 = vsub.f32 %v20_v14, %v33_v9 }
   0xa   :  { %v28_v6 = vadd.f32 1e-05, %v27_v5 }
   0xc   :  { %75 = vrsqrt.f32 %v28_v6 }
  0x16   :  { %v76_v16 = vpop.eup %75 }
  0x17   :  { %v45_v18 = vmul.f32 %v76_v16, %v73_v11 }
  0x19   :  { %v49_v22 = vrot.slane %v45_v18, %v48_v15 }
  0x1b   :  { %v50_v24 = vmul.f32 %v49_v22, %v34_v17  ;;  %v51_v25 = vmul.f32 %v49_v22, %v35_v19  ;;  %v52_v26 = vmul.f32 %v49_v22, %v36_v20  ;;  %v53_v27 = vmul.f32 %v49_v22, %v37_v21 }
  0x1d   :  { %v61_v28 = vadd.f32 %v74_v23, %v50_v24  ;;  %v62_v29 = vadd.f32 %v74_v23, %v51_v25  ;;  %v63_v30 = vadd.f32 %v74_v23, %v52_v26  ;;  %v64_v31 = vadd.f32 %v74_v23, %v53_v27 }
  0x1f   :  { %65 = vst [vmem:[%s139_s4] sm:$0xff] %v61_v28  ;;  %66 = vst [vmem:[%s139_s4 + $0x8] sm:$0xff] %v62_v29 }
  0x20   :  { %67 = vst [vmem:[%s139_s4 + $0x10] sm:$0xff] %v63_v30  ;;  %68 = vst [vmem:[%s139_s4 + $0x18] sm:$0xff] %v64_v31 }

// kernel: _lambda_.32
= control target key start
LH: loop header
LB: loop body
LE: loop exit
PB: predicated region body
PF: predicated region fallthrough
CT: control target
= control target key end

     0   :  { %v37_v0 = vmov 0.0   ;;  %vm28_vm0 = vcmask 1040384   ;;  %s60_s1 = inlined_call_operand.vmem [shape: f32[2,128], index: 1, kind: output, shape index: {}]   ;;  %s61_s0 = inlined_call_operand.vmem [shape: f32[8,128], index: 0, kind: input, shape index: {}]  }
   0x1   :  { %12 = vst [vmem:[%s60_s1] sm:$0x3] %v37_v0  ;;  %v13_v1 = vld [vmem:[%s61_s0] sm:$0xff] }
   0x2   :  { %v15_v2 = vrot.slane %v13_v1, 4  ;;  %v21_v3 = vmul.f32 %v13_v1, %v13_v1 }
   0x4   :  { %v16_v4 = vadd.f32 %v15_v2, %v13_v1  ;;  %v22_v5 = vrot.slane %v21_v3, 4 }
   0x6   :  { %v17_v6 = vrot.slane %v16_v4, 2  ;;  %v23_v7 = vadd.f32 %v22_v5, %v21_v3 }
   0x8   :  { %v18_v8 = vadd.f32 %v17_v6, %v16_v4  ;;  %v24_v9 = vrot.slane %v23_v7, 2  ;;  %v14_v14 = vld [vmem:[%s60_s1] sm:$0x3] }
   0xa   :  { %v19_v10 = vrot.slane %v18_v8, 1  ;;  %v25_v11 = vadd.f32 %v24_v9, %v23_v7 }
   0xc   :  { %v20_v12 = vadd.f32 %v19_v10, %v18_v8  ;;  %v26_v13 = vrot.slane %v25_v11, 1 }
   0xe   :  { %v27_v15 = vadd.f32 %v26_v13, %v25_v11 }
  0x10   :  { %v29_v16 = vsel %vm28_vm0, %v20_v12, %v27_v15 }
  0x11   :  { %v30_v17 = vadd.f32 %v29_v16, %v14_v14 }
  0x13   :  { %31 = vst [vmem:[%s60_s1] sm:$0x3] %v30_v17 }

// kernel: _lambda_.31
= control target key start
LH: loop header
LB: loop body
LE: loop exit
PB: predicated region body
PF: predicated region fallthrough
CT: control target
= control target key end

     0   :  { %s640_s1 = inlined_call_operand.vmem [shape: bf16[512,128], index: 1, kind: input, shape index: {}]   ;;  %s641_s0 = inlined_call_operand.vmem [shape: bf16[8,512], index: 0, kind: input, shape index: {}]   ;;  %s642_s2 = inlined_call_operand.vmem [shape: f32[1,128], index: 2, kind: input, shape index: {}]   ;;  %s643_s3 = inlined_call_operand.vmem [shape: f32[8,128], index: 3, kind: output, shape index: {}]  }
   0x1   :  { %v480_v0 = vld [vmem:[%s640_s1 + $0x40] sm:$0xff]   ;;  %v484_v4 = vld [vmem:[%s640_s1 + $0x48] sm:$0xff]   ;;  %v488_v8 = vld [vmem:[%s640_s1 + $0x50] sm:$0xff]  }
   0x2   :  { %v481_v1 = vld [vmem:[%s640_s1 + $0xc0] sm:$0xff]   ;;  %436 = vmatprep.subr.bf16.mxu0 %v480_v0  ;;  %v485_v5 = vld [vmem:[%s640_s1 + $0xc8] sm:$0xff]   ;;  %v489_v9 = vld [vmem:[%s640_s1 + $0xd0] sm:$0xff]  }
   0x3   :  { %v482_v2 = vld [vmem:[%s640_s1] sm:$0xff]   ;;  %458 = vmatprep.subr.bf16.mxu1 %v481_v1  ;;  %v486_v6 = vld [vmem:[%s640_s1 + $0x8] sm:$0xff]   ;;  %v490_v10 = vld [vmem:[%s640_s1 + $0x10] sm:$0xff]  }
   0x4   :  { %v483_v3 = vld [vmem:[%s640_s1 + $0x80] sm:$0xff]   ;;  %437 = vmatpush3.bf16.msra.mxu0 %v482_v2  ;;  %v487_v7 = vld [vmem:[%s640_s1 + $0x88] sm:$0xff]   ;;  %v491_v11 = vld [vmem:[%s640_s1 + $0x90] sm:$0xff]  }
   0x5   :  { %459 = vmatpush3.bf16.msra.mxu1 %v483_v3  ;;  %438 = vmatprep.subr.bf16.mxu0 %v484_v4  ;;  %v492_v12 = vld [vmem:[%s640_s1 + $0x58] sm:$0xff]   ;;  %v496_v16 = vld [vmem:[%s640_s1 + $0x60] sm:$0xff]   ;;  %v500_v20 = vld [vmem:[%s640_s1 + $0x68] sm:$0xff]  }
   0x6   :  { %460 = vmatprep.subr.bf16.mxu1 %v485_v5  ;;  %v493_v13 = vld [vmem:[%s640_s1 + $0xd8] sm:$0xff]   ;;  %v497_v17 = vld [vmem:[%s640_s1 + $0xe0] sm:$0xff]   ;;  %v501_v21 = vld [vmem:[%s640_s1 + $0xe8] sm:$0xff]  }
   0x7   :  { %v494_v14 = vld [vmem:[%s640_s1 + $0x18] sm:$0xff]   ;;  %v498_v18 = vld [vmem:[%s640_s1 + $0x20] sm:$0xff]   ;;  %v502_v22 = vld [vmem:[%s640_s1 + $0x28] sm:$0xff]  }
   0x8   :  { %439 = vmatpush3.bf16.msra.mxu0 %v486_v6  ;;  %v495_v15 = vld [vmem:[%s640_s1 + $0x98] sm:$0xff]   ;;  %v499_v19 = vld [vmem:[%s640_s1 + $0xa0] sm:$0xff]   ;;  %v503_v23 = vld [vmem:[%s640_s1 + $0xa8] sm:$0xff]  }
   0x9   :  { %461 = vmatpush3.bf16.msra.mxu1 %v487_v7  ;;  %440 = vmatprep.subr.bf16.mxu0 %v488_v8  ;;  %v504_v24 = vld [vmem:[%s640_s1 + $0x70] sm:$0xff]   ;;  %v508_v28 = vld [vmem:[%s640_s1 + $0x78] sm:$0xff]   ;;  %v21_v32 = vld [vmem:[%s641_s0] sm:$0xff] }
   0xa   :  { %462 = vmatprep.subr.bf16.mxu1 %v489_v9  ;;  %v505_v25 = vld [vmem:[%s640_s1 + $0xf0] sm:$0xff]   ;;  %v509_v29 = vld [vmem:[%s640_s1 + $0xf8] sm:$0xff]   ;;  %v22_v33 = vld [vmem:[%s641_s0 + $0x8] sm:$0xff]  ;;  %vm23_vm0 = vcmp.ge.bf16.partialorder %v21_v32, 0  ;;  %v25_v34 = vmul.bf16 1045249613, %v21_v32 }
   0xb   :  { %v506_v26 = vld [vmem:[%s640_s1 + $0x30] sm:$0xff]   ;;  %v510_v30 = vld [vmem:[%s640_s1 + $0x38] sm:$0xff]   ;;  %vm24_vm1 = vcmp.ge.bf16.partialorder %v22_v33, 0  ;;  %v26_v35 = vmul.bf16 1045249613, %v22_v33 }
   0xc   :  { %441 = vmatpush3.bf16.msra.mxu0 %v490_v10  ;;  %v507_v27 = vld [vmem:[%s640_s1 + $0xb0] sm:$0xff]   ;;  %v511_v31 = vld [vmem:[%s640_s1 + $0xb8] sm:$0xff]   ;;  %v27_v36 = vsel %vm23_vm0, %v21_v32, %v25_v34  ;;  %v435_v50 = vld [vmem:[%s642_s2] ss:$0 sm:$0xff] }
   0xd   :  { %463 = vmatpush3.bf16.msra.mxu1 %v491_v11  ;;  %442 = vmatprep.subr.bf16.mxu0 %v492_v12  ;;  %v28_v37 = vsel %vm24_vm1, %v22_v33, %v26_v35  ;;  %v399_v38 = vcombine.low %v27_v36, %v27_v36  ;;  %v400_v39 = vcombine.high %v27_v36, %v27_v36 }
   0xe   :  { %464 = vmatprep.subr.bf16.mxu1 %v493_v13  ;;  %v401_v40 = vcombine.low %v28_v37, %v28_v37  ;;  %v402_v41 = vcombine.high %v28_v37, %v28_v37 }
   0xf   :  { %332 = vmatprep.mubr.bf16.mxu0 %v400_v39 }
  0x10   :  { %443 = vmatpush3.bf16.msra.mxu0 %v494_v14  ;;  %372 = vmatprep.mubr.bf16.mxu1 %v402_v41 }
  0x11   :  { %465 = vmatpush3.bf16.msra.mxu1 %v495_v15  ;;  %444 = vmatprep.subr.bf16.mxu0 %v496_v16 }
  0x12   :  { %466 = vmatprep.subr.bf16.mxu1 %v497_v17 }
  0x14   :  { %445 = vmatpush3.bf16.msra.mxu0 %v498_v18 }
  0x15   :  { %467 = vmatpush3.bf16.msra.mxu1 %v499_v19  ;;  %446 = vmatprep.subr.bf16.mxu0 %v500_v20 }
  0x16   :  { %468 = vmatprep.subr.bf16.mxu1 %v501_v21 }
  0x18   :  { %447 = vmatpush3.bf16.msra.mxu0 %v502_v22 }
  0x19   :  { %469 = vmatpush3.bf16.msra.mxu1 %v503_v23  ;;  %448 = vmatprep.subr.bf16.mxu0 %v504_v24 }
  0x1a   :  { %470 = vmatprep.subr.bf16.mxu1 %v505_v25 }
  0x1c   :  { %449 = vmatpush3.bf16.msra.mxu0 %v506_v26 }
  0x1d   :  { %471 = vmatpush3.bf16.msra.mxu1 %v507_v27  ;;  %450 = vmatprep.subr.bf16.mxu0 %v508_v28 }
  0x1e   :  { %472 = vmatprep.subr.bf16.mxu1 %v509_v29 }
  0x20   :  { %451 = vmatpush3.bf16.msra.mxu0 %v510_v30 }
  0x21   :  { %473 = vmatpush3.bf16.msra.mxu1 %v511_v31 }
  0x23   :  { %333 = vmatmul.mubr.bf16.vlgmr.msra.gmra.mrb[0].mxu0 %v399_v38 }
  0x24   :  { %373 = vmatmul.mubr.bf16.vlgmr.msra.gmra.mrb[0].mxu1 %v401_v40 }
  0xf6   :  { %v452_v42 = vpop.f32.mrb[0].mxu0 }
  0xf7   :  { %v474_v43 = vpop.f32.mrb[0].mxu1  ;;  %v453_v44 = vpop.f32.mrb[1].mxu0 }
  0xf8   :  { %v475_v45 = vpop.f32.mrb[1].mxu1  ;;  %v454_v46 = vadd.f32 %v453_v44, %v452_v42  ;;  %v455_v48 = vpop.f32.mrb[2].mxu0 }
  0xf9   :  { %v476_v47 = vadd.f32 %v475_v45, %v474_v43  ;;  %v477_v49 = vpop.f32.mrb[2].mxu1  ;;  %v456_v51 = vpop.f32.mrb[3].mxu0 }
  0xfa   :  { %v478_v52 = vpop.f32.mrb[3].mxu1 }
  0xfb   :  { %v375_v53 = vadd.f32 %v476_v47, %v454_v46 }
  0xfd   :  { %v393_v54 = vadd.f32 %v435_v50, %v375_v53 }
  0xff   :  { %394 = vst [vmem:[%s643_s3] sm:$0xff] %v393_v54 }

// kernel: _lambda_.33
= control target key start
LH: loop header
LB: loop body
LE: loop exit
PB: predicated region body
PF: predicated region fallthrough
CT: control target
= control target key end

     0   :  { %v27_v4 = vlaneseq  ;;  %s102_s1 = inlined_call_operand.vmem [shape: f32[2,128], index: 1, kind: input, shape index: {}]   ;;  %s103_s0 = inlined_call_operand.vmem [shape: f32[8,128], index: 0, kind: input, shape index: {}]   ;;  %s104_s2 = inlined_call_operand.vmem [shape: f32[1,128], index: 2, kind: input, shape index: {}]   ;;  %s105_s3 = inlined_call_operand.vmem [shape: f32[1,128], index: 3, kind: input, shape index: {}]   ;;  %s106_s4 = inlined_call_operand.vmem [shape: f32[8,128], index: 4, kind: output, shape index: {}]  }
   0x1   :  { %v18_v0 = vld [vmem:[%s102_s1] sm:$0x3] }
   0x2   :  { %v19_v1 = vmul.f32 0.125, %v18_v0  ;;  %v28_v7 = vshrl.u32 %v27_v4, 7  ;;  %v17_v10 = vld [vmem:[%s103_s0] sm:$0xff] }
   0x3   :  { %v58_v11 = vld [vmem:[%s104_s2] ss:$0 sm:$0xff] }
   0x4   :  { %v20_v2 = vmul.f32 %v19_v1, %v19_v1  ;;  %v29_v8 = vsub.s32 0, %v28_v7  ;;  %v42_v12 = vsub.s32 1, %v28_v7  ;;  %v59_v17 = vld [vmem:[%s105_s3] ss:$0 sm:$0xff] }
   0x6   :  { %v22_v3 = vrot.slane %v20_v2, 7  ;;  %v30_v9 = vrot.slane %v19_v1, %v29_v8 }
   0x8   :  { %v24_v5 = vsub.f32 %v19_v1, %v22_v3  ;;  %v31_v14 = vsub.f32 %v17_v10, %v30_v9 }
   0xa   :  { %v25_v6 = vadd.f32 1e-05, %v24_v5 }
   0xc   :  { %60 = vrsqrt.f32 %v25_v6 }
  0x16   :  { %v61_v13 = vpop.eup %60 }
  0x17   :  { %v39_v15 = vmul.f32 %v61_v13, %v58_v11 }
  0x19   :  { %v43_v16 = vrot.slane %v39_v15, %v42_v12 }
  0x1b   :  { %v44_v18 = vmul.f32 %v43_v16, %v31_v14 }
  0x1d   :  { %v52_v19 = vadd.f32 %v59_v17, %v44_v18 }
  0x1f   :  { %53 = vst [vmem:[%s106_s4] sm:$0xff] %v52_v19 }

// kernel: _lambda_.34
= control target key start
LH: loop header
LB: loop body
LE: loop exit
PB: predicated region body
PF: predicated region fallthrough
CT: control target
= control target key end

     0   :  { %s944_s12 = smov 0   ;;  %s946_s13 = smov 0   ;;  %s1027_s0 = inlined_call_operand.vmem [shape: bf16[8,1024], index: 0, kind: input, shape index: {}]   ;;  %s1028_s1 = inlined_call_operand.vmem [shape: bf16[1024,128], index: 1, kind: input, shape index: {}]   ;;  %s1029_s2 = inlined_call_operand.vmem [shape: f32[1,128], index: 2, kind: input, shape index: {}]   ;;  %s1030_s3 = inlined_call_operand.vmem [shape: f32[8,128], index: 3, kind: output, shape index: {}]  }
   0x1   :  { %s948_s14 = smov 0  }
   0x2 LB: > { %s25_s15 = sadd.s32 1, %s917_s13  ;;  %p751_p0 = scmp.ge.s32.totalorder %s921_s14, 1  ;;  %s921_s14 = sphi %s948_s14, %s13_s14   ;;  %s917_s13 = sphi %s946_s13, %s1032_s13   ;;  %s913_s12 = sphi %s944_s12, %s1031_s12  }
   0x3   : > { %p26_p1 = scmp.ge.s32.totalorder %s25_s15, 2  ;;  %p189_p2 = scmp.lt.s32.totalorder %s921_s14, 3 }
   0x5   : > { %s1034_s15 = smov (%p26_p1, %s25_s15), 0  ;;  %p190_p3 = pnand %p751_p0, %p189_p2 }
   0x6   : > { %s752_s16 = sshll.u32 (!%p190_p3), %s913_s12, 2  ;;  %s754_s17 = sshll.u32 (!%p190_p3), %s913_s12, 6 }
   0x7   : > { %193 = sbr.rel (%p190_p3) target bundleno = 291 (0x123), region = 32  ;;  %p233_p4 = scmp.lt.s32.totalorder (!%p190_p3), %s752_s16, 7 }
   0x8   : > { %p241_p5 = scmp.lt.s32.totalorder (!%p190_p3), %s754_s17, 127  ;;  %p756_p6 = scmp.ne.s32.totalorder (!%p190_p3), %s913_s12, 0 }
   0xe   : > { %s1036_s16 = smov (!%p233_p4, %s752_s16), 7  ;;  %s1038_s17 = smov (!%p241_p5, %s754_s17), 127 }
   0xf   : > { %s753_s18 = sshll.u32 %s1036_s16, 2  ;;  %s755_s22 = sshll.u32 %s1038_s17, 2  ;;  %v923_v0 = vmov (!%p756_p6), 0.0  }
  0x10   : > { %s969_s21 = scalar_lea.vmem %s1027_s0, %s753_s18  ;;  %s974_s25 = scalar_lea.vmem %s1028_s1, %s755_s22  ;;  %265 = vst [vmem:[#allocation2] sm:$0xff] (!%p756_p6), %v923_v0 }
  0x11   : > { %264 = sbr.rel (%p756_p6) target bundleno = 24 (0x18), region = 36 }
  0x18 PF: > { %v867_v1 = vld [vmem:[%s974_s25 + $0x40] sm:$0xff]   ;;  %v871_v5 = vld [vmem:[%s974_s25 + $0x48] sm:$0xff]   ;;  %v875_v9 = vld [vmem:[%s974_s25 + $0x50] sm:$0xff]   ;;  %p793_p7 = scmp.ne.s32.totalorder %s913_s12, 1 }
  0x19   : > { %v868_v2 = vld [vmem:[%s974_s25 + $0xc0] sm:$0xff]   ;;  %798 = vmatprep.subr.bf16.mxu0 %v867_v1  ;;  %v872_v6 = vld [vmem:[%s974_s25 + $0xc8] sm:$0xff]   ;;  %v876_v10 = vld [vmem:[%s974_s25 + $0xd0] sm:$0xff]  }
  0x1a   : > { %v869_v3 = vld [vmem:[%s974_s25] sm:$0xff]   ;;  %820 = vmatprep.subr.bf16.mxu1 %v868_v2  ;;  %v873_v7 = vld [vmem:[%s974_s25 + $0x8] sm:$0xff]   ;;  %v877_v11 = vld [vmem:[%s974_s25 + $0x10] sm:$0xff]  }
  0x1b   : > { %v870_v4 = vld [vmem:[%s974_s25 + $0x80] sm:$0xff]   ;;  %799 = vmatpush3.bf16.msra.mxu0 %v869_v3  ;;  %v874_v8 = vld [vmem:[%s974_s25 + $0x88] sm:$0xff]   ;;  %v878_v12 = vld [vmem:[%s974_s25 + $0x90] sm:$0xff]  }
  0x1c   : > { %821 = vmatpush3.bf16.msra.mxu1 %v870_v4  ;;  %800 = vmatprep.subr.bf16.mxu0 %v871_v5  ;;  %v879_v13 = vld [vmem:[%s974_s25 + $0x58] sm:$0xff]   ;;  %v883_v17 = vld [vmem:[%s974_s25 + $0x60] sm:$0xff]   ;;  %v887_v21 = vld [vmem:[%s974_s25 + $0x68] sm:$0xff]  }
  0x1d   : > { %822 = vmatprep.subr.bf16.mxu1 %v872_v6  ;;  %v880_v14 = vld [vmem:[%s974_s25 + $0xd8] sm:$0xff]   ;;  %v884_v18 = vld [vmem:[%s974_s25 + $0xe0] sm:$0xff]   ;;  %v888_v22 = vld [vmem:[%s974_s25 + $0xe8] sm:$0xff]  }
  0x1e   : > { %v881_v15 = vld [vmem:[%s974_s25 + $0x18] sm:$0xff]   ;;  %v885_v19 = vld [vmem:[%s974_s25 + $0x20] sm:$0xff]   ;;  %v889_v23 = vld [vmem:[%s974_s25 + $0x28] sm:$0xff]  }
  0x1f   : > { %801 = vmatpush3.bf16.msra.mxu0 %v873_v7  ;;  %v882_v16 = vld [vmem:[%s974_s25 + $0x98] sm:$0xff]   ;;  %v886_v20 = vld [vmem:[%s974_s25 + $0xa0] sm:$0xff]   ;;  %v890_v24 = vld [vmem:[%s974_s25 + $0xa8] sm:$0xff]  }
  0x20   : > { %823 = vmatpush3.bf16.msra.mxu1 %v874_v8  ;;  %802 = vmatprep.subr.bf16.mxu0 %v875_v9  ;;  %v891_v25 = vld [vmem:[%s974_s25 + $0x70] sm:$0xff]   ;;  %v895_v29 = vld [vmem:[%s974_s25 + $0x78] sm:$0xff]   ;;  %v266_v33 = vld [vmem:[%s969_s21] sm:$0xff] }
  0x21   : > { %824 = vmatprep.subr.bf16.mxu1 %v876_v10  ;;  %v892_v26 = vld [vmem:[%s974_s25 + $0xf0] sm:$0xff]   ;;  %v896_v30 = vld [vmem:[%s974_s25 + $0xf8] sm:$0xff]   ;;  %v267_v34 = vld [vmem:[%s969_s21 + $0x8] sm:$0xff]  ;;  %vm268_vm0 = vcmp.ge.bf16.partialorder %v266_v33, 0  ;;  %v270_v35 = vmul.bf16 1045249613, %v266_v33 }
  0x22   : > { %v893_v27 = vld [vmem:[%s974_s25 + $0x30] sm:$0xff]   ;;  %v897_v31 = vld [vmem:[%s974_s25 + $0x38] sm:$0xff]   ;;  %vm269_vm1 = vcmp.ge.bf16.partialorder %v267_v34, 0  ;;  %v271_v36 = vmul.bf16 1045249613, %v267_v34  ;;  %v274_v51 = vld [vmem:[#allocation2] sm:$0xff] }
  0x23   : > { %803 = vmatpush3.bf16.msra.mxu0 %v877_v11  ;;  %v894_v28 = vld [vmem:[%s974_s25 + $0xb0] sm:$0xff]   ;;  %v898_v32 = vld [vmem:[%s974_s25 + $0xb8] sm:$0xff]   ;;  %v272_v37 = vsel %vm268_vm0, %v266_v33, %v270_v35  ;;  %v794_v57 = vld [vmem:[%s1029_s2] ss:$0 sm:$0xff] (!%p793_p7) }
  0x24   : > { %825 = vmatpush3.bf16.msra.mxu1 %v878_v12  ;;  %804 = vmatprep.subr.bf16.mxu0 %v879_v13  ;;  %v273_v38 = vsel %vm269_vm1, %v267_v34, %v271_v36  ;;  %v757_v39 = vcombine.low %v272_v37, %v272_v37  ;;  %v758_v40 = vcombine.high %v272_v37, %v272_v37 }
  0x25   : > { %826 = vmatprep.subr.bf16.mxu1 %v880_v14  ;;  %v759_v41 = vcombine.low %v273_v38, %v273_v38  ;;  %v760_v42 = vcombine.high %v273_v38, %v273_v38 }
  0x26   : > { %577 = vmatprep.mubr.bf16.mxu0 %v758_v40 }
  0x27   : > { %805 = vmatpush3.bf16.msra.mxu0 %v881_v15  ;;  %617 = vmatprep.mubr.bf16.mxu1 %v760_v42 }
  0x28   : > { %827 = vmatpush3.bf16.msra.mxu1 %v882_v16  ;;  %806 = vmatprep.subr.bf16.mxu0 %v883_v17 }
  0x29   : > { %828 = vmatprep.subr.bf16.mxu1 %v884_v18 }
  0x2b   : > { %807 = vmatpush3.bf16.msra.mxu0 %v885_v19 }
  0x2c   : > { %829 = vmatpush3.bf16.msra.mxu1 %v886_v20  ;;  %808 = vmatprep.subr.bf16.mxu0 %v887_v21 }
  0x2d   : > { %830 = vmatprep.subr.bf16.mxu1 %v888_v22 }
  0x2f   : > { %809 = vmatpush3.bf16.msra.mxu0 %v889_v23 }
  0x30   : > { %831 = vmatpush3.bf16.msra.mxu1 %v890_v24  ;;  %810 = vmatprep.subr.bf16.mxu0 %v891_v25 }
  0x31   : > { %832 = vmatprep.subr.bf16.mxu1 %v892_v26 }
  0x33   : > { %811 = vmatpush3.bf16.msra.mxu0 %v893_v27 }
  0x34   : > { %833 = vmatpush3.bf16.msra.mxu1 %v894_v28  ;;  %812 = vmatprep.subr.bf16.mxu0 %v895_v29 }
  0x35   : > { %834 = vmatprep.subr.bf16.mxu1 %v896_v30 }
  0x37   : > { %813 = vmatpush3.bf16.msra.mxu0 %v897_v31 }
  0x38   : > { %835 = vmatpush3.bf16.msra.mxu1 %v898_v32 }
  0x3a   : > { %578 = vmatmul.mubr.bf16.vlgmr.msra.gmra.mrb[0].mxu0 %v757_v39 }
  0x3b   : > { %618 = vmatmul.mubr.bf16.vlgmr.msra.gmra.mrb[0].mxu1 %v759_v41 }
 0x10d   : > { %v814_v43 = vpop.f32.mrb[0].mxu0 }
 0x10e   : > { %v836_v44 = vpop.f32.mrb[0].mxu1  ;;  %v815_v45 = vpop.f32.mrb[1].mxu0 }
 0x10f   : > { %v837_v46 = vpop.f32.mrb[1].mxu1  ;;  %v816_v47 = vadd.f32 %v815_v45, %v814_v43  ;;  %v817_v49 = vpop.f32.mrb[2].mxu0 }
 0x110   : > { %v838_v48 = vadd.f32 %v837_v46, %v836_v44  ;;  %v839_v50 = vpop.f32.mrb[2].mxu1  ;;  %v818_v52 = vpop.f32.mrb[3].mxu0  ;;  %630 = sbr.rel (%p793_p7) target bundleno = 291 (0x123), region = 40 }
 0x111   : > { %v840_v53 = vpop.f32.mrb[3].mxu1 }
 0x112   : > { %v620_v54 = vadd.f32 %v838_v48, %v816_v47 }
 0x114   : > { %v625_v55 = vadd.f32 %v620_v54, %v274_v51 }
 0x116   : > { %626 = vst [vmem:[#allocation2] sm:$0xff] %v625_v55 }
 0x11d   : > { %v631_v56 = vld [vmem:[#allocation2] sm:$0xff] }
 0x11e   : > { %v639_v58 = vadd.f32 %v794_v57, %v631_v56 }
 0x120   : > { %v640_v59 = vmax.f32 %v639_v58, 0.0 }
 0x122   : > { %641 = vst [vmem:[%s1030_s3] sm:$0xff] %v640_v59 }
 0x123 PF: > { %s13_s14 = sadd.s32 1, %s921_s14   ;;  %s1031_s12 = smov %s917_s13 }
 0x124   : > { %p10_p8 = scmp.ge.s32.totalorder %s13_s14, 4   ;;  %s1032_s13 = smov %s1034_s15 }
 0x126   :  { %12 = sbr.rel (!%p10_p8) target bundleno = 2 (0x2), region = 76 }

// kernel: _lambda_.35
= control target key start
LH: loop header
LB: loop body
LE: loop exit
PB: predicated region body
PF: predicated region fallthrough
CT: control target
= control target key end

     0   :  { %s1165_s12 = smov 0   ;;  %s1167_s13 = smov 0   ;;  %s1283_s0 = inlined_call_operand.vmem [shape: bf16[8,1024], index: 0, kind: input, shape index: {}]   ;;  %s1284_s1 = inlined_call_operand.vmem [shape: bf16[1024,256], index: 1, kind: input, shape index: {}]   ;;  %s1285_s2 = inlined_call_operand.vmem [shape: f32[1,256], index: 2, kind: input, shape index: {}]   ;;  %s1286_s3 = inlined_call_operand.vmem [shape: f32[8,256], index: 3, kind: output, shape index: {}]  }
   0x1   :  { %s1169_s14 = smov 0  }
   0x2 LB: > { %s25_s15 = sadd.s32 1, %s1138_s13  ;;  %p914_p0 = scmp.ge.s32.totalorder %s1142_s14, 1  ;;  %s1142_s14 = sphi %s1169_s14, %s13_s14   ;;  %s1138_s13 = sphi %s1167_s13, %s1288_s13   ;;  %s1134_s12 = sphi %s1165_s12, %s1287_s12  }
   0x3   : > { %p26_p1 = scmp.ge.s32.totalorder %s25_s15, 2  ;;  %p194_p2 = scmp.lt.s32.totalorder %s1142_s14, 3 }
   0x5   : > { %s1290_s15 = smov (%p26_p1, %s25_s15), 0  ;;  %p195_p3 = pnand %p914_p0, %p194_p2 }
   0x6   : > { %s915_s16 = sshll.u32 (!%p195_p3), %s1134_s12, 2  ;;  %s917_s17 = sshll.u32 (!%p195_p3), %s1134_s12, 6 }
   0x7   : > { %198 = sbr.rel (%p195_p3) target bundleno = 318 (0x13e), region = 32  ;;  %p243_p4 = scmp.lt.s32.totalorder (!%p195_p3), %s915_s16, 7 }
   0x8   : > { %p252_p5 = scmp.lt.s32.totalorder (!%p195_p3), %s917_s17, 127  ;;  %p920_p6 = scmp.ne.s32.totalorder (!%p195_p3), %s1134_s12, 0 }
   0xe   : > { %s1292_s16 = smov (!%p243_p4, %s915_s16), 7  ;;  %s1294_s17 = smov (!%p252_p5, %s917_s17), 127 }
   0xf   : > { %s916_s18 = sshll.u32 %s1292_s16, 2  ;;  %s994_s22 = sshll.u32 %s1294_s17, 3  ;;  %v1144_v0 = vmov (!%p920_p6), 0.0  }
  0x10   : > { %s1190_s21 = scalar_lea.vmem %s1283_s0, %s916_s18  ;;  %s1195_s25 = scalar_lea.vmem %s1284_s1, %s994_s22  ;;  %281 = vst [vmem:[#allocation2] sm:$0xff] (!%p920_p6), %v1144_v0  ;;  %282 = vst [vmem:[#allocation2 + $0x8] sm:$0xff] (!%p920_p6), %v1144_v0 }
  0x11   : > { %280 = sbr.rel (%p920_p6) target bundleno = 24 (0x18), region = 36 }
  0x18 PF: > { %v1020_v1 = vld [vmem:[%s1195_s25 + $0x4] ss:$8 sps:$4 sm:$0xff]   ;;  %v1024_v3 = vld [vmem:[%s1195_s25] ss:$8 sps:$4 sm:$0xff]   ;;  %v1026_v5 = vld [vmem:[%s1195_s25 + $0x14] ss:$8 sps:$4 sm:$0xff]  }
  0x19   : > { %v1022_v2 = vld [vmem:[%s1195_s25 + $0x104] ss:$8 sps:$4 sm:$0xff]   ;;  %685 = vmatprep.subr.bf16.mxu0 %v1020_v1  ;;  %v1025_v4 = vld [vmem:[%s1195_s25 + $0x100] ss:$8 sps:$4 sm:$0xff]   ;;  %v1028_v6 = vld [vmem:[%s1195_s25 + $0x114] ss:$8 sps:$4 sm:$0xff]  }
  0x1a   : > { %726 = vmatprep.subr.bf16.mxu1 %v1022_v2  ;;  %686 = vmatpush1.bf16.msra.mxu0 %v1024_v3  ;;  %v1030_v7 = vld [vmem:[%s1195_s25 + $0x10] ss:$8 sps:$4 sm:$0xff]   ;;  %v1032_v9 = vld [vmem:[%s1195_s25 + $0x24] ss:$8 sps:$4 sm:$0xff]   ;;  %v1036_v11 = vld [vmem:[%s1195_s25 + $0x20] ss:$8 sps:$4 sm:$0xff]  }
  0x1b   : > { %727 = vmatpush1.bf16.msra.mxu1 %v1025_v4  ;;  %687 = vmatprep.subr.bf16.mxu0 %v1026_v5  ;;  %v1031_v8 = vld [vmem:[%s1195_s25 + $0x110] ss:$8 sps:$4 sm:$0xff]   ;;  %v1034_v10 = vld [vmem:[%s1195_s25 + $0x124] ss:$8 sps:$4 sm:$0xff]   ;;  %v1037_v12 = vld [vmem:[%s1195_s25 + $0x120] ss:$8 sps:$4 sm:$0xff]  }
  0x1c   : > { %728 = vmatprep.subr.bf16.mxu1 %v1028_v6  ;;  %v1038_v13 = vld [vmem:[%s1195_s25 + $0x34] ss:$8 sps:$4 sm:$0xff]   ;;  %v1042_v15 = vld [vmem:[%s1195_s25 + $0x30] ss:$8 sps:$4 sm:$0xff]   ;;  %v1044_v17 = vld [vmem:[%s1195_s25 + $0x44] ss:$8 sps:$4 sm:$0xff]  }
  0x1d   : > { %v1040_v14 = vld [vmem:[%s1195_s25 + $0x134] ss:$8 sps:$4 sm:$0xff]   ;;  %v1043_v16 = vld [vmem:[%s1195_s25 + $0x130] ss:$8 sps:$4 sm:$0xff]   ;;  %v1046_v18 = vld [vmem:[%s1195_s25 + $0x144] ss:$8 sps:$4 sm:$0xff]  }
  0x1e   : > { %688 = vmatpush1.bf16.msra.mxu0 %v1030_v7  ;;  %v1048_v19 = vld [vmem:[%s1195_s25 + $0x40] ss:$8 sps:$4 sm:$0xff]   ;;  %v1050_v21 = vld [vmem:[%s1195_s25 + $0x54] ss:$8 sps:$4 sm:$0xff]   ;;  %v1054_v23 = vld [vmem:[%s1195_s25 + $0x50] ss:$8 sps:$4 sm:$0xff]  }
  0x1f   : > { %729 = vmatpush1.bf16.msra.mxu1 %v1031_v8  ;;  %689 = vmatprep.subr.bf16.mxu0 %v1032_v9  ;;  %v1049_v20 = vld [vmem:[%s1195_s25 + $0x140] ss:$8 sps:$4 sm:$0xff]   ;;  %v1052_v22 = vld [vmem:[%s1195_s25 + $0x154] ss:$8 sps:$4 sm:$0xff]   ;;  %v1055_v24 = vld [vmem:[%s1195_s25 + $0x150] ss:$8 sps:$4 sm:$0xff]  }
  0x20   : > { %730 = vmatprep.subr.bf16.mxu1 %v1034_v10  ;;  %v1056_v25 = vld [vmem:[%s1195_s25 + $0x64] ss:$8 sps:$4 sm:$0xff]   ;;  %v1060_v27 = vld [vmem:[%s1195_s25 + $0x60] ss:$8 sps:$4 sm:$0xff]   ;;  %v1062_v29 = vld [vmem:[%s1195_s25 + $0x74] ss:$8 sps:$4 sm:$0xff]  }
  0x21   : > { %v1058_v26 = vld [vmem:[%s1195_s25 + $0x164] ss:$8 sps:$4 sm:$0xff]   ;;  %v1061_v28 = vld [vmem:[%s1195_s25 + $0x160] ss:$8 sps:$4 sm:$0xff]   ;;  %v1064_v30 = vld [vmem:[%s1195_s25 + $0x174] ss:$8 sps:$4 sm:$0xff]  }
  0x22   : > { %690 = vmatpush1.bf16.msra.mxu0 %v1036_v11  ;;  %v1066_v31 = vld [vmem:[%s1195_s25 + $0x70] ss:$8 sps:$4 sm:$0xff]   ;;  %v1068_v33 = vld [vmem:[%s1195_s25 + $0x84] ss:$8 sps:$4 sm:$0xff]   ;;  %v1072_v35 = vld [vmem:[%s1195_s25 + $0x80] ss:$8 sps:$4 sm:$0xff]  }
  0x23   : > { %731 = vmatpush1.bf16.msra.mxu1 %v1037_v12  ;;  %691 = vmatprep.subr.bf16.mxu0 %v1038_v13  ;;  %v1067_v32 = vld [vmem:[%s1195_s25 + $0x170] ss:$8 sps:$4 sm:$0xff]   ;;  %v1070_v34 = vld [vmem:[%s1195_s25 + $0x184] ss:$8 sps:$4 sm:$0xff]   ;;  %v1073_v36 = vld [vmem:[%s1195_s25 + $0x180] ss:$8 sps:$4 sm:$0xff]  }
  0x24   : > { %732 = vmatprep.subr.bf16.mxu1 %v1040_v14  ;;  %v1074_v37 = vld [vmem:[%s1195_s25 + $0x94] ss:$8 sps:$4 sm:$0xff]   ;;  %v1078_v39 = vld [vmem:[%s1195_s25 + $0x90] ss:$8 sps:$4 sm:$0xff]   ;;  %v1080_v41 = vld [vmem:[%s1195_s25 + $0xa4] ss:$8 sps:$4 sm:$0xff]  }
  0x25   : > { %v1076_v38 = vld [vmem:[%s1195_s25 + $0x194] ss:$8 sps:$4 sm:$0xff]   ;;  %v1079_v40 = vld [vmem:[%s1195_s25 + $0x190] ss:$8 sps:$4 sm:$0xff]   ;;  %v1082_v42 = vld [vmem:[%s1195_s25 + $0x1a4] ss:$8 sps:$4 sm:$0xff]  }
  0x26   : > { %692 = vmatpush1.bf16.msra.mxu0 %v1042_v15  ;;  %v1084_v43 = vld [vmem:[%s1195_s25 + $0xa0] ss:$8 sps:$4 sm:$0xff]   ;;  %v1086_v45 = vld [vmem:[%s1195_s25 + $0xb4] ss:$8 sps:$4 sm:$0xff]   ;;  %v1090_v50 = vld [vmem:[%s1195_s25 + $0xb0] ss:$8 sps:$4 sm:$0xff]  }
  0x27   : > { %733 = vmatpush1.bf16.msra.mxu1 %v1043_v16  ;;  %693 = vmatprep.subr.bf16.mxu0 %v1044_v17  ;;  %v1085_v44 = vld [vmem:[%s1195_s25 + $0x1a0] ss:$8 sps:$4 sm:$0xff]   ;;  %v1088_v46 = vld [vmem:[%s1195_s25 + $0x1b4] ss:$8 sps:$4 sm:$0xff]   ;;  %v1091_v51 = vld [vmem:[%s1195_s25 + $0x1b0] ss:$8 sps:$4 sm:$0xff]  }
  0x28   : > { %734 = vmatprep.subr.bf16.mxu1 %v1046_v18  ;;  %v283_v47 = vld [vmem:[%s1190_s21] sm:$0xff]  ;;  %v284_v49 = vld [vmem:[%s1190_s21 + $0x8] sm:$0xff]  ;;  %v1098_v57 = vld [vmem:[%s1195_s25 + $0xd4] ss:$8 sps:$4 sm:$0xff]   ;;  %p989_p7 = scmp.ne.s32.totalorder %s1134_s12, 1 }
  0x29   : > { %v922_v48 = vcombine.high %v283_v47, %v283_v47  ;;  %v924_v52 = vcombine.high %v284_v49, %v284_v49  ;;  %v1092_v53 = vld [vmem:[%s1195_s25 + $0xc4] ss:$8 sps:$4 sm:$0xff]   ;;  %v1096_v55 = vld [vmem:[%s1195_s25 + $0xc0] ss:$8 sps:$4 sm:$0xff]   ;;  %v1100_v58 = vld [vmem:[%s1195_s25 + $0x1d4] ss:$8 sps:$4 sm:$0xff]   ;;  %v921_v5 = vcombine.low %v283_v47, %v283_v47  ;;  %v923_v6 = vcombine.low %v284_v49, %v284_v49 }
  0x2a   : > { %694 = vmatpush1.bf16.msra.mxu0 %v1048_v19  ;;  %v1094_v54 = vld [vmem:[%s1195_s25 + $0x1c4] ss:$8 sps:$4 sm:$0xff]   ;;  %v1097_v56 = vld [vmem:[%s1195_s25 + $0x1c0] ss:$8 sps:$4 sm:$0xff]   ;;  %v1102_v59 = vld [vmem:[%s1195_s25 + $0xd0] ss:$8 sps:$4 sm:$0xff]  }
  0x2b   : > { %735 = vmatpush1.bf16.msra.mxu1 %v1049_v20  ;;  %695 = vmatprep.subr.bf16.mxu0 %v1050_v21  ;;  %v1103_v60 = vld [vmem:[%s1195_s25 + $0x1d0] ss:$8 sps:$4 sm:$0xff]   ;;  %v1104_v61 = vld [vmem:[%s1195_s25 + $0xe4] ss:$8 sps:$4 sm:$0xff]   ;;  %v1108_v63 = vld [vmem:[%s1195_s25 + $0xe0] ss:$8 sps:$4 sm:$0xff]   ;;  %v779_v21 = vlaneseq (!%p989_p7) }
  0x2c   : > { %736 = vmatprep.subr.bf16.mxu1 %v1052_v22  ;;  %717 = vmatprep.mubr.bf16.mxu0 %v922_v48  ;;  %v1106_v62 = vld [vmem:[%s1195_s25 + $0x1e4] ss:$8 sps:$4 sm:$0xff]   ;;  %v1109_v0 = vld [vmem:[%s1195_s25 + $0x1e0] ss:$8 sps:$4 sm:$0xff]   ;;  %v1110_v1 = vld [vmem:[%s1195_s25 + $0xf4] ss:$8 sps:$4 sm:$0xff]  }
  0x2d   : > { %758 = vmatprep.mubr.bf16.mxu1 %v924_v52  ;;  %v1112_v2 = vld [vmem:[%s1195_s25 + $0x1f4] ss:$8 sps:$4 sm:$0xff]   ;;  %v1114_v3 = vld [vmem:[%s1195_s25 + $0xf0] ss:$8 sps:$4 sm:$0xff]   ;;  %v285_v8 = vld [vmem:[#allocation2] sm:$0xff]  ;;  %v780_v22 = vshrl.u32 (!%p989_p7), %v779_v21, 7 }
  0x2e   : > { %696 = vmatpush1.bf16.msra.mxu0 %v1054_v23  ;;  %v1115_v4 = vld [vmem:[%s1195_s25 + $0x1f0] ss:$8 sps:$4 sm:$0xff]   ;;  %v286_v12 = vld [vmem:[#allocation2 + $0x8] sm:$0xff]  ;;  %v777_v23 = vld [vmem:[%s1285_s2] sm:$0x3] (!%p989_p7) }
  0x2f   : > { %737 = vmatpush1.bf16.msra.mxu1 %v1055_v24  ;;  %697 = vmatprep.subr.bf16.mxu0 %v1056_v25  ;;  %v781_v24 = vsub.s32 (!%p989_p7), 0, %v780_v22  ;;  %v785_v25 = vsub.s32 (!%p989_p7), 1, %v780_v22 }
  0x30   : > { %738 = vmatprep.subr.bf16.mxu1 %v1058_v26 }
  0x32   : > { %698 = vmatpush1.bf16.msra.mxu0 %v1060_v27 }
  0x33   : > { %739 = vmatpush1.bf16.msra.mxu1 %v1061_v28  ;;  %699 = vmatprep.subr.bf16.mxu0 %v1062_v29  ;;  %v782_v28 = vrot.slane (!%p989_p7), %v777_v23, %v781_v24  ;;  %v786_v29 = vrot.slane (!%p989_p7), %v777_v23, %v785_v25 }
  0x34   : > { %740 = vmatprep.subr.bf16.mxu1 %v1064_v30 }
  0x36   : > { %700 = vmatpush1.bf16.msra.mxu0 %v1066_v31 }
  0x37   : > { %741 = vmatpush1.bf16.msra.mxu1 %v1067_v32  ;;  %701 = vmatprep.subr.bf16.mxu0 %v1068_v33 }
  0x38   : > { %742 = vmatprep.subr.bf16.mxu1 %v1070_v34 }
  0x3a   : > { %702 = vmatpush1.bf16.msra.mxu0 %v1072_v35 }
  0x3b   : > { %743 = vmatpush1.bf16.msra.mxu1 %v1073_v36  ;;  %703 = vmatprep.subr.bf16.mxu0 %v1074_v37 }
  0x3c   : > { %744 = vmatprep.subr.bf16.mxu1 %v1076_v38 }
  0x3e   : > { %704 = vmatpush1.bf16.msra.mxu0 %v1078_v39 }
  0x3f   : > { %745 = vmatpush1.bf16.msra.mxu1 %v1079_v40  ;;  %705 = vmatprep.subr.bf16.mxu0 %v1080_v41 }
  0x40   : > { %746 = vmatprep.subr.bf16.mxu1 %v1082_v42 }
  0x42   : > { %706 = vmatpush1.bf16.msra.mxu0 %v1084_v43 }
  0x43   : > { %747 = vmatpush1.bf16.msra.mxu1 %v1085_v44  ;;  %707 = vmatprep.subr.bf16.mxu0 %v1086_v45 }
  0x44   : > { %748 = vmatprep.subr.bf16.mxu1 %v1088_v46 }
  0x46   : > { %708 = vmatpush1.bf16.msra.mxu0 %v1090_v50 }
  0x47   : > { %749 = vmatpush1.bf16.msra.mxu1 %v1091_v51  ;;  %709 = vmatprep.subr.bf16.mxu0 %v1092_v53 }
  0x48   : > { %750 = vmatprep.subr.bf16.mxu1 %v1094_v54 }
  0x4a   : > { %710 = vmatpush1.bf16.msra.mxu0 %v1096_v55 }
  0x4b   : > { %751 = vmatpush1.bf16.msra.mxu1 %v1097_v56  ;;  %711 = vmatprep.subr.bf16.mxu0 %v1098_v57 }
  0x4c   : > { %752 = vmatprep.subr.bf16.mxu1 %v1100_v58 }
  0x4e   : > { %712 = vmatpush1.bf16.msra.mxu0 %v1102_v59 }
  0x4f   : > { %753 = vmatpush1.bf16.msra.mxu1 %v1103_v60  ;;  %713 = vmatprep.subr.bf16.mxu0 %v1104_v61 }
  0x50   : > { %754 = vmatprep.subr.bf16.mxu1 %v1106_v62 }
  0x52   : > { %714 = vmatpush1.bf16.msra.mxu0 %v1108_v63 }
  0x53   : > { %755 = vmatpush1.bf16.msra.mxu1 %v1109_v0  ;;  %715 = vmatprep.subr.bf16.mxu0 %v1110_v1 }
  0x54   : > { %756 = vmatprep.subr.bf16.mxu1 %v1112_v2 }
  0x56   : > { %716 = vmatpush1.bf16.msra.mxu0 %v1114_v3 }
  0x57   : > { %757 = vmatpush1.bf16.msra.mxu1 %v1115_v4 }
  0x59   : > { %718 = vmatmul.mubr.bf16.vlgmr.msra.gmra.mrb[0].mxu0 %v921_v5 }
  0x5a   : > { %759 = vmatmul.mubr.bf16.vlgmr.msra.gmra.mrb[0].mxu1 %v923_v6 }
 0x12c   : > { %v719_v7 = vpop.f32.mrb[0].mxu0 }
 0x12d   : > { %v760_v9 = vpop.f32.mrb[0].mxu1  ;;  %v721_v11 = vpop.f32.mrb[1].mxu0  ;;  %774 = sbr.rel (%p989_p7) target bundleno = 318 (0x13e), region = 40 }
 0x12e   : > { %v761_v10 = vadd.f32 %v760_v9, %v719_v7  ;;  %v762_v13 = vpop.f32.mrb[1].mxu1  ;;  %v723_v15 = vpop.f32.mrb[2].mxu0 }
 0x12f   : > { %v763_v14 = vadd.f32 %v762_v13, %v721_v11  ;;  %v764_v16 = vpop.f32.mrb[2].mxu1  ;;  %v724_v18 = vpop.f32.mrb[3].mxu0 }
 0x130   : > { %v767_v17 = vadd.f32 %v761_v10, %v285_v8  ;;  %v765_v19 = vpop.f32.mrb[3].mxu1 }
 0x131   : > { %v768_v20 = vadd.f32 %v763_v14, %v286_v12 }
 0x132   : > { %769 = vst [vmem:[#allocation2] sm:$0xff] %v767_v17 }
 0x133   : > { %770 = vst [vmem:[#allocation2 + $0x8] sm:$0xff] %v768_v20 }
 0x139   : > { %v775_v26 = vld [vmem:[#allocation2] sm:$0xff] }
 0x13a   : > { %v776_v27 = vld [vmem:[#allocation2 + $0x8] sm:$0xff]  ;;  %v789_v30 = vadd.f32 %v782_v28, %v775_v26 }
 0x13b   : > { %v790_v31 = vadd.f32 %v786_v29, %v776_v27 }
 0x13c   : > { %791 = vst [vmem:[%s1286_s3] sm:$0xff] %v789_v30 }
 0x13d   : > { %792 = vst [vmem:[%s1286_s3 + $0x8] sm:$0xff] %v790_v31 }
 0x13e PF: > { %s13_s14 = sadd.s32 1, %s1142_s14   ;;  %s1287_s12 = smov %s1138_s13 }
 0x13f   : > { %p10_p8 = scmp.ge.s32.totalorder %s13_s14, 4   ;;  %s1288_s13 = smov %s1290_s15 }
 0x141   :  { %12 = sbr.rel (!%p10_p8) target bundleno = 2 (0x2), region = 76 }

// kernel: _lambda_.38
= control target key start
LH: loop header
LB: loop body
LE: loop exit
PB: predicated region body
PF: predicated region fallthrough
CT: control target
= control target key end

     0   :  { %s940_s12 = smov 0   ;;  %s942_s13 = smov 0   ;;  %s1023_s0 = inlined_call_operand.vmem [shape: bf16[8,1536], index: 0, kind: input, shape index: {}]   ;;  %s1024_s1 = inlined_call_operand.vmem [shape: bf16[1536,128], index: 1, kind: input, shape index: {}]   ;;  %s1025_s2 = inlined_call_operand.vmem [shape: f32[1,128], index: 2, kind: input, shape index: {}]   ;;  %s1026_s3 = inlined_call_operand.vmem [shape: f32[8,128], index: 3, kind: output, shape index: {}]  }
   0x1   :  { %s944_s14 = smov 0  }
   0x2 LB: > { %s25_s15 = sadd.s32 1, %s912_s13  ;;  %p745_p0 = scmp.ge.s32.totalorder %s916_s14, 1  ;;  %s916_s14 = sphi %s944_s14, %s13_s14   ;;  %s912_s13 = sphi %s942_s13, %s1028_s13   ;;  %s908_s12 = sphi %s940_s12, %s1027_s12  }
   0x3   : > { %p26_p1 = scmp.ge.s32.totalorder %s25_s15, 3  ;;  %p189_p2 = scmp.lt.s32.totalorder %s916_s14, 4 }
   0x5   : > { %s1030_s15 = smov (%p26_p1, %s25_s15), 0  ;;  %p190_p3 = pnand %p745_p0, %p189_p2 }
   0x6   : > { %s746_s16 = sshll.u32 (!%p190_p3), %s908_s12, 2  ;;  %s748_s17 = sshll.u32 (!%p190_p3), %s908_s12, 6 }
   0x7   : > { %193 = sbr.rel (%p190_p3) target bundleno = 289 (0x121), region = 32  ;;  %p233_p4 = scmp.lt.s32.totalorder (!%p190_p3), %s746_s16, 11 }
   0x8   : > { %p241_p5 = scmp.lt.s32.totalorder (!%p190_p3), %s748_s17, 191  ;;  %p750_p6 = scmp.ne.s32.totalorder (!%p190_p3), %s908_s12, 0 }
   0xe   : > { %s1032_s16 = smov (!%p233_p4, %s746_s16), 11  ;;  %s1034_s17 = smov (!%p241_p5, %s748_s17), 191 }
   0xf   : > { %s747_s18 = sshll.u32 %s1032_s16, 2  ;;  %s749_s22 = sshll.u32 %s1034_s17, 2  ;;  %v918_v0 = vmov (!%p750_p6), 0.0  }
  0x10   : > { %s965_s21 = scalar_lea.vmem %s1023_s0, %s747_s18  ;;  %s970_s25 = scalar_lea.vmem %s1024_s1, %s749_s22  ;;  %264 = vst [vmem:[#allocation2] sm:$0xff] (!%p750_p6), %v918_v0 }
  0x11   : > { %263 = sbr.rel (%p750_p6) target bundleno = 24 (0x18), region = 36 }
  0x18 PF: > { %v862_v1 = vld [vmem:[%s970_s25 + $0x40] sm:$0xff]   ;;  %v866_v5 = vld [vmem:[%s970_s25 + $0x48] sm:$0xff]   ;;  %v870_v9 = vld [vmem:[%s970_s25 + $0x50] sm:$0xff]   ;;  %v919_v35 = vmov 0   ;;  %p787_p7 = scmp.ne.s32.totalorder %s908_s12, 2 }
  0x19   : > { %v863_v2 = vld [vmem:[%s970_s25 + $0xc0] sm:$0xff]   ;;  %792 = vmatprep.subr.bf16.mxu0 %v862_v1  ;;  %v867_v6 = vld [vmem:[%s970_s25 + $0xc8] sm:$0xff]   ;;  %v871_v10 = vld [vmem:[%s970_s25 + $0xd0] sm:$0xff]  }
  0x1a   : > { %v864_v3 = vld [vmem:[%s970_s25] sm:$0xff]   ;;  %814 = vmatprep.subr.bf16.mxu1 %v863_v2  ;;  %v868_v7 = vld [vmem:[%s970_s25 + $0x8] sm:$0xff]   ;;  %v872_v11 = vld [vmem:[%s970_s25 + $0x10] sm:$0xff]  }
  0x1b   : > { %v865_v4 = vld [vmem:[%s970_s25 + $0x80] sm:$0xff]   ;;  %793 = vmatpush3.bf16.msra.mxu0 %v864_v3  ;;  %v869_v8 = vld [vmem:[%s970_s25 + $0x88] sm:$0xff]   ;;  %v873_v12 = vld [vmem:[%s970_s25 + $0x90] sm:$0xff]  }
  0x1c   : > { %815 = vmatpush3.bf16.msra.mxu1 %v865_v4  ;;  %794 = vmatprep.subr.bf16.mxu0 %v866_v5  ;;  %v874_v13 = vld [vmem:[%s970_s25 + $0x58] sm:$0xff]   ;;  %v878_v17 = vld [vmem:[%s970_s25 + $0x60] sm:$0xff]   ;;  %v882_v21 = vld [vmem:[%s970_s25 + $0x68] sm:$0xff]  }
  0x1d   : > { %816 = vmatprep.subr.bf16.mxu1 %v867_v6  ;;  %v875_v14 = vld [vmem:[%s970_s25 + $0xd8] sm:$0xff]   ;;  %v879_v18 = vld [vmem:[%s970_s25 + $0xe0] sm:$0xff]   ;;  %v883_v22 = vld [vmem:[%s970_s25 + $0xe8] sm:$0xff]  }
  0x1e   : > { %v876_v15 = vld [vmem:[%s970_s25 + $0x18] sm:$0xff]   ;;  %v880_v19 = vld [vmem:[%s970_s25 + $0x20] sm:$0xff]   ;;  %v884_v23 = vld [vmem:[%s970_s25 + $0x28] sm:$0xff]  }
  0x1f   : > { %795 = vmatpush3.bf16.msra.mxu0 %v868_v7  ;;  %v877_v16 = vld [vmem:[%s970_s25 + $0x98] sm:$0xff]   ;;  %v881_v20 = vld [vmem:[%s970_s25 + $0xa0] sm:$0xff]   ;;  %v885_v24 = vld [vmem:[%s970_s25 + $0xa8] sm:$0xff]  }
  0x20   : > { %817 = vmatpush3.bf16.msra.mxu1 %v869_v8  ;;  %796 = vmatprep.subr.bf16.mxu0 %v870_v9  ;;  %v886_v25 = vld [vmem:[%s970_s25 + $0x70] sm:$0xff]   ;;  %v890_v29 = vld [vmem:[%s970_s25 + $0x78] sm:$0xff]   ;;  %v265_v33 = vld [vmem:[%s965_s21] sm:$0xff] }
  0x21   : > { %818 = vmatprep.subr.bf16.mxu1 %v871_v10  ;;  %v887_v26 = vld [vmem:[%s970_s25 + $0xf0] sm:$0xff]   ;;  %v891_v30 = vld [vmem:[%s970_s25 + $0xf8] sm:$0xff]   ;;  %v266_v34 = vld [vmem:[%s965_s21 + $0x8] sm:$0xff]  ;;  %v267_v36 = vmax.bf16 %v919_v35, %v265_v33 }
  0x22   : > { %v888_v27 = vld [vmem:[%s970_s25 + $0x30] sm:$0xff]   ;;  %v892_v31 = vld [vmem:[%s970_s25 + $0x38] sm:$0xff]   ;;  %v268_v37 = vmax.bf16 %v919_v35, %v266_v34  ;;  %v269_v50 = vld [vmem:[#allocation2] sm:$0xff] }
  0x23   : > { %797 = vmatpush3.bf16.msra.mxu0 %v872_v11  ;;  %v889_v28 = vld [vmem:[%s970_s25 + $0xb0] sm:$0xff]   ;;  %v893_v32 = vld [vmem:[%s970_s25 + $0xb8] sm:$0xff]   ;;  %v752_v38 = vcombine.high %v267_v36, %v267_v36  ;;  %v751_v40 = vcombine.low %v267_v36, %v267_v36  ;;  %v788_v56 = vld [vmem:[%s1025_s2] ss:$0 sm:$0xff] (!%p787_p7) }
  0x24   : > { %819 = vmatpush3.bf16.msra.mxu1 %v873_v12  ;;  %798 = vmatprep.subr.bf16.mxu0 %v874_v13  ;;  %v754_v39 = vcombine.high %v268_v37, %v268_v37  ;;  %v753_v41 = vcombine.low %v268_v37, %v268_v37 }
  0x25   : > { %820 = vmatprep.subr.bf16.mxu1 %v875_v14  ;;  %572 = vmatprep.mubr.bf16.mxu0 %v752_v38 }
  0x26   : > { %612 = vmatprep.mubr.bf16.mxu1 %v754_v39 }
  0x27   : > { %799 = vmatpush3.bf16.msra.mxu0 %v876_v15 }
  0x28   : > { %821 = vmatpush3.bf16.msra.mxu1 %v877_v16  ;;  %800 = vmatprep.subr.bf16.mxu0 %v878_v17 }
  0x29   : > { %822 = vmatprep.subr.bf16.mxu1 %v879_v18 }
  0x2b   : > { %801 = vmatpush3.bf16.msra.mxu0 %v880_v19 }
  0x2c   : > { %823 = vmatpush3.bf16.msra.mxu1 %v881_v20  ;;  %802 = vmatprep.subr.bf16.mxu0 %v882_v21 }
  0x2d   : > { %824 = vmatprep.subr.bf16.mxu1 %v883_v22 }
  0x2f   : > { %803 = vmatpush3.bf16.msra.mxu0 %v884_v23 }
  0x30   : > { %825 = vmatpush3.bf16.msra.mxu1 %v885_v24  ;;  %804 = vmatprep.subr.bf16.mxu0 %v886_v25 }
  0x31   : > { %826 = vmatprep.subr.bf16.mxu1 %v887_v26 }
  0x33   : > { %805 = vmatpush3.bf16.msra.mxu0 %v888_v27 }
  0x34   : > { %827 = vmatpush3.bf16.msra.mxu1 %v889_v28  ;;  %806 = vmatprep.subr.bf16.mxu0 %v890_v29 }
  0x35   : > { %828 = vmatprep.subr.bf16.mxu1 %v891_v30 }
  0x37   : > { %807 = vmatpush3.bf16.msra.mxu0 %v892_v31 }
  0x38   : > { %829 = vmatpush3.bf16.msra.mxu1 %v893_v32 }
  0x3a   : > { %573 = vmatmul.mubr.bf16.vlgmr.msra.gmra.mrb[0].mxu0 %v751_v40 }
  0x3b   : > { %613 = vmatmul.mubr.bf16.vlgmr.msra.gmra.mrb[0].mxu1 %v753_v41 }
 0x10d   : > { %v808_v42 = vpop.f32.mrb[0].mxu0 }
 0x10e   : > { %v830_v43 = vpop.f32.mrb[0].mxu1  ;;  %v809_v44 = vpop.f32.mrb[1].mxu0 }
 0x10f   : > { %v831_v45 = vpop.f32.mrb[1].mxu1  ;;  %v810_v46 = vadd.f32 %v809_v44, %v808_v42  ;;  %v811_v48 = vpop.f32.mrb[2].mxu0 }
 0x110   : > { %v832_v47 = vadd.f32 %v831_v45, %v830_v43  ;;  %v833_v49 = vpop.f32.mrb[2].mxu1  ;;  %v812_v51 = vpop.f32.mrb[3].mxu0  ;;  %625 = sbr.rel (%p787_p7) target bundleno = 289 (0x121), region = 40 }
 0x111   : > { %v834_v52 = vpop.f32.mrb[3].mxu1 }
 0x112   : > { %v615_v53 = vadd.f32 %v832_v47, %v810_v46 }
 0x114   : > { %v620_v54 = vadd.f32 %v615_v53, %v269_v50 }
 0x116   : > { %621 = vst [vmem:[#allocation2] sm:$0xff] %v620_v54 }
 0x11d   : > { %v626_v55 = vld [vmem:[#allocation2] sm:$0xff] }
 0x11e   : > { %v634_v57 = vadd.f32 %v788_v56, %v626_v55 }
 0x120   : > { %635 = vst [vmem:[%s1026_s3] sm:$0xff] %v634_v57 }
 0x121 PF: > { %s13_s14 = sadd.s32 1, %s916_s14   ;;  %s1027_s12 = smov %s912_s13 }
 0x122   : > { %p10_p8 = scmp.ge.s32.totalorder %s13_s14, 5   ;;  %s1028_s13 = smov %s1030_s15 }
 0x124   :  { %12 = sbr.rel (!%p10_p8) target bundleno = 2 (0x2), region = 76 }

// kernel: _lambda_.41
= control target key start
LH: loop header
LB: loop body
LE: loop exit
PB: predicated region body
PF: predicated region fallthrough
CT: control target
= control target key end

     0   :  { %s1103_s12 = smov 0   ;;  %s1105_s13 = smov 0   ;;  %s1229_s0 = inlined_call_operand.vmem [shape: bf16[32,1024], index: 0, kind: input, shape index: {}]   ;;  %s1230_s1 = inlined_call_operand.vmem [shape: bf16[1024,128], index: 1, kind: input, shape index: {}]   ;;  %s1231_s2 = inlined_call_operand.vmem [shape: f32[1,128], index: 2, kind: input, shape index: {}]   ;;  %s1232_s3 = inlined_call_operand.vmem [shape: f32[32,128], index: 3, kind: output, shape index: {}]  }
   0x1   :  { %s1107_s14 = smov 0   ;;  %s1109_s15 = smov 0  }
   0x2   :  { %s1111_s16 = smov 0  }
   0x3 LB: > { %s25_s17 = sadd.s32 1, %s1075_s15  ;;  %p48_p1 = scmp.ne.s32.totalorder %s1067_s13, %s1063_s12  ;;  %s1079_s16 = sphi %s1111_s16, %s13_s16   ;;  %s1075_s15 = sphi %s1109_s15, %s1236_s15   ;;  %s1071_s14 = sphi %s1107_s14, %s1235_s14   ;;  %s1067_s13 = sphi %s1105_s13, %s1234_s13   ;;  %s1063_s12 = sphi %s1103_s12, %s1233_s12  }
   0x4   : > { %p26_p0 = scmp.ge.s32.totalorder %s25_s17, 2  ;;  %p49_p2 = scmp.eq.s32.totalorder %s1079_s16, 0 }
   0x5   : > { %s41_s19 = sadd.s32 1, %s1067_s13  ;;  %p855_p5 = scmp.ge.s32.totalorder %s1079_s16, 2 }
   0x6   : > { %s1238_s17 = smov (%p26_p0, %s25_s17), 0  ;;  %p50_p3 = por %p49_p2, %p48_p1 }
   0x7   : > { %s37_s18 = ssub.s32 %s1075_s15, %s1238_s17  ;;  %162 = sbr.rel (%p855_p5) target bundleno = 22 (0x16), region = 20 }
   0x8   : > { %p39_p4 = scmp.eq.s32.totalorder %s37_s18, 0 }
   0xa   : > { %s1138_s20 = scalar_select %p39_p4, %s1067_s13, %s41_s19  }
   0xe   : > { %165 = sbr.rel (!%p50_p3) target bundleno = 22 (0x16), region = 24  ;;  %s167_s21 = sand.u32 (%p50_p3), 1, %s1067_s13  }
   0xf   : > { %s910_s22 = sshll.u32 (%p50_p3), %s1075_s15, 4  ;;  %s856_s23 = sshll.u32 (%p50_p3), %s167_s21, 6 }
  0x10   : > { %s175_s26 = scalar_lea.vmem (%p50_p3), %s1229_s0, %s910_s22  ;;  %s169_s27 = scalar_lea.vmem (%p50_p3), [#allocation3], %s856_s23 }
  0x11   : > { %v188_v0 = vld [vmem:[%s175_s26] sm:$0xff] (%p50_p3)  ;;  %v190_v1 = vld [vmem:[%s175_s26 + $0x8] sm:$0xff] (%p50_p3) }
  0x12   : > { %v192_v2 = vld [vmem:[%s175_s26 + $0x20] sm:$0xff] (%p50_p3)  ;;  %189 = vst [vmem:[%s169_s27] sm:$0xff] (%p50_p3), %v188_v0  ;;  %191 = vst [vmem:[%s169_s27 + $0x8] sm:$0xff] (%p50_p3), %v190_v1  ;;  %v194_v3 = vld [vmem:[%s175_s26 + $0x28] sm:$0xff] (%p50_p3) }
  0x13   : > { %193 = vst [vmem:[%s169_s27 + $0x10] sm:$0xff] (%p50_p3), %v192_v2  ;;  %v196_v4 = vld [vmem:[%s175_s26 + $0x40] sm:$0xff] (%p50_p3)  ;;  %v198_v5 = vld [vmem:[%s175_s26 + $0x48] sm:$0xff] (%p50_p3)  ;;  %195 = vst [vmem:[%s169_s27 + $0x18] sm:$0xff] (%p50_p3), %v194_v3 }
  0x14   : > { %197 = vst [vmem:[%s169_s27 + $0x20] sm:$0xff] (%p50_p3), %v196_v4  ;;  %199 = vst [vmem:[%s169_s27 + $0x28] sm:$0xff] (%p50_p3), %v198_v5  ;;  %v200_v6 = vld [vmem:[%s175_s26 + $0x60] sm:$0xff] (%p50_p3)  ;;  %v202_v7 = vld [vmem:[%s175_s26 + $0x68] sm:$0xff] (%p50_p3) }
  0x15   : > { %201 = vst [vmem:[%s169_s27 + $0x30] sm:$0xff] %v200_v6  ;;  %203 = vst [vmem:[%s169_s27 + $0x38] sm:$0xff] %v202_v7 }
  0x16 PF: > { %p859_p6 = scmp.ge.s32.totalorder %s1079_s16, 1  ;;  %p220_p7 = scmp.lt.s32.totalorder %s1079_s16, 3 }
  0x18   : > { %p221_p8 = pnand %p859_p6, %p220_p7 }
  0x19   : > { %s227_s28 = sand.u32 (!%p221_p8), 1, %s1063_s12   ;;  %s861_s29 = sshll.u32 (!%p221_p8), %s1071_s14, 6 }
  0x1a   : > { %224 = sbr.rel (%p221_p8) target bundleno = 315 (0x13b), region = 51  ;;  %s860_s30 = sshll.u32 (!%p221_p8), %s227_s28, 6 }
  0x1b   : > { %p267_p9 = scmp.lt.s32.totalorder (!%p221_p8), %s861_s29, 127  ;;  %s1155_s8 = scalar_lea.vmem (!%p221_p8), [#allocation3], %s860_s30 }
  0x1c   : > { %p863_p10 = scmp.ne.s32.totalorder (!%p221_p8), %s1071_s14, 0 }
  0x21   : > { %s1240_s29 = smov (!%p267_p9, %s861_s29), 127  ;;  %291 = sbr.rel (%p863_p10) target bundleno = 40 (0x28), region = 59 }
  0x22   : > { %s862_s4 = sshll.u32 %s1240_s29, 2  ;;  %v1081_v8 = vmov (!%p863_p10), 0.0  }
  0x23   : > { %s1153_s7 = scalar_lea.vmem %s1230_s1, %s862_s4  ;;  %292 = vst [vmem:[#allocation2] sm:$0xff] (!%p863_p10), %v1081_v8  ;;  %293 = vst [vmem:[#allocation2 + $0x8] sm:$0xff] (!%p863_p10), %v1081_v8 }
  0x24   : > { %294 = vst [vmem:[#allocation2 + $0x10] sm:$0xff] (!%p863_p10), %v1081_v8  ;;  %295 = vst [vmem:[#allocation2 + $0x18] sm:$0xff] (!%p863_p10), %v1081_v8 }
  0x28 PF: > { %v1009_v9 = vld [vmem:[%s1153_s7 + $0x40] sm:$0xff]   ;;  %v1013_v13 = vld [vmem:[%s1153_s7 + $0x48] sm:$0xff]   ;;  %v1017_v17 = vld [vmem:[%s1153_s7 + $0x50] sm:$0xff]   ;;  %v1082_v44 = vmov 0   ;;  %p904_p11 = scmp.ne.s32.totalorder %s1071_s14, 1 }
  0x29   : > { %v1010_v10 = vld [vmem:[%s1153_s7 + $0xc0] sm:$0xff]   ;;  %911 = vmatprep.subr.bf16.mxu0 %v1009_v9  ;;  %v1014_v14 = vld [vmem:[%s1153_s7 + $0xc8] sm:$0xff]   ;;  %v1018_v18 = vld [vmem:[%s1153_s7 + $0xd0] sm:$0xff]  }
  0x2a   : > { %v1011_v11 = vld [vmem:[%s1153_s7] sm:$0xff]   ;;  %939 = vmatprep.subr.bf16.mxu1 %v1010_v10  ;;  %v1015_v15 = vld [vmem:[%s1153_s7 + $0x8] sm:$0xff]   ;;  %v1019_v19 = vld [vmem:[%s1153_s7 + $0x10] sm:$0xff]  }
  0x2b   : > { %v1012_v12 = vld [vmem:[%s1153_s7 + $0x80] sm:$0xff]   ;;  %912 = vmatpush3.bf16.msra.mxu0 %v1011_v11  ;;  %v1016_v16 = vld [vmem:[%s1153_s7 + $0x88] sm:$0xff]   ;;  %v1020_v20 = vld [vmem:[%s1153_s7 + $0x90] sm:$0xff]  }
  0x2c   : > { %940 = vmatpush3.bf16.msra.mxu1 %v1012_v12  ;;  %913 = vmatprep.subr.bf16.mxu0 %v1013_v13  ;;  %v1021_v21 = vld [vmem:[%s1153_s7 + $0x58] sm:$0xff]   ;;  %v1025_v25 = vld [vmem:[%s1153_s7 + $0x60] sm:$0xff]   ;;  %v1029_v29 = vld [vmem:[%s1153_s7 + $0x68] sm:$0xff]  }
  0x2d   : > { %941 = vmatprep.subr.bf16.mxu1 %v1014_v14  ;;  %v1022_v22 = vld [vmem:[%s1153_s7 + $0xd8] sm:$0xff]   ;;  %v1026_v26 = vld [vmem:[%s1153_s7 + $0xe0] sm:$0xff]   ;;  %v1030_v30 = vld [vmem:[%s1153_s7 + $0xe8] sm:$0xff]  }
  0x2e   : > { %v1023_v23 = vld [vmem:[%s1153_s7 + $0x18] sm:$0xff]   ;;  %v1027_v27 = vld [vmem:[%s1153_s7 + $0x20] sm:$0xff]   ;;  %v1031_v31 = vld [vmem:[%s1153_s7 + $0x28] sm:$0xff]  }
  0x2f   : > { %914 = vmatpush3.bf16.msra.mxu0 %v1015_v15  ;;  %v1024_v24 = vld [vmem:[%s1153_s7 + $0x98] sm:$0xff]   ;;  %v1028_v28 = vld [vmem:[%s1153_s7 + $0xa0] sm:$0xff]   ;;  %v1032_v32 = vld [vmem:[%s1153_s7 + $0xa8] sm:$0xff]  }
  0x30   : > { %942 = vmatpush3.bf16.msra.mxu1 %v1016_v16  ;;  %915 = vmatprep.subr.bf16.mxu0 %v1017_v17  ;;  %v1033_v33 = vld [vmem:[%s1153_s7 + $0x70] sm:$0xff]   ;;  %v1037_v37 = vld [vmem:[%s1153_s7 + $0x78] sm:$0xff]   ;;  %v296_v41 = vld [vmem:[%s1155_s8] sm:$0xff] }
  0x31   : > { %943 = vmatprep.subr.bf16.mxu1 %v1018_v18  ;;  %v1034_v34 = vld [vmem:[%s1153_s7 + $0xf0] sm:$0xff]   ;;  %v1038_v38 = vld [vmem:[%s1153_s7 + $0xf8] sm:$0xff]   ;;  %v297_v43 = vld [vmem:[%s1155_s8 + $0x8] sm:$0xff]  ;;  %v304_v45 = vmax.bf16 %v1082_v44, %v296_v41 }
  0x32   : > { %v1035_v35 = vld [vmem:[%s1153_s7 + $0x30] sm:$0xff]   ;;  %v1039_v39 = vld [vmem:[%s1153_s7 + $0x38] sm:$0xff]   ;;  %v305_v48 = vmax.bf16 %v1082_v44, %v297_v43  ;;  %v300_v49 = vld [vmem:[%s1155_s8 + $0x20] sm:$0xff] }
  0x33   : > { %916 = vmatpush3.bf16.msra.mxu0 %v1019_v19  ;;  %v1036_v36 = vld [vmem:[%s1153_s7 + $0xb0] sm:$0xff]   ;;  %v1040_v40 = vld [vmem:[%s1153_s7 + $0xb8] sm:$0xff]   ;;  %v308_v52 = vmax.bf16 %v1082_v44, %v300_v49  ;;  %v301_v54 = vld [vmem:[%s1155_s8 + $0x28] sm:$0xff] }
  0x34   : > { %944 = vmatpush3.bf16.msra.mxu1 %v1020_v20  ;;  %917 = vmatprep.subr.bf16.mxu0 %v1021_v21  ;;  %v298_v42 = vld [vmem:[%s1155_s8 + $0x10] sm:$0xff]  ;;  %v299_v47 = vld [vmem:[%s1155_s8 + $0x18] sm:$0xff]  ;;  %v309_v58 = vmax.bf16 %v1082_v44, %v301_v54  ;;  %v312_v11 = vld [vmem:[#allocation2] sm:$0xff] }
  0x35   : > { %945 = vmatprep.subr.bf16.mxu1 %v1022_v22  ;;  %v306_v46 = vmax.bf16 %v1082_v44, %v298_v42  ;;  %v302_v50 = vld [vmem:[%s1155_s8 + $0x30] sm:$0xff]  ;;  %v307_v51 = vmax.bf16 %v1082_v44, %v299_v47  ;;  %v303_v55 = vld [vmem:[%s1155_s8 + $0x38] sm:$0xff]  ;;  %v313_v16 = vld [vmem:[#allocation2 + $0x8] sm:$0xff] }
  0x36   : > { %v310_v53 = vmax.bf16 %v1082_v44, %v302_v50  ;;  %v311_v59 = vmax.bf16 %v1082_v44, %v303_v55 }
  0x37   : > { %918 = vmatpush3.bf16.msra.mxu0 %v1023_v23  ;;  %v865_v56 = vcombine.high %v304_v45, %v306_v46  ;;  %v864_v57 = vcombine.low %v304_v45, %v306_v46  ;;  %v867_v60 = vcombine.high %v305_v48, %v307_v51  ;;  %v866_v61 = vcombine.low %v305_v48, %v307_v51 }
  0x38   : > { %946 = vmatpush3.bf16.msra.mxu1 %v1024_v24  ;;  %919 = vmatprep.subr.bf16.mxu0 %v1025_v25  ;;  %v869_v62 = vcombine.high %v308_v52, %v310_v53  ;;  %v871_v63 = vcombine.high %v309_v58, %v311_v59  ;;  %v868_v0 = vcombine.low %v308_v52, %v310_v53 }
  0x39   : > { %947 = vmatprep.subr.bf16.mxu1 %v1026_v26  ;;  %644 = vmatprep.mubr.bf16.mxu0 %v865_v56  ;;  %v870_v1 = vcombine.low %v309_v58, %v311_v59 }
  0x3a   : > { %693 = vmatprep.mubr.bf16.mxu1 %v867_v60 }
  0x3b   : > { %920 = vmatpush3.bf16.msra.mxu0 %v1027_v27 }
  0x3c   : > { %948 = vmatpush3.bf16.msra.mxu1 %v1028_v28  ;;  %921 = vmatprep.subr.bf16.mxu0 %v1029_v29  ;;  %v314_v29 = vld [vmem:[#allocation2 + $0x10] sm:$0xff] }
  0x3d   : > { %949 = vmatprep.subr.bf16.mxu1 %v1030_v30 }
  0x3f   : > { %922 = vmatpush3.bf16.msra.mxu0 %v1031_v31 }
  0x40   : > { %950 = vmatpush3.bf16.msra.mxu1 %v1032_v32  ;;  %923 = vmatprep.subr.bf16.mxu0 %v1033_v33 }
  0x41   : > { %951 = vmatprep.subr.bf16.mxu1 %v1034_v34  ;;  %v315_v34 = vld [vmem:[#allocation2 + $0x18] sm:$0xff] }
  0x43   : > { %924 = vmatpush3.bf16.msra.mxu0 %v1035_v35 }
  0x44   : > { %952 = vmatpush3.bf16.msra.mxu1 %v1036_v36  ;;  %925 = vmatprep.subr.bf16.mxu0 %v1037_v37 }
  0x45   : > { %953 = vmatprep.subr.bf16.mxu1 %v1038_v38 }
  0x47   : > { %926 = vmatpush3.bf16.msra.mxu0 %v1039_v39  ;;  %v905_v39 = vld [vmem:[%s1231_s2] ss:$0 sm:$0xff] (!%p904_p11) }
  0x48   : > { %954 = vmatpush3.bf16.msra.mxu1 %v1040_v40 }
  0x4a   : > { %645 = vmatmul.mubr.bf16.vlgmr.msra.gmra.mrb[0].mxu0 %v864_v57 }
  0x4b   : > { %694 = vmatmul.mubr.bf16.vlgmr.msra.gmra.mrb[0].mxu1 %v866_v61  ;;  %652 = vmatprep.mubr.bf16.mxu0 %v869_v62 }
  0x4c   : > { %701 = vmatprep.mubr.bf16.mxu1 %v871_v63 }
  0x52   : > { %653 = vmatmul.mubr.bf16.gmra.mrb[4].mxu0 %v868_v0 }
  0x53   : > { %702 = vmatmul.mubr.bf16.gmra.mrb[4].mxu1 %v870_v1 }
 0x11d   : > { %v927_v2 = vpop.f32.mrb[0].mxu0 }
 0x11e   : > { %v955_v3 = vpop.f32.mrb[0].mxu1  ;;  %v928_v4 = vpop.f32.mrb[1].mxu0 }
 0x11f   : > { %v929_v5 = vadd.f32 %v928_v4, %v927_v2  ;;  %v956_v6 = vpop.f32.mrb[1].mxu1  ;;  %v930_v7 = vpop.f32.mrb[2].mxu0 }
 0x120   : > { %v957_v8 = vadd.f32 %v956_v6, %v955_v3  ;;  %v958_v9 = vpop.f32.mrb[2].mxu1  ;;  %v931_v10 = vpop.f32.mrb[3].mxu0 }
 0x121   : > { %v932_v12 = vadd.f32 %v931_v10, %v930_v7  ;;  %v959_v13 = vpop.f32.mrb[3].mxu1 }
 0x122   : > { %v696_v14 = vadd.f32 %v957_v8, %v929_v5  ;;  %v960_v15 = vadd.f32 %v959_v13, %v958_v9 }
 0x124   : > { %v710_v17 = vadd.f32 %v696_v14, %v312_v11  ;;  %v699_v18 = vadd.f32 %v960_v15, %v932_v12 }
 0x125   : > { %v933_v19 = vpop.f32.mrb[4].mxu0 }
 0x126   : > { %714 = vst [vmem:[#allocation2] sm:$0xff] %v710_v17  ;;  %v711_v20 = vadd.f32 %v699_v18, %v313_v16  ;;  %v961_v21 = vpop.f32.mrb[4].mxu1  ;;  %v934_v22 = vpop.f32.mrb[5].mxu0 }
 0x127   : > { %v935_v23 = vadd.f32 %v934_v22, %v933_v19  ;;  %v962_v24 = vpop.f32.mrb[5].mxu1  ;;  %v936_v25 = vpop.f32.mrb[6].mxu0 }
 0x128   : > { %715 = vst [vmem:[#allocation2 + $0x8] sm:$0xff] %v711_v20  ;;  %v963_v26 = vadd.f32 %v962_v24, %v961_v21  ;;  %v964_v27 = vpop.f32.mrb[6].mxu1  ;;  %v937_v28 = vpop.f32.mrb[7].mxu0 }
 0x129   : > { %v938_v30 = vadd.f32 %v937_v28, %v936_v25  ;;  %v965_v31 = vpop.f32.mrb[7].mxu1 }
 0x12a   : > { %v704_v32 = vadd.f32 %v963_v26, %v935_v23  ;;  %v966_v33 = vadd.f32 %v965_v31, %v964_v27  ;;  %721 = sbr.rel (%p904_p11) target bundleno = 315 (0x13b), region = 63 }
 0x12c   : > { %v712_v35 = vadd.f32 %v704_v32, %v314_v29  ;;  %v707_v36 = vadd.f32 %v966_v33, %v938_v30 }
 0x12d   : > { %v722_v38 = vld [vmem:[#allocation2] sm:$0xff] (!%p904_p11) }
 0x12e   : > { %716 = vst [vmem:[#allocation2 + $0x10] sm:$0xff] %v712_v35  ;;  %v713_v37 = vadd.f32 %v707_v36, %v315_v34  ;;  %v733_v41 = vadd.f32 (!%p904_p11), %v905_v39, %v722_v38 }
 0x12f   : > { %v723_v40 = vld [vmem:[#allocation2 + $0x8] sm:$0xff] (!%p904_p11) }
 0x130   : > { %717 = vst [vmem:[#allocation2 + $0x18] sm:$0xff] %v713_v37  ;;  %v734_v42 = vadd.f32 (!%p904_p11), %v905_v39, %v723_v40  ;;  %737 = vst [vmem:[%s1232_s3] sm:$0xff] (!%p904_p11), %v733_v41 }
 0x132   : > { %738 = vst [vmem:[%s1232_s3 + $0x8] sm:$0xff] %v734_v42 }
 0x135   : > { %v724_v43 = vld [vmem:[#allocation2 + $0x10] sm:$0xff] }
 0x136   : > { %v735_v45 = vadd.f32 %v905_v39, %v724_v43 }
 0x137   : > { %v725_v44 = vld [vmem:[#allocation2 + $0x18] sm:$0xff] }
 0x138   : > { %v736_v46 = vadd.f32 %v905_v39, %v725_v44  ;;  %739 = vst [vmem:[%s1232_s3 + $0x10] sm:$0xff] %v735_v45 }
 0x13a   : > { %740 = vst [vmem:[%s1232_s3 + $0x18] sm:$0xff] %v736_v46 }
 0x13b PF: > { %s13_s16 = sadd.s32 1, %s1079_s16   ;;  %s1233_s12 = smov %s1067_s13 }
 0x13c   : > { %p10_p12 = scmp.ge.s32.totalorder %s13_s16, 4   ;;  %s1234_s13 = smov %s1138_s20 }
 0x13d   : > { %s1235_s14 = smov %s1075_s15  ;;  %s1236_s15 = smov %s1238_s17 }
 0x13e   :  { %12 = sbr.rel (!%p10_p12) target bundleno = 3 (0x3), region = 104 }

// kernel: _lambda_.44
= control target key start
LH: loop header
LB: loop body
LE: loop exit
PB: predicated region body
PF: predicated region fallthrough
CT: control target
= control target key end

     0   :  { %v909_v25 = vmov 0   ;;  %s1199_s1 = inlined_call_operand.vmem [shape: bf16[384,128], index: 1, kind: input, shape index: {}]   ;;  %s1200_s0 = inlined_call_operand.vmem [shape: bf16[128,384], index: 0, kind: input, shape index: {}]   ;;  %s1201_s2 = inlined_call_operand.vmem [shape: f32[1,128], index: 2, kind: input, shape index: {}]   ;;  %s1202_s3 = inlined_call_operand.vmem [shape: f32[128,128], index: 3, kind: output, shape index: {}]  }
   0x1   :  { %v885_v0 = vld [vmem:[%s1199_s1 + $0x40] sm:$0xff]   ;;  %v888_v3 = vld [vmem:[%s1199_s1 + $0x48] sm:$0xff]   ;;  %v891_v6 = vld [vmem:[%s1199_s1 + $0x50] sm:$0xff]  }
   0x2   :  { %v886_v1 = vld [vmem:[%s1199_s1] sm:$0xff]   ;;  %772 = vmatprep.subr.bf16.mxu0 %v885_v0  ;;  %v889_v4 = vld [vmem:[%s1199_s1 + $0x8] sm:$0xff]   ;;  %v892_v7 = vld [vmem:[%s1199_s1 + $0x10] sm:$0xff]  }
   0x3   :  { %v887_v2 = vld [vmem:[%s1199_s1 + $0x80] sm:$0xff]   ;;  %773 = vmatpush3.bf16.msra.mxu0 %v886_v1  ;;  %v890_v5 = vld [vmem:[%s1199_s1 + $0x88] sm:$0xff]   ;;  %v893_v8 = vld [vmem:[%s1199_s1 + $0x90] sm:$0xff]  }
   0x4   :  { %852 = vmatprep.subr.bf16.mxu1 %v887_v2  ;;  %774 = vmatprep.subr.bf16.mxu0 %v888_v3  ;;  %v894_v9 = vld [vmem:[%s1199_s1 + $0x58] sm:$0xff]   ;;  %v897_v12 = vld [vmem:[%s1199_s1 + $0x60] sm:$0xff]   ;;  %v900_v15 = vld [vmem:[%s1199_s1 + $0x68] sm:$0xff]  }
   0x5   :  { %853 = vmatpush3.bf16.msra.mxu1 %v887_v2  ;;  %v895_v10 = vld [vmem:[%s1199_s1 + $0x18] sm:$0xff]   ;;  %v899_v13 = vld [vmem:[%s1199_s1 + $0xa0] sm:$0xff]   ;;  %v902_v16 = vld [vmem:[%s1199_s1 + $0xa8] sm:$0xff]  }
   0x6   :  { %854 = vmatprep.subr.bf16.mxu1 %v890_v5  ;;  %v896_v11 = vld [vmem:[%s1199_s1 + $0x98] sm:$0xff]   ;;  %v898_v14 = vld [vmem:[%s1199_s1 + $0x20] sm:$0xff]   ;;  %v901_v17 = vld [vmem:[%s1199_s1 + $0x28] sm:$0xff]  }
   0x7   :  { %775 = vmatpush3.bf16.msra.mxu0 %v889_v4  ;;  %v903_v18 = vld [vmem:[%s1199_s1 + $0x70] sm:$0xff]   ;;  %v906_v21 = vld [vmem:[%s1199_s1 + $0x78] sm:$0xff]   ;;  %v35_v22 = vld [vmem:[%s1200_s0] sm:$0xff] }
   0x8   :  { %776 = vmatprep.subr.bf16.mxu0 %v891_v6  ;;  %v904_v19 = vld [vmem:[%s1199_s1 + $0x30] sm:$0xff]   ;;  %v36_v24 = vld [vmem:[%s1200_s0 + $0x8] sm:$0xf]  ;;  %v67_v26 = vmax.bf16 %v909_v25, %v35_v22  ;;  %v40_v30 = vld [vmem:[%s1200_s0 + $0x20] sm:$0xf] }
   0x9   :  { %855 = vmatpush3.bf16.msra.mxu1 %v890_v5  ;;  %v905_v20 = vld [vmem:[%s1199_s1 + $0xb0] sm:$0xff]   ;;  %v68_v29 = vmax.bf16 %v909_v25, %v36_v24  ;;  %v42_v31 = vld [vmem:[%s1200_s0 + $0x2c] sm:$0xf]  ;;  %v908_v32 = vld [vmem:[%s1199_s1 + $0xb8] sm:$0xff]   ;;  %v72_v43 = vmax.bf16 %v909_v25, %v40_v30 }
   0xa   :  { %856 = vmatprep.subr.bf16.mxu1 %v893_v8  ;;  %v37_v23 = vld [vmem:[%s1200_s0 + $0xc] sm:$0xff]  ;;  %v38_v28 = vld [vmem:[%s1200_s0 + $0x14] sm:$0xf]  ;;  %v39_v34 = vld [vmem:[%s1200_s0 + $0x18] sm:$0xff]  ;;  %v74_v44 = vmax.bf16 %v909_v25, %v42_v31 }
   0xb   :  { %777 = vmatpush3.bf16.msra.mxu0 %v892_v7  ;;  %v69_v27 = vmax.bf16 %v909_v25, %v37_v23  ;;  %v70_v33 = vmax.bf16 %v909_v25, %v38_v28  ;;  %v41_v35 = vld [vmem:[%s1200_s0 + $0x24] sm:$0xff]  ;;  %v907_v36 = vld [vmem:[%s1199_s1 + $0x38] sm:$0xff]   ;;  %v71_v38 = vmax.bf16 %v909_v25, %v39_v34  ;;  %v43_v50 = vld [vmem:[%s1200_s0 + $0x30] sm:$0xff] }
   0xc   :  { %778 = vmatprep.subr.bf16.mxu0 %v894_v9  ;;  %v73_v39 = vmax.bf16 %v909_v25, %v41_v35  ;;  %v44_v40 = vld [vmem:[%s1200_s0 + $0x38] sm:$0xf]  ;;  %v46_v41 = vld [vmem:[%s1200_s0 + $0x44] sm:$0xf]  ;;  %v728_v49 = vcombine.low %v72_v43, %v74_v44  ;;  %v45_v51 = vld [vmem:[%s1200_s0 + $0x3c] sm:$0xff]  ;;  %v75_v57 = vmax.bf16 %v909_v25, %v43_v50 }
   0xd   :  { %857 = vmatpush3.bf16.msra.mxu1 %v893_v8  ;;  %v724_v37 = vcombine.high %v67_v26, %v69_v27  ;;  %v725_v42 = vcombine.low %v68_v29, %v70_v33  ;;  %v76_v45 = vmax.bf16 %v909_v25, %v44_v40  ;;  %v723_v46 = vcombine.low %v67_v26, %v69_v27  ;;  %v48_v53 = vld [vmem:[%s1200_s0 + $0x50] sm:$0xf]  ;;  %v50_v54 = vld [vmem:[%s1200_s0 + $0x5c] sm:$0xf]  ;;  %v52_v55 = vld [vmem:[%s1200_s0 + $0x68] sm:$0xf] }
   0xe   :  { %858 = vmatprep.subr.bf16.mxu1 %v896_v11  ;;  %v78_v47 = vmax.bf16 %v909_v25, %v46_v41  ;;  %v727_v48 = vcombine.high %v71_v38, %v73_v39  ;;  %v54_v56 = vld [vmem:[%s1200_s0 + $0x74] sm:$0xf]  ;;  %v77_v58 = vmax.bf16 %v909_v25, %v45_v51  ;;  %v80_v59 = vmax.bf16 %v909_v25, %v48_v53  ;;  %v47_v2 = vld [vmem:[%s1200_s0 + $0x48] sm:$0xff]  ;;  %v56_v5 = vld [vmem:[%s1200_s0 + $0x80] sm:$0xf] }
   0xf   :  { %779 = vmatpush3.bf16.msra.mxu0 %v895_v10  ;;  %467 = vmatprep.mubr.bf16.mxu0 %v724_v37  ;;  %v82_v60 = vmax.bf16 %v909_v25, %v50_v54  ;;  %v84_v61 = vmax.bf16 %v909_v25, %v52_v55  ;;  %v86_v62 = vmax.bf16 %v909_v25, %v54_v56  ;;  %v49_v3 = vld [vmem:[%s1200_s0 + $0x54] sm:$0xff]  ;;  %v58_v6 = vld [vmem:[%s1200_s0 + $0x8c] sm:$0xf]  ;;  %v62_v8 = vld [vmem:[%s1200_s0 + $0xa4] sm:$0xf] }
  0x10   :  { %780 = vmatprep.subr.bf16.mxu0 %v897_v12  ;;  %868 = vmatprep.mubr.bf16.mxu1 %v725_v42  ;;  %v731_v52 = vcombine.low %v76_v45, %v78_v47  ;;  %v726_v63 = vcombine.low %v71_v38, %v73_v39  ;;  %v730_v0 = vcombine.high %v75_v57, %v77_v58  ;;  %v60_v7 = vld [vmem:[%s1200_s0 + $0x98] sm:$0xf]  ;;  %v66_v22 = vld [vmem:[%s1200_s0 + $0xbc] sm:$0xf]  ;;  %v57_v31 = vld [vmem:[%s1200_s0 + $0x84] sm:$0xff] }
  0x11   :  { %859 = vmatpush3.bf16.msra.mxu1 %v896_v11  ;;  %v734_v1 = vcombine.low %v80_v59, %v82_v60  ;;  %v737_v4 = vcombine.low %v84_v61, %v86_v62  ;;  %v79_v9 = vmax.bf16 %v909_v25, %v47_v2  ;;  %v81_v10 = vmax.bf16 %v909_v25, %v49_v3  ;;  %v55_v30 = vld [vmem:[%s1200_s0 + $0x78] sm:$0xff]  ;;  %v59_v37 = vld [vmem:[%s1200_s0 + $0x90] sm:$0xff]  ;;  %v63_v43 = vld [vmem:[%s1200_s0 + $0xa8] sm:$0xff] }
  0x12   :  { %860 = vmatprep.subr.bf16.mxu1 %v899_v13  ;;  %v88_v11 = vmax.bf16 %v909_v25, %v56_v5  ;;  %v90_v12 = vmax.bf16 %v909_v25, %v58_v6  ;;  %v98_v27 = vmax.bf16 %v909_v25, %v66_v22  ;;  %v87_v33 = vmax.bf16 %v909_v25, %v55_v30  ;;  %v61_v38 = vld [vmem:[%s1200_s0 + $0x9c] sm:$0xff]  ;;  %v65_v44 = vld [vmem:[%s1200_s0 + $0xb4] sm:$0xff] }
  0x13   :  { %781 = vmatpush3.bf16.msra.mxu0 %v898_v14  ;;  %v94_v14 = vmax.bf16 %v909_v25, %v62_v8  ;;  %v732_v28 = vcombine.low %v79_v9, %v81_v10  ;;  %v89_v34 = vmax.bf16 %v909_v25, %v57_v31  ;;  %v91_v39 = vmax.bf16 %v909_v25, %v59_v37 }
  0x14   :  { %782 = vmatprep.subr.bf16.mxu0 %v900_v15  ;;  %v729_v15 = vcombine.low %v75_v57, %v77_v58  ;;  %v93_v40 = vmax.bf16 %v909_v25, %v61_v38  ;;  %v95_v45 = vmax.bf16 %v909_v25, %v63_v43  ;;  %v1133_v57 = vld [vmem:[%s1201_s2] ss:$0 sm:$0xff] }
  0x15   :  { %861 = vmatpush3.bf16.msra.mxu1 %v899_v13  ;;  %v92_v13 = vmax.bf16 %v909_v25, %v60_v7  ;;  %v738_v41 = vcombine.low %v87_v33, %v89_v34 }
  0x16   :  { %862 = vmatprep.subr.bf16.mxu1 %v902_v16  ;;  %v742_v42 = vcombine.high %v91_v39, %v93_v40  ;;  %v741_v47 = vcombine.low %v91_v39, %v93_v40 }
  0x17   :  { %783 = vmatpush3.bf16.msra.mxu0 %v901_v17  ;;  %v51_v17 = vld [vmem:[%s1200_s0 + $0x60] sm:$0xff] }
  0x18   :  { %784 = vmatprep.subr.bf16.mxu0 %v903_v18  ;;  %v53_v18 = vld [vmem:[%s1200_s0 + $0x6c] sm:$0xff]  ;;  %v83_v23 = vmax.bf16 %v909_v25, %v51_v17 }
  0x19   :  { %863 = vmatpush3.bf16.msra.mxu1 %v902_v16  ;;  %v733_v16 = vcombine.high %v79_v9, %v81_v10  ;;  %v85_v24 = vmax.bf16 %v909_v25, %v53_v18 }
  0x1a   :  { %864 = vmatprep.subr.bf16.mxu1 %v905_v20 }
  0x1b   :  { %785 = vmatpush3.bf16.msra.mxu0 %v904_v19  ;;  %v740_v19 = vcombine.low %v88_v11, %v90_v12  ;;  %v736_v29 = vcombine.high %v83_v23, %v85_v24  ;;  %v735_v35 = vcombine.low %v83_v23, %v85_v24 }
  0x1c   :  { %786 = vmatprep.subr.bf16.mxu0 %v906_v21  ;;  %v64_v21 = vld [vmem:[%s1200_s0 + $0xb0] sm:$0xf] }
  0x1d   :  { %865 = vmatpush3.bf16.msra.mxu1 %v905_v20  ;;  %v743_v20 = vcombine.low %v92_v13, %v94_v14  ;;  %v96_v26 = vmax.bf16 %v909_v25, %v64_v21 }
  0x1e   :  { %866 = vmatprep.subr.bf16.mxu1 %v908_v32 }
  0x1f   :  { %787 = vmatpush3.bf16.msra.mxu0 %v907_v36  ;;  %v739_v36 = vcombine.high %v87_v33, %v89_v34 }
  0x21   :  { %867 = vmatpush3.bf16.msra.mxu1 %v908_v32  ;;  %v746_v32 = vcombine.low %v96_v26, %v98_v27 }
  0x22   :  { %468 = vmatmul.mubr.bf16.vlgmr.msra.gmra.mrb[0].mxu0 %v723_v46  ;;  %v97_v46 = vmax.bf16 %v909_v25, %v65_v44 }
  0x23   :  { %475 = vmatprep.mubr.bf16.mxu0 %v727_v48 }
  0x24   :  { %869 = vmatmul.mubr.bf16.vlgmr.msra.gmra.mrb[0].mxu1 %v728_v49  ;;  %v745_v48 = vcombine.high %v95_v45, %v97_v46  ;;  %v744_v49 = vcombine.low %v95_v45, %v97_v46 }
  0x25   :  { %872 = vmatprep.mubr.bf16.mxu1 %v731_v52 }
  0x2a   :  { %476 = vmatmul.mubr.bf16.gmra.mrb[4].mxu0 %v726_v63 }
  0x2b   :  { %483 = vmatprep.mubr.bf16.mxu0 %v730_v0 }
  0x2c   :  { %873 = vmatmul.mubr.bf16.gmra.mrb[4].mxu1 %v734_v1 }
  0x2d   :  { %876 = vmatprep.mubr.bf16.mxu1 %v737_v4 }
  0x32   :  { %484 = vmatmul.mubr.bf16.gmra.mrb[8].mxu0 %v729_v15 }
  0x33   :  { %491 = vmatprep.mubr.bf16.mxu0 %v733_v16 }
  0x34   :  { %877 = vmatmul.mubr.bf16.gmra.mrb[8].mxu1 %v740_v19 }
  0x35   :  { %880 = vmatprep.mubr.bf16.mxu1 %v743_v20 }
  0x3a   :  { %492 = vmatmul.mubr.bf16.gmra.mrb[12].mxu0 %v732_v28 }
  0x3b   :  { %499 = vmatprep.mubr.bf16.mxu0 %v736_v29 }
  0x3c   :  { %881 = vmatmul.mubr.bf16.gmra.mrb[12].mxu1 %v746_v32 }
  0x42   :  { %500 = vmatmul.mubr.bf16.gmra.mrb[16].mxu0 %v735_v35 }
  0x43   :  { %507 = vmatprep.mubr.bf16.mxu0 %v739_v36 }
  0x4a   :  { %508 = vmatmul.mubr.bf16.gmra.mrb[20].mxu0 %v738_v41 }
  0x4b   :  { %515 = vmatprep.mubr.bf16.mxu0 %v742_v42 }
  0x52   :  { %516 = vmatmul.mubr.bf16.gmra.mrb[24].mxu0 %v741_v47 }
  0x53   :  { %523 = vmatprep.mubr.bf16.mxu0 %v745_v48 }
  0x5a   :  { %524 = vmatmul.mubr.bf16.gmra.mrb[28].mxu0 %v744_v49 }
  0xf5   :  { %v788_v50 = vpop.f32.mrb[0].mxu0 }
  0xf6   :  { %v789_v51 = vpop.f32.mrb[1].mxu0 }
  0xf7   :  { %v790_v52 = vadd.f32 %v789_v51, %v788_v50  ;;  %v791_v53 = vpop.f32.mrb[2].mxu0  ;;  %v870_v54 = vpop.f32.mrb[0].mxu1 }
  0xf8   :  { %v792_v55 = vpop.f32.mrb[3].mxu0  ;;  %v566_v56 = vpop.f32.mrb[1].mxu1 }
  0xf9   :  { %v793_v58 = vadd.f32 %v792_v55, %v791_v53  ;;  %v567_v25 = vadd.f32 %v790_v52, %v566_v56  ;;  %v871_v59 = vpop.f32.mrb[2].mxu1 }
  0xfa   :  { %v569_v60 = vpop.f32.mrb[3].mxu1 }
  0xfb   :  { %v687_v61 = vadd.f32 %v1133_v57, %v567_v25  ;;  %v570_v62 = vadd.f32 %v793_v58, %v569_v60 }
  0xfd   :  { %703 = vst [vmem:[%s1202_s3] sm:$0xff] %v687_v61  ;;  %v688_v63 = vadd.f32 %v1133_v57, %v570_v62  ;;  %v794_v0 = vpop.f32.mrb[4].mxu0 }
  0xfe   :  { %v795_v1 = vpop.f32.mrb[5].mxu0 }
  0xff   :  { %704 = vst [vmem:[%s1202_s3 + $0x8] sm:$0xff] %v688_v63  ;;  %v796_v2 = vadd.f32 %v795_v1, %v794_v0  ;;  %v797_v3 = vpop.f32.mrb[6].mxu0  ;;  %v874_v4 = vpop.f32.mrb[4].mxu1 }
 0x100   :  { %v798_v5 = vpop.f32.mrb[7].mxu0  ;;  %v582_v6 = vpop.f32.mrb[5].mxu1 }
 0x101   :  { %v575_v7 = vadd.f32 %v870_v54, %v796_v2  ;;  %v799_v8 = vadd.f32 %v798_v5, %v797_v3  ;;  %v875_v9 = vpop.f32.mrb[6].mxu1 }
 0x102   :  { %v585_v10 = vpop.f32.mrb[7].mxu1 }
 0x103   :  { %v689_v11 = vadd.f32 %v1133_v57, %v575_v7  ;;  %v578_v12 = vadd.f32 %v871_v59, %v799_v8 }
 0x105   :  { %705 = vst [vmem:[%s1202_s3 + $0x10] sm:$0xff] %v689_v11  ;;  %v690_v13 = vadd.f32 %v1133_v57, %v578_v12  ;;  %v800_v14 = vpop.f32.mrb[8].mxu0 }
 0x106   :  { %v801_v15 = vpop.f32.mrb[9].mxu0 }
 0x107   :  { %706 = vst [vmem:[%s1202_s3 + $0x18] sm:$0xff] %v690_v13  ;;  %v802_v16 = vadd.f32 %v801_v15, %v800_v14  ;;  %v803_v17 = vpop.f32.mrb[10].mxu0  ;;  %v878_v18 = vpop.f32.mrb[8].mxu1 }
 0x108   :  { %v804_v19 = vpop.f32.mrb[11].mxu0  ;;  %v598_v20 = vpop.f32.mrb[9].mxu1 }
 0x109   :  { %v805_v21 = vadd.f32 %v804_v19, %v803_v17  ;;  %v583_v22 = vadd.f32 %v802_v16, %v582_v6  ;;  %v879_v23 = vpop.f32.mrb[10].mxu1 }
 0x10a   :  { %v601_v24 = vpop.f32.mrb[11].mxu1 }
 0x10b   :  { %v691_v26 = vadd.f32 %v1133_v57, %v583_v22  ;;  %v586_v27 = vadd.f32 %v805_v21, %v585_v10 }
 0x10d   :  { %707 = vst [vmem:[%s1202_s3 + $0x20] sm:$0xff] %v691_v26  ;;  %v692_v28 = vadd.f32 %v1133_v57, %v586_v27  ;;  %v806_v29 = vpop.f32.mrb[12].mxu0 }
 0x10e   :  { %v807_v30 = vpop.f32.mrb[13].mxu0 }
 0x10f   :  { %708 = vst [vmem:[%s1202_s3 + $0x28] sm:$0xff] %v692_v28  ;;  %v808_v31 = vadd.f32 %v807_v30, %v806_v29  ;;  %v809_v32 = vpop.f32.mrb[14].mxu0  ;;  %v882_v33 = vpop.f32.mrb[12].mxu1 }
 0x110   :  { %v810_v34 = vpop.f32.mrb[15].mxu0  ;;  %v614_v35 = vpop.f32.mrb[13].mxu1 }
 0x111   :  { %v591_v36 = vadd.f32 %v874_v4, %v808_v31  ;;  %v811_v37 = vadd.f32 %v810_v34, %v809_v32  ;;  %v883_v38 = vpop.f32.mrb[14].mxu1 }
 0x112   :  { %v617_v39 = vpop.f32.mrb[15].mxu1 }
 0x113   :  { %v693_v40 = vadd.f32 %v1133_v57, %v591_v36  ;;  %v594_v41 = vadd.f32 %v875_v9, %v811_v37 }
 0x115   :  { %709 = vst [vmem:[%s1202_s3 + $0x30] sm:$0xff] %v693_v40  ;;  %v694_v42 = vadd.f32 %v1133_v57, %v594_v41  ;;  %v812_v43 = vpop.f32.mrb[16].mxu0 }
 0x116   :  { %v813_v44 = vpop.f32.mrb[17].mxu0 }
 0x117   :  { %710 = vst [vmem:[%s1202_s3 + $0x38] sm:$0xff] %v694_v42  ;;  %v814_v45 = vadd.f32 %v813_v44, %v812_v43  ;;  %v815_v46 = vpop.f32.mrb[18].mxu0 }
 0x118   :  { %v816_v47 = vpop.f32.mrb[19].mxu0 }
 0x119   :  { %v817_v48 = vadd.f32 %v816_v47, %v815_v46  ;;  %v599_v49 = vadd.f32 %v814_v45, %v598_v20 }
 0x11b   :  { %v695_v50 = vadd.f32 %v1133_v57, %v599_v49  ;;  %v602_v51 = vadd.f32 %v817_v48, %v601_v24 }
 0x11d   :  { %711 = vst [vmem:[%s1202_s3 + $0x40] sm:$0xff] %v695_v50  ;;  %v696_v52 = vadd.f32 %v1133_v57, %v602_v51  ;;  %v818_v53 = vpop.f32.mrb[20].mxu0 }
 0x11e   :  { %v819_v54 = vpop.f32.mrb[21].mxu0 }
 0x11f   :  { %712 = vst [vmem:[%s1202_s3 + $0x48] sm:$0xff] %v696_v52  ;;  %v820_v55 = vadd.f32 %v819_v54, %v818_v53  ;;  %v821_v56 = vpop.f32.mrb[22].mxu0 }
 0x120   :  { %v822_v58 = vpop.f32.mrb[23].mxu0 }
 0x121   :  { %v607_v25 = vadd.f32 %v878_v18, %v820_v55  ;;  %v823_v59 = vadd.f32 %v822_v58, %v821_v56 }
 0x123   :  { %v697_v60 = vadd.f32 %v1133_v57, %v607_v25  ;;  %v610_v61 = vadd.f32 %v879_v23, %v823_v59 }
 0x125   :  { %713 = vst [vmem:[%s1202_s3 + $0x50] sm:$0xff] %v697_v60  ;;  %v698_v62 = vadd.f32 %v1133_v57, %v610_v61  ;;  %v824_v63 = vpop.f32.mrb[24].mxu0 }
 0x126   :  { %v825_v0 = vpop.f32.mrb[25].mxu0 }
 0x127   :  { %714 = vst [vmem:[%s1202_s3 + $0x58] sm:$0xff] %v698_v62  ;;  %v826_v1 = vadd.f32 %v825_v0, %v824_v63  ;;  %v827_v2 = vpop.f32.mrb[26].mxu0 }
 0x128   :  { %v828_v3 = vpop.f32.mrb[27].mxu0 }
 0x129   :  { %v829_v4 = vadd.f32 %v828_v3, %v827_v2  ;;  %v615_v5 = vadd.f32 %v826_v1, %v614_v35 }
 0x12b   :  { %v699_v6 = vadd.f32 %v1133_v57, %v615_v5  ;;  %v618_v7 = vadd.f32 %v829_v4, %v617_v39 }
 0x12d   :  { %715 = vst [vmem:[%s1202_s3 + $0x60] sm:$0xff] %v699_v6  ;;  %v700_v8 = vadd.f32 %v1133_v57, %v618_v7  ;;  %v830_v9 = vpop.f32.mrb[28].mxu0 }
 0x12e   :  { %v831_v10 = vpop.f32.mrb[29].mxu0 }
 0x12f   :  { %716 = vst [vmem:[%s1202_s3 + $0x68] sm:$0xff] %v700_v8  ;;  %v832_v11 = vadd.f32 %v831_v10, %v830_v9  ;;  %v833_v12 = vpop.f32.mrb[30].mxu0 }
 0x130   :  { %v834_v13 = vpop.f32.mrb[31].mxu0 }
 0x131   :  { %v623_v14 = vadd.f32 %v882_v33, %v832_v11  ;;  %v835_v15 = vadd.f32 %v834_v13, %v833_v12 }
 0x133   :  { %v701_v16 = vadd.f32 %v1133_v57, %v623_v14  ;;  %v626_v17 = vadd.f32 %v883_v38, %v835_v15 }
 0x135   :  { %717 = vst [vmem:[%s1202_s3 + $0x70] sm:$0xff] %v701_v16  ;;  %v702_v18 = vadd.f32 %v1133_v57, %v626_v17 }
 0x137   :  { %718 = vst [vmem:[%s1202_s3 + $0x78] sm:$0xff] %v702_v18 }

// kernel: _lambda_.45
= control target key start
LH: loop header
LB: loop body
LE: loop exit
PB: predicated region body
PF: predicated region fallthrough
CT: control target
= control target key end

     0   :  { %v289_v0 = vmov 0.0   ;;  %vm280_vm0 = vcmask 1040384   ;;  %s501_s0 = inlined_call_operand.vmem [shape: f32[512,128], index: 0, kind: input, shape index: {}]   ;;  %s502_s1 = inlined_call_operand.vmem [shape: f32[2,128], index: 1, kind: output, shape index: {}]  }
   0x1   :  { %12 = vst [vmem:[%s502_s1] sm:$0x3] %v289_v0  ;;  %v13_v1 = vld [vmem:[%s501_s0] sm:$0xff]  ;;  %v14_v2 = vld [vmem:[%s501_s0 + $0x8] sm:$0xff]  ;;  %v15_v3 = vld [vmem:[%s501_s0 + $0x10] sm:$0xff] }
   0x2   :  { %v16_v4 = vld [vmem:[%s501_s0 + $0x18] sm:$0xff]  ;;  %v78_v5 = vadd.f32 %v14_v2, %v13_v1  ;;  %v147_v6 = vmul.f32 %v13_v1, %v13_v1  ;;  %v148_v7 = vmul.f32 %v14_v2, %v14_v2  ;;  %v149_v8 = vmul.f32 %v15_v3, %v15_v3  ;;  %v17_v9 = vld [vmem:[%s501_s0 + $0x20] sm:$0xff]  ;;  %v18_v13 = vld [vmem:[%s501_s0 + $0x28] sm:$0xff] }
   0x3   :  { %v150_v11 = vmul.f32 %v16_v4, %v16_v4  ;;  %v151_v15 = vmul.f32 %v17_v9, %v17_v9  ;;  %v19_v17 = vld [vmem:[%s501_s0 + $0x30] sm:$0xff]  ;;  %v152_v19 = vmul.f32 %v18_v13, %v18_v13  ;;  %v20_v21 = vld [vmem:[%s501_s0 + $0x38] sm:$0xff]  ;;  %v21_v25 = vld [vmem:[%s501_s0 + $0x40] sm:$0xff] }
   0x4   :  { %v79_v10 = vadd.f32 %v78_v5, %v15_v3  ;;  %v211_v12 = vadd.f32 %v148_v7, %v147_v6  ;;  %v153_v23 = vmul.f32 %v19_v17, %v19_v17  ;;  %v154_v27 = vmul.f32 %v20_v21, %v20_v21  ;;  %v22_v29 = vld [vmem:[%s501_s0 + $0x48] sm:$0xff]  ;;  %v23_v33 = vld [vmem:[%s501_s0 + $0x50] sm:$0xff]  ;;  %v24_v37 = vld [vmem:[%s501_s0 + $0x58] sm:$0xff] }
   0x5   :  { %v155_v31 = vmul.f32 %v21_v25, %v21_v25  ;;  %v156_v35 = vmul.f32 %v22_v29, %v22_v29  ;;  %v157_v39 = vmul.f32 %v23_v33, %v23_v33  ;;  %v25_v41 = vld [vmem:[%s501_s0 + $0x60] sm:$0xff]  ;;  %v158_v43 = vmul.f32 %v24_v37, %v24_v37  ;;  %v26_v45 = vld [vmem:[%s501_s0 + $0x68] sm:$0xff]  ;;  %v27_v49 = vld [vmem:[%s501_s0 + $0x70] sm:$0xff] }
   0x6   :  { %v80_v14 = vadd.f32 %v79_v10, %v16_v4  ;;  %v212_v16 = vadd.f32 %v211_v12, %v149_v8  ;;  %v159_v47 = vmul.f32 %v25_v41, %v25_v41  ;;  %v160_v51 = vmul.f32 %v26_v45, %v26_v45  ;;  %v28_v53 = vld [vmem:[%s501_s0 + $0x78] sm:$0xff]  ;;  %v29_v57 = vld [vmem:[%s501_s0 + $0x80] sm:$0xff]  ;;  %v30_v61 = vld [vmem:[%s501_s0 + $0x88] sm:$0xff] }
   0x7   :  { %v161_v55 = vmul.f32 %v27_v49, %v27_v49  ;;  %v162_v59 = vmul.f32 %v28_v53, %v28_v53  ;;  %v163_v63 = vmul.f32 %v29_v57, %v29_v57  ;;  %v31_v1 = vld [vmem:[%s501_s0 + $0x90] sm:$0xff]  ;;  %v164_v3 = vmul.f32 %v30_v61, %v30_v61  ;;  %v32_v5 = vld [vmem:[%s501_s0 + $0x98] sm:$0xff] }
   0x8   :  { %v81_v18 = vadd.f32 %v80_v14, %v17_v9  ;;  %v213_v20 = vadd.f32 %v212_v16, %v150_v11  ;;  %v165_v7 = vmul.f32 %v31_v1, %v31_v1  ;;  %v33_v9 = vld [vmem:[%s501_s0 + $0xa0] sm:$0xff]  ;;  %v166_v11 = vmul.f32 %v32_v5, %v32_v5 }
   0xa   :  { %v82_v22 = vadd.f32 %v81_v18, %v18_v13  ;;  %v214_v24 = vadd.f32 %v213_v20, %v151_v15  ;;  %v34_v13 = vld [vmem:[%s501_s0 + $0xa8] sm:$0xff]  ;;  %v167_v15 = vmul.f32 %v33_v9, %v33_v9 }
   0xc   :  { %v83_v26 = vadd.f32 %v82_v22, %v19_v17  ;;  %v215_v28 = vadd.f32 %v214_v24, %v152_v19  ;;  %v35_v17 = vld [vmem:[%s501_s0 + $0xb0] sm:$0xff]  ;;  %v168_v19 = vmul.f32 %v34_v13, %v34_v13 }
   0xe   :  { %v84_v30 = vadd.f32 %v83_v26, %v20_v21  ;;  %v216_v32 = vadd.f32 %v215_v28, %v153_v23  ;;  %v36_v21 = vld [vmem:[%s501_s0 + $0xb8] sm:$0xff]  ;;  %v169_v23 = vmul.f32 %v35_v17, %v35_v17 }
  0x10   :  { %v85_v34 = vadd.f32 %v84_v30, %v21_v25  ;;  %v217_v36 = vadd.f32 %v216_v32, %v154_v27  ;;  %v37_v25 = vld [vmem:[%s501_s0 + $0xc0] sm:$0xff]  ;;  %v170_v27 = vmul.f32 %v36_v21, %v36_v21 }
  0x12   :  { %v86_v38 = vadd.f32 %v85_v34, %v22_v29  ;;  %v218_v40 = vadd.f32 %v217_v36, %v155_v31  ;;  %v38_v29 = vld [vmem:[%s501_s0 + $0xc8] sm:$0xff]  ;;  %v171_v31 = vmul.f32 %v37_v25, %v37_v25 }
  0x14   :  { %v87_v42 = vadd.f32 %v86_v38, %v23_v33  ;;  %v219_v44 = vadd.f32 %v218_v40, %v156_v35  ;;  %v39_v33 = vld [vmem:[%s501_s0 + $0xd0] sm:$0xff]  ;;  %v172_v35 = vmul.f32 %v38_v29, %v38_v29 }
  0x16   :  { %v88_v46 = vadd.f32 %v87_v42, %v24_v37  ;;  %v220_v48 = vadd.f32 %v219_v44, %v157_v39  ;;  %v40_v37 = vld [vmem:[%s501_s0 + $0xd8] sm:$0xff]  ;;  %v173_v39 = vmul.f32 %v39_v33, %v39_v33 }
  0x18   :  { %v89_v50 = vadd.f32 %v88_v46, %v25_v41  ;;  %v221_v52 = vadd.f32 %v220_v48, %v158_v43  ;;  %v41_v41 = vld [vmem:[%s501_s0 + $0xe0] sm:$0xff]  ;;  %v174_v43 = vmul.f32 %v40_v37, %v40_v37 }
  0x1a   :  { %v90_v54 = vadd.f32 %v89_v50, %v26_v45  ;;  %v222_v56 = vadd.f32 %v221_v52, %v159_v47  ;;  %v42_v45 = vld [vmem:[%s501_s0 + $0xe8] sm:$0xff]  ;;  %v175_v47 = vmul.f32 %v41_v41, %v41_v41 }
  0x1c   :  { %v91_v58 = vadd.f32 %v90_v54, %v27_v49  ;;  %v223_v60 = vadd.f32 %v222_v56, %v160_v51  ;;  %v43_v49 = vld [vmem:[%s501_s0 + $0xf0] sm:$0xff]  ;;  %v176_v51 = vmul.f32 %v42_v45, %v42_v45 }
  0x1e   :  { %v92_v62 = vadd.f32 %v91_v58, %v28_v53  ;;  %v224_v0 = vadd.f32 %v223_v60, %v161_v55  ;;  %v44_v53 = vld [vmem:[%s501_s0 + $0xf8] sm:$0xff]  ;;  %v177_v55 = vmul.f32 %v43_v49, %v43_v49 }
  0x20   :  { %v93_v2 = vadd.f32 %v92_v62, %v29_v57  ;;  %v225_v4 = vadd.f32 %v224_v0, %v162_v59  ;;  %v45_v57 = vld [vmem:[%s501_s0 + $0x100] sm:$0xff]  ;;  %v178_v59 = vmul.f32 %v44_v53, %v44_v53 }
  0x22   :  { %v94_v6 = vadd.f32 %v93_v2, %v30_v61  ;;  %v226_v8 = vadd.f32 %v225_v4, %v163_v63  ;;  %v46_v61 = vld [vmem:[%s501_s0 + $0x108] sm:$0xff]  ;;  %v179_v63 = vmul.f32 %v45_v57, %v45_v57 }
  0x24   :  { %v95_v10 = vadd.f32 %v94_v6, %v31_v1  ;;  %v227_v12 = vadd.f32 %v226_v8, %v164_v3  ;;  %v47_v1 = vld [vmem:[%s501_s0 + $0x110] sm:$0xff]  ;;  %v180_v3 = vmul.f32 %v46_v61, %v46_v61 }
  0x26   :  { %v96_v14 = vadd.f32 %v95_v10, %v32_v5  ;;  %v228_v16 = vadd.f32 %v227_v12, %v165_v7  ;;  %v48_v5 = vld [vmem:[%s501_s0 + $0x118] sm:$0xff]  ;;  %v181_v7 = vmul.f32 %v47_v1, %v47_v1 }
  0x28   :  { %v97_v18 = vadd.f32 %v96_v14, %v33_v9  ;;  %v229_v20 = vadd.f32 %v228_v16, %v166_v11  ;;  %v49_v9 = vld [vmem:[%s501_s0 + $0x120] sm:$0xff]  ;;  %v182_v11 = vmul.f32 %v48_v5, %v48_v5 }
  0x2a   :  { %v98_v22 = vadd.f32 %v97_v18, %v34_v13  ;;  %v230_v24 = vadd.f32 %v229_v20, %v167_v15  ;;  %v50_v13 = vld [vmem:[%s501_s0 + $0x128] sm:$0xff]  ;;  %v183_v15 = vmul.f32 %v49_v9, %v49_v9 }
  0x2c   :  { %v99_v26 = vadd.f32 %v98_v22, %v35_v17  ;;  %v231_v28 = vadd.f32 %v230_v24, %v168_v19  ;;  %v51_v17 = vld [vmem:[%s501_s0 + $0x130] sm:$0xff]  ;;  %v184_v19 = vmul.f32 %v50_v13, %v50_v13 }
  0x2e   :  { %v100_v30 = vadd.f32 %v99_v26, %v36_v21  ;;  %v232_v32 = vadd.f32 %v231_v28, %v169_v23  ;;  %v52_v21 = vld [vmem:[%s501_s0 + $0x138] sm:$0xff]  ;;  %v185_v23 = vmul.f32 %v51_v17, %v51_v17 }
  0x30   :  { %v101_v34 = vadd.f32 %v100_v30, %v37_v25  ;;  %v233_v36 = vadd.f32 %v232_v32, %v170_v27  ;;  %v53_v25 = vld [vmem:[%s501_s0 + $0x140] sm:$0xff]  ;;  %v186_v27 = vmul.f32 %v52_v21, %v52_v21 }
  0x32   :  { %v102_v38 = vadd.f32 %v101_v34, %v38_v29  ;;  %v234_v40 = vadd.f32 %v233_v36, %v171_v31  ;;  %v54_v29 = vld [vmem:[%s501_s0 + $0x148] sm:$0xff]  ;;  %v187_v31 = vmul.f32 %v53_v25, %v53_v25 }
  0x34   :  { %v103_v42 = vadd.f32 %v102_v38, %v39_v33  ;;  %v235_v44 = vadd.f32 %v234_v40, %v172_v35  ;;  %v55_v33 = vld [vmem:[%s501_s0 + $0x150] sm:$0xff]  ;;  %v188_v35 = vmul.f32 %v54_v29, %v54_v29 }
  0x36   :  { %v104_v46 = vadd.f32 %v103_v42, %v40_v37  ;;  %v236_v48 = vadd.f32 %v235_v44, %v173_v39  ;;  %v56_v37 = vld [vmem:[%s501_s0 + $0x158] sm:$0xff]  ;;  %v189_v39 = vmul.f32 %v55_v33, %v55_v33 }
  0x38   :  { %v105_v50 = vadd.f32 %v104_v46, %v41_v41  ;;  %v237_v52 = vadd.f32 %v236_v48, %v174_v43  ;;  %v57_v41 = vld [vmem:[%s501_s0 + $0x160] sm:$0xff]  ;;  %v190_v43 = vmul.f32 %v56_v37, %v56_v37 }
  0x3a   :  { %v106_v54 = vadd.f32 %v105_v50, %v42_v45  ;;  %v238_v56 = vadd.f32 %v237_v52, %v175_v47  ;;  %v58_v45 = vld [vmem:[%s501_s0 + $0x168] sm:$0xff]  ;;  %v191_v47 = vmul.f32 %v57_v41, %v57_v41 }
  0x3c   :  { %v107_v58 = vadd.f32 %v106_v54, %v43_v49  ;;  %v239_v60 = vadd.f32 %v238_v56, %v176_v51  ;;  %v59_v49 = vld [vmem:[%s501_s0 + $0x170] sm:$0xff]  ;;  %v192_v51 = vmul.f32 %v58_v45, %v58_v45 }
  0x3e   :  { %v108_v62 = vadd.f32 %v107_v58, %v44_v53  ;;  %v240_v0 = vadd.f32 %v239_v60, %v177_v55  ;;  %v60_v53 = vld [vmem:[%s501_s0 + $0x178] sm:$0xff]  ;;  %v193_v55 = vmul.f32 %v59_v49, %v59_v49 }
  0x40   :  { %v109_v2 = vadd.f32 %v108_v62, %v45_v57  ;;  %v241_v4 = vadd.f32 %v240_v0, %v178_v59  ;;  %v61_v57 = vld [vmem:[%s501_s0 + $0x180] sm:$0xff]  ;;  %v194_v59 = vmul.f32 %v60_v53, %v60_v53 }
  0x42   :  { %v110_v6 = vadd.f32 %v109_v2, %v46_v61  ;;  %v242_v8 = vadd.f32 %v241_v4, %v179_v63  ;;  %v62_v61 = vld [vmem:[%s501_s0 + $0x188] sm:$0xff]  ;;  %v195_v63 = vmul.f32 %v61_v57, %v61_v57 }
  0x44   :  { %v111_v10 = vadd.f32 %v110_v6, %v47_v1  ;;  %v243_v12 = vadd.f32 %v242_v8, %v180_v3  ;;  %v63_v1 = vld [vmem:[%s501_s0 + $0x190] sm:$0xff]  ;;  %v196_v3 = vmul.f32 %v62_v61, %v62_v61 }
  0x46   :  { %v112_v14 = vadd.f32 %v111_v10, %v48_v5  ;;  %v244_v16 = vadd.f32 %v243_v12, %v181_v7  ;;  %v64_v5 = vld [vmem:[%s501_s0 + $0x198] sm:$0xff]  ;;  %v197_v7 = vmul.f32 %v63_v1, %v63_v1 }
  0x48   :  { %v113_v18 = vadd.f32 %v112_v14, %v49_v9  ;;  %v245_v20 = vadd.f32 %v244_v16, %v182_v11  ;;  %v65_v9 = vld [vmem:[%s501_s0 + $0x1a0] sm:$0xff]  ;;  %v198_v11 = vmul.f32 %v64_v5, %v64_v5 }
  0x4a   :  { %v114_v22 = vadd.f32 %v113_v18, %v50_v13  ;;  %v246_v24 = vadd.f32 %v245_v20, %v183_v15  ;;  %v66_v13 = vld [vmem:[%s501_s0 + $0x1a8] sm:$0xff]  ;;  %v199_v15 = vmul.f32 %v65_v9, %v65_v9 }
  0x4c   :  { %v115_v26 = vadd.f32 %v114_v22, %v51_v17  ;;  %v247_v28 = vadd.f32 %v246_v24, %v184_v19  ;;  %v67_v17 = vld [vmem:[%s501_s0 + $0x1b0] sm:$0xff]  ;;  %v200_v19 = vmul.f32 %v66_v13, %v66_v13 }
  0x4e   :  { %v116_v30 = vadd.f32 %v115_v26, %v52_v21  ;;  %v248_v32 = vadd.f32 %v247_v28, %v185_v23  ;;  %v68_v21 = vld [vmem:[%s501_s0 + $0x1b8] sm:$0xff]  ;;  %v201_v23 = vmul.f32 %v67_v17, %v67_v17 }
  0x50   :  { %v117_v34 = vadd.f32 %v116_v30, %v53_v25  ;;  %v249_v36 = vadd.f32 %v248_v32, %v186_v27  ;;  %v69_v25 = vld [vmem:[%s501_s0 + $0x1c0] sm:$0xff]  ;;  %v202_v27 = vmul.f32 %v68_v21, %v68_v21 }
  0x52   :  { %v118_v38 = vadd.f32 %v117_v34, %v54_v29  ;;  %v250_v40 = vadd.f32 %v249_v36, %v187_v31  ;;  %v70_v29 = vld [vmem:[%s501_s0 + $0x1c8] sm:$0xff]  ;;  %v203_v31 = vmul.f32 %v69_v25, %v69_v25 }
  0x54   :  { %v119_v42 = vadd.f32 %v118_v38, %v55_v33  ;;  %v251_v44 = vadd.f32 %v250_v40, %v188_v35  ;;  %v71_v33 = vld [vmem:[%s501_s0 + $0x1d0] sm:$0xff]  ;;  %v204_v35 = vmul.f32 %v70_v29, %v70_v29 }
  0x56   :  { %v120_v46 = vadd.f32 %v119_v42, %v56_v37  ;;  %v252_v48 = vadd.f32 %v251_v44, %v189_v39  ;;  %v72_v37 = vld [vmem:[%s501_s0 + $0x1d8] sm:$0xff]  ;;  %v205_v39 = vmul.f32 %v71_v33, %v71_v33 }
  0x58   :  { %v121_v50 = vadd.f32 %v120_v46, %v57_v41  ;;  %v253_v52 = vadd.f32 %v252_v48, %v190_v43  ;;  %v73_v41 = vld [vmem:[%s501_s0 + $0x1e0] sm:$0xff]  ;;  %v206_v43 = vmul.f32 %v72_v37, %v72_v37 }
  0x5a   :  { %v122_v54 = vadd.f32 %v121_v50, %v58_v45  ;;  %v254_v56 = vadd.f32 %v253_v52, %v191_v47  ;;  %v74_v45 = vld [vmem:[%s501_s0 + $0x1e8] sm:$0xff]  ;;  %v207_v47 = vmul.f32 %v73_v41, %v73_v41 }
  0x5c   :  { %v123_v58 = vadd.f32 %v122_v54, %v59_v49  ;;  %v255_v60 = vadd.f32 %v254_v56, %v192_v51  ;;  %v75_v49 = vld [vmem:[%s501_s0 + $0x1f0] sm:$0xff]  ;;  %v208_v51 = vmul.f32 %v74_v45, %v74_v45 }
  0x5e   :  { %v124_v62 = vadd.f32 %v123_v58, %v60_v53  ;;  %v256_v0 = vadd.f32 %v255_v60, %v193_v55  ;;  %v76_v53 = vld [vmem:[%s501_s0 + $0x1f8] sm:$0xff]  ;;  %v209_v55 = vmul.f32 %v75_v49, %v75_v49 }
  0x5f   :  { %v210_v58 = vmul.f32 %v76_v53, %v76_v53 }
  0x60   :  { %v125_v2 = vadd.f32 %v124_v62, %v61_v57  ;;  %v257_v4 = vadd.f32 %v256_v0, %v194_v59 }
  0x62   :  { %v126_v6 = vadd.f32 %v125_v2, %v62_v61  ;;  %v258_v8 = vadd.f32 %v257_v4, %v195_v63 }
  0x64   :  { %v127_v10 = vadd.f32 %v126_v6, %v63_v1  ;;  %v259_v12 = vadd.f32 %v258_v8, %v196_v3 }
  0x66   :  { %v128_v14 = vadd.f32 %v127_v10, %v64_v5  ;;  %v260_v16 = vadd.f32 %v259_v12, %v197_v7  ;;  %v77_v10 = vld [vmem:[%s502_s1] sm:$0x3] }
  0x68   :  { %v129_v18 = vadd.f32 %v128_v14, %v65_v9  ;;  %v261_v20 = vadd.f32 %v260_v16, %v198_v11 }
  0x6a   :  { %v130_v22 = vadd.f32 %v129_v18, %v66_v13  ;;  %v262_v24 = vadd.f32 %v261_v20, %v199_v15 }
  0x6c   :  { %v131_v26 = vadd.f32 %v130_v22, %v67_v17  ;;  %v263_v28 = vadd.f32 %v262_v24, %v200_v19 }
  0x6e   :  { %v132_v30 = vadd.f32 %v131_v26, %v68_v21  ;;  %v264_v32 = vadd.f32 %v263_v28, %v201_v23 }
  0x70   :  { %v133_v34 = vadd.f32 %v132_v30, %v69_v25  ;;  %v265_v36 = vadd.f32 %v264_v32, %v202_v27 }
  0x72   :  { %v134_v38 = vadd.f32 %v133_v34, %v70_v29  ;;  %v266_v40 = vadd.f32 %v265_v36, %v203_v31 }
  0x74   :  { %v135_v42 = vadd.f32 %v134_v38, %v71_v33  ;;  %v267_v44 = vadd.f32 %v266_v40, %v204_v35 }
  0x76   :  { %v136_v46 = vadd.f32 %v135_v42, %v72_v37  ;;  %v268_v48 = vadd.f32 %v267_v44, %v205_v39 }
  0x78   :  { %v137_v50 = vadd.f32 %v136_v46, %v73_v41  ;;  %v269_v52 = vadd.f32 %v268_v48, %v206_v43 }
  0x7a   :  { %v138_v54 = vadd.f32 %v137_v50, %v74_v45  ;;  %v270_v56 = vadd.f32 %v269_v52, %v207_v47 }
  0x7c   :  { %v139_v57 = vadd.f32 %v138_v54, %v75_v49  ;;  %v271_v59 = vadd.f32 %v270_v56, %v208_v51 }
  0x7e   :  { %v140_v60 = vadd.f32 %v139_v57, %v76_v53  ;;  %v272_v61 = vadd.f32 %v271_v59, %v209_v55 }
  0x80   :  { %v141_v62 = vrot.slane %v140_v60, 4  ;;  %v273_v63 = vadd.f32 %v272_v61, %v210_v58 }
  0x82   :  { %v142_v0 = vadd.f32 %v141_v62, %v140_v60  ;;  %v274_v1 = vrot.slane %v273_v63, 4 }
  0x84   :  { %v143_v2 = vrot.slane %v142_v0, 2  ;;  %v275_v3 = vadd.f32 %v274_v1, %v273_v63 }
  0x86   :  { %v144_v4 = vadd.f32 %v143_v2, %v142_v0  ;;  %v276_v5 = vrot.slane %v275_v3, 2 }
  0x88   :  { %v145_v6 = vrot.slane %v144_v4, 1  ;;  %v277_v7 = vadd.f32 %v276_v5, %v275_v3 }
  0x8a   :  { %v146_v8 = vadd.f32 %v145_v6, %v144_v4  ;;  %v278_v9 = vrot.slane %v277_v7, 1 }
  0x8c   :  { %v279_v11 = vadd.f32 %v278_v9, %v277_v7 }
  0x8e   :  { %v281_v12 = vsel %vm280_vm0, %v146_v8, %v279_v11 }
  0x8f   :  { %v282_v13 = vadd.f32 %v281_v12, %v77_v10 }
  0x91   :  { %283 = vst [vmem:[%s502_s1] sm:$0x3] %v282_v13 }

// kernel: _lambda_.46
= control target key start
LH: loop header
LB: loop body
LE: loop exit
PB: predicated region body
PF: predicated region fallthrough
CT: control target
= control target key end

     0   :  { %v90_v0 = vlaneseq  ;;  %s1383_s1 = inlined_call_operand.vmem [shape: f32[2,128], index: 1, kind: input, shape index: {}]   ;;  %s1384_s0 = inlined_call_operand.vmem [shape: f32[512,128], index: 0, kind: input, shape index: {}]   ;;  %s1385_s2 = inlined_call_operand.vmem [shape: f32[1,128], index: 2, kind: input, shape index: {}]   ;;  %s1386_s3 = inlined_call_operand.vmem [shape: f32[1,128], index: 3, kind: input, shape index: {}]   ;;  %s1387_s4 = inlined_call_operand.vmem [shape: f32[512,128], index: 4, kind: output, shape index: {}]  }
   0x1   :  { %v81_v1 = vld [vmem:[%s1383_s1] sm:$0x3]  ;;  %v416_v7 = vld [vmem:[%s1384_s0 + $0x8] sm:$0xff]  ;;  %v421_v8 = vld [vmem:[%s1384_s0 + $0x10] sm:$0xff] }
   0x2   :  { %v82_v2 = vmul.f32 0.001953125, %v81_v1  ;;  %v405_v3 = vshrl.u32 %v90_v0, 7  ;;  %v411_v6 = vld [vmem:[%s1384_s0] sm:$0xff]  ;;  %v428_v11 = vld [vmem:[%s1384_s0 + $0x18] sm:$0xff]  ;;  %v438_v13 = vld [vmem:[%s1384_s0 + $0x28] sm:$0xff] }
   0x3   :  { %v433_v12 = vld [vmem:[%s1384_s0 + $0x20] sm:$0xff]  ;;  %v443_v14 = vld [vmem:[%s1384_s0 + $0x30] sm:$0xff]  ;;  %v448_v15 = vld [vmem:[%s1384_s0 + $0x38] sm:$0xff] }
   0x4   :  { %v83_v4 = vmul.f32 %v82_v2, %v82_v2  ;;  %v92_v5 = vsub.s32 0, %v405_v3  ;;  %v453_v16 = vld [vmem:[%s1384_s0 + $0x40] sm:$0xff]  ;;  %v458_v17 = vld [vmem:[%s1384_s0 + $0x48] sm:$0xff]  ;;  %v463_v19 = vld [vmem:[%s1384_s0 + $0x50] sm:$0xff] }
   0x5   :  { %v468_v20 = vld [vmem:[%s1384_s0 + $0x58] sm:$0xff]  ;;  %v473_v21 = vld [vmem:[%s1384_s0 + $0x60] sm:$0xff]  ;;  %v478_v22 = vld [vmem:[%s1384_s0 + $0x68] sm:$0xff] }
   0x6   :  { %v85_v9 = vrot.slane %v83_v4, 7  ;;  %v423_v10 = vrot.slane %v82_v2, %v92_v5  ;;  %v484_v24 = vld [vmem:[%s1384_s0 + $0x70] sm:$0xff]  ;;  %v489_v25 = vld [vmem:[%s1384_s0 + $0x78] sm:$0xff]  ;;  %v494_v26 = vld [vmem:[%s1384_s0 + $0x80] sm:$0xff] }
   0x7   :  { %v499_v27 = vld [vmem:[%s1384_s0 + $0x88] sm:$0xff]  ;;  %v510_v32 = vld [vmem:[%s1384_s0 + $0x90] sm:$0xff]  ;;  %v515_v33 = vld [vmem:[%s1384_s0 + $0x98] sm:$0xff] }
   0x8   :  { %v87_v18 = vsub.f32 %v82_v2, %v85_v9  ;;  %v520_v34 = vld [vmem:[%s1384_s0 + $0xa0] sm:$0xff]  ;;  %v525_v35 = vld [vmem:[%s1384_s0 + $0xa8] sm:$0xff]  ;;  %v538_v40 = vld [vmem:[%s1384_s0 + $0xb0] sm:$0xff] }
   0x9   :  { %v543_v41 = vld [vmem:[%s1384_s0 + $0xb8] sm:$0xff]  ;;  %v548_v42 = vld [vmem:[%s1384_s0 + $0xc0] sm:$0xff]  ;;  %v553_v43 = vld [vmem:[%s1384_s0 + $0xc8] sm:$0xff] }
   0xa   :  { %v88_v28 = vadd.f32 1e-05, %v87_v18  ;;  %v564_v47 = vld [vmem:[%s1384_s0 + $0xd0] sm:$0xff]  ;;  %v569_v48 = vld [vmem:[%s1384_s0 + $0xd8] sm:$0xff]  ;;  %v574_v49 = vld [vmem:[%s1384_s0 + $0xe0] sm:$0xff] }
   0xb   :  { %v579_v50 = vld [vmem:[%s1384_s0 + $0xe8] sm:$0xff]  ;;  %v592_v55 = vld [vmem:[%s1384_s0 + $0xf0] sm:$0xff]  ;;  %v597_v56 = vld [vmem:[%s1384_s0 + $0xf8] sm:$0xff] }
   0xc   :  { %375 = vrsqrt.f32 %v88_v28  ;;  %v602_v57 = vld [vmem:[%s1384_s0 + $0x100] sm:$0xff]  ;;  %v607_v58 = vld [vmem:[%s1384_s0 + $0x108] sm:$0xff]  ;;  %v620_v63 = vld [vmem:[%s1384_s0 + $0x110] sm:$0xff] }
   0xd   :  { %v625_v0 = vld [vmem:[%s1384_s0 + $0x118] sm:$0xff]  ;;  %v630_v1 = vld [vmem:[%s1384_s0 + $0x120] sm:$0xff]  ;;  %v643_v18 = vld [vmem:[%s1384_s0 + $0x128] sm:$0xff] }
   0xe   :  { %v648_v28 = vld [vmem:[%s1384_s0 + $0x130] sm:$0xff]  ;;  %v653_v4 = vld [vmem:[%s1384_s0 + $0x138] sm:$0xff]  ;;  %v666_v61 = vld [vmem:[%s1384_s0 + $0x140] sm:$0xff] }
   0xf   :  { %v671_v60 = vld [vmem:[%s1384_s0 + $0x148] sm:$0xff]  ;;  %v676_v9 = vld [vmem:[%s1384_s0 + $0x150] sm:$0xff]  ;;  %v689_v54 = vld [vmem:[%s1384_s0 + $0x158] sm:$0xff] }
  0x10   :  { %1401 = vst [vmem:[#allocation2_spill] sm:$0xff] %v676_v9  ;;  %1402 = vst [vmem:[#allocation3_spill] sm:$0xff] %v689_v54  ;;  %v694_v53 = vld [vmem:[%s1384_s0 + $0x160] sm:$0xff]  ;;  %v699_v62 = vld [vmem:[%s1384_s0 + $0x168] sm:$0xff] }
  0x11   :  { %1403 = vst [vmem:[#allocation4_spill] sm:$0xff] %v694_v53  ;;  %1404 = vst [vmem:[#allocation5_spill] sm:$0xff] %v699_v62  ;;  %v373_v5 = vld [vmem:[%s1385_s2] ss:$0 sm:$0xff]  ;;  %v715_v46 = vld [vmem:[%s1384_s0 + $0x170] sm:$0xff]  ;;  %v1417_v62 = vsub.f32 %v421_v8, %v423_v10  ;;  %v1421_v8 = vsub.f32 %v443_v14, %v423_v10 }
  0x12   :  { %1405 = vst [vmem:[#allocation6_spill] sm:$0xff] %v715_v46  ;;  %v720_v45 = vld [vmem:[%s1384_s0 + $0x178] sm:$0xff]  ;;  %v725_v2 = vld [vmem:[%s1384_s0 + $0x180] sm:$0xff]  ;;  %v738_v39 = vld [vmem:[%s1384_s0 + $0x188] sm:$0xff] }
  0x13   :  { %1406 = vst [vmem:[#allocation7_spill] sm:$0xff] %v720_v45  ;;  %1407 = vst [vmem:[#allocation8_spill] sm:$0xff] %v725_v2  ;;  %v743_v38 = vld [vmem:[%s1384_s0 + $0x190] sm:$0xff]  ;;  %v748_v51 = vld [vmem:[%s1384_s0 + $0x198] sm:$0xff] }
  0x14   :  { %1408 = vst [vmem:[#allocation9_spill] sm:$0xff] %v738_v39  ;;  %1409 = vst [vmem:[#allocation10_spill] sm:$0xff] %v743_v38  ;;  %v761_v36 = vld [vmem:[%s1384_s0 + $0x1a0] sm:$0xff]  ;;  %v766_v31 = vld [vmem:[%s1384_s0 + $0x1a8] sm:$0xff]  ;;  %v1416_v38 = vsub.f32 %v416_v7, %v423_v10  ;;  %v1420_v7 = vsub.f32 %v438_v13, %v423_v10 }
  0x15   :  { %1410 = vst [vmem:[#allocation11_spill] sm:$0xff] %v748_v51  ;;  %1411 = vst [vmem:[#allocation12_spill] sm:$0xff] %v761_v36  ;;  %v771_v44 = vld [vmem:[%s1384_s0 + $0x1b0] sm:$0xff]  ;;  %v784_v29 = vld [vmem:[%s1384_s0 + $0x1b8] sm:$0xff]  ;;  %v1414_v36 = vsub.s32 1, %v405_v3 }
  0x16   :  { %v789_v23 = vld [vmem:[%s1384_s0 + $0x1c0] sm:$0xff]  ;;  %v794_v37 = vld [vmem:[%s1384_s0 + $0x1c8] sm:$0xff]  ;;  %v376_v52 = vpop.eup %375  ;;  %v807_v54 = vld [vmem:[%s1384_s0 + $0x1d0] sm:$0xff] }
  0x17   :  { %v812_v9 = vld [vmem:[%s1384_s0 + $0x1d8] sm:$0xff]  ;;  %v817_v30 = vld [vmem:[%s1384_s0 + $0x1e0] sm:$0xff]  ;;  %v165_v59 = vmul.f32 %v376_v52, %v373_v5  ;;  %v828_v2 = vld [vmem:[%s1384_s0 + $0x1e8] sm:$0xff]  ;;  %v1415_v5 = vsub.f32 %v411_v6, %v423_v10  ;;  %v1419_v6 = vsub.f32 %v433_v12, %v423_v10 }
  0x18   :  { %v833_v45 = vld [vmem:[%s1384_s0 + $0x1f0] sm:$0xff]  ;;  %v838_v52 = vld [vmem:[%s1384_s0 + $0x1f8] sm:$0xff]  ;;  %v861_v53 = vld [vmem:[%s1386_s3] ss:$0 sm:$0xff] }
  0x19   :  { %1412 = vst [vmem:[#allocation13_spill] sm:$0xff] %v833_v45  ;;  %1413 = vst [vmem:[#allocation14_spill] sm:$0xff] %v838_v52  ;;  %v850_v51 = vrot.slane %v165_v59, %v1414_v36  ;;  %v1418_v36 = vsub.f32 %v428_v11, %v423_v10  ;;  %v1422_v11 = vsub.f32 %v448_v15, %v423_v10 }
  0x1a   :  { %v1423_v15 = vsub.f32 %v453_v16, %v423_v10  ;;  %v1427_v16 = vsub.f32 %v473_v21, %v423_v10 }
  0x1b   :  { %v170_v46 = vmul.f32 %v850_v51, %v1415_v5  ;;  %v171_v39 = vmul.f32 %v850_v51, %v1416_v38  ;;  %v172_v3 = vmul.f32 %v850_v51, %v1417_v62  ;;  %v173_v59 = vmul.f32 %v850_v51, %v1418_v36 }
  0x1c   :  { %v174_v5 = vmul.f32 %v850_v51, %v1419_v6  ;;  %v175_v38 = vmul.f32 %v850_v51, %v1420_v7  ;;  %v176_v62 = vmul.f32 %v850_v51, %v1421_v8  ;;  %v177_v36 = vmul.f32 %v850_v51, %v1422_v11 }
  0x1d   :  { %v241_v52 = vadd.f32 %v861_v53, %v170_v46  ;;  %v242_v12 = vadd.f32 %v861_v53, %v171_v39  ;;  %v243_v6 = vadd.f32 %v861_v53, %v172_v3  ;;  %v244_v13 = vadd.f32 %v861_v53, %v173_v59 }
  0x1e   :  { %v245_v7 = vadd.f32 %v861_v53, %v174_v5  ;;  %v246_v45 = vadd.f32 %v861_v53, %v175_v38  ;;  %v247_v14 = vadd.f32 %v861_v53, %v176_v62  ;;  %v248_v8 = vadd.f32 %v861_v53, %v177_v36 }
  0x1f   :  { %305 = vst [vmem:[%s1387_s4] sm:$0xff] %v241_v52  ;;  %306 = vst [vmem:[%s1387_s4 + $0x8] sm:$0xff] %v242_v12  ;;  %v178_v39 = vmul.f32 %v850_v51, %v1423_v15  ;;  %v1424_v46 = vsub.f32 %v458_v17, %v423_v10  ;;  %v1425_v3 = vsub.f32 %v463_v19, %v423_v10 }
  0x20   :  { %307 = vst [vmem:[%s1387_s4 + $0x10] sm:$0xff] %v243_v6  ;;  %308 = vst [vmem:[%s1387_s4 + $0x18] sm:$0xff] %v244_v13  ;;  %v1426_v5 = vsub.f32 %v468_v20, %v423_v10  ;;  %v182_v17 = vmul.f32 %v850_v51, %v1427_v16  ;;  %v1428_v19 = vsub.f32 %v478_v22, %v423_v10 }
  0x21   :  { %v179_v52 = vmul.f32 %v850_v51, %v1424_v46  ;;  %v180_v59 = vmul.f32 %v850_v51, %v1425_v3  ;;  %309 = vst [vmem:[%s1387_s4 + $0x20] sm:$0xff] %v245_v7  ;;  %310 = vst [vmem:[%s1387_s4 + $0x28] sm:$0xff] %v246_v45  ;;  %v1429_v45 = vsub.f32 %v484_v24, %v423_v10 }
  0x22   :  { %v181_v38 = vmul.f32 %v850_v51, %v1426_v5  ;;  %311 = vst [vmem:[%s1387_s4 + $0x30] sm:$0xff] %v247_v14  ;;  %312 = vst [vmem:[%s1387_s4 + $0x38] sm:$0xff] %v248_v8  ;;  %v183_v20 = vmul.f32 %v850_v51, %v1428_v19  ;;  %v1430_v11 = vsub.f32 %v489_v25, %v423_v10 }
  0x23   :  { %v184_v62 = vmul.f32 %v850_v51, %v1429_v45  ;;  %v249_v12 = vadd.f32 %v861_v53, %v178_v39  ;;  %v250_v21 = vadd.f32 %v861_v53, %v179_v52  ;;  %v251_v6 = vadd.f32 %v861_v53, %v180_v59 }
  0x24   :  { %v185_v36 = vmul.f32 %v850_v51, %v1430_v11  ;;  %v252_v22 = vadd.f32 %v861_v53, %v181_v38  ;;  %v253_v13 = vadd.f32 %v861_v53, %v182_v17  ;;  %v254_v7 = vadd.f32 %v861_v53, %v183_v20 }
  0x25   :  { %v255_v24 = vadd.f32 %v861_v53, %v184_v62  ;;  %313 = vst [vmem:[%s1387_s4 + $0x40] sm:$0xff] %v249_v12  ;;  %314 = vst [vmem:[%s1387_s4 + $0x48] sm:$0xff] %v250_v21  ;;  %v1431_v25 = vsub.f32 %v494_v26, %v423_v10  ;;  %v1432_v15 = vsub.f32 %v499_v27, %v423_v10 }
  0x26   :  { %v256_v14 = vadd.f32 %v861_v53, %v185_v36  ;;  %315 = vst [vmem:[%s1387_s4 + $0x50] sm:$0xff] %v251_v6  ;;  %316 = vst [vmem:[%s1387_s4 + $0x58] sm:$0xff] %v252_v22  ;;  %v1433_v46 = vsub.f32 %v510_v32, %v423_v10  ;;  %v1434_v3 = vsub.f32 %v515_v33, %v423_v10 }
  0x27   :  { %v186_v8 = vmul.f32 %v850_v51, %v1431_v25  ;;  %v187_v39 = vmul.f32 %v850_v51, %v1432_v15  ;;  %317 = vst [vmem:[%s1387_s4 + $0x60] sm:$0xff] %v253_v13  ;;  %318 = vst [vmem:[%s1387_s4 + $0x68] sm:$0xff] %v254_v7  ;;  %v1435_v26 = vsub.f32 %v520_v34, %v423_v10 }
  0x28   :  { %v188_v52 = vmul.f32 %v850_v51, %v1433_v46  ;;  %v189_v59 = vmul.f32 %v850_v51, %v1434_v3  ;;  %319 = vst [vmem:[%s1387_s4 + $0x70] sm:$0xff] %v255_v24  ;;  %320 = vst [vmem:[%s1387_s4 + $0x78] sm:$0xff] %v256_v14  ;;  %v1436_v32 = vsub.f32 %v525_v35, %v423_v10 }
  0x29   :  { %v190_v27 = vmul.f32 %v850_v51, %v1435_v26  ;;  %v1437_v5 = vsub.f32 %v538_v40, %v423_v10  ;;  %v1438_v16 = vsub.f32 %v543_v41, %v423_v10  ;;  %v257_v19 = vadd.f32 %v861_v53, %v186_v8 }
  0x2a   :  { %v191_v33 = vmul.f32 %v850_v51, %v1436_v32  ;;  %v258_v34 = vadd.f32 %v861_v53, %v187_v39  ;;  %v259_v20 = vadd.f32 %v861_v53, %v188_v52  ;;  %v260_v35 = vadd.f32 %v861_v53, %v189_v59 }
  0x2b   :  { %v192_v38 = vmul.f32 %v850_v51, %v1437_v5  ;;  %v193_v17 = vmul.f32 %v850_v51, %v1438_v16  ;;  %v261_v45 = vadd.f32 %v861_v53, %v190_v27  ;;  %321 = vst [vmem:[%s1387_s4 + $0x80] sm:$0xff] %v257_v19  ;;  %v1439_v41 = vsub.f32 %v548_v42, %v423_v10 }
  0x2c   :  { %v262_v62 = vadd.f32 %v861_v53, %v191_v33  ;;  %322 = vst [vmem:[%s1387_s4 + $0x88] sm:$0xff] %v258_v34  ;;  %323 = vst [vmem:[%s1387_s4 + $0x90] sm:$0xff] %v259_v20  ;;  %v1440_v12 = vsub.f32 %v553_v43, %v423_v10  ;;  %v1441_v6 = vsub.f32 %v564_v47, %v423_v10 }
  0x2d   :  { %v263_v40 = vadd.f32 %v861_v53, %v192_v38  ;;  %v264_v11 = vadd.f32 %v861_v53, %v193_v17  ;;  %324 = vst [vmem:[%s1387_s4 + $0x98] sm:$0xff] %v260_v35  ;;  %v194_v36 = vmul.f32 %v850_v51, %v1439_v41  ;;  %v1442_v13 = vsub.f32 %v569_v48, %v423_v10 }
  0x2e   :  { %v195_v21 = vmul.f32 %v850_v51, %v1440_v12  ;;  %v196_v22 = vmul.f32 %v850_v51, %v1441_v6  ;;  %325 = vst [vmem:[%s1387_s4 + $0xa0] sm:$0xff] %v261_v45  ;;  %326 = vst [vmem:[%s1387_s4 + $0xa8] sm:$0xff] %v262_v62  ;;  %v1443_v42 = vsub.f32 %v574_v49, %v423_v10  ;;  %v1457_v12 = vld [vmem:[#allocation2_spill] sm:$0xff] }
  0x2f   :  { %v197_v7 = vmul.f32 %v850_v51, %v1442_v13  ;;  %327 = vst [vmem:[%s1387_s4 + $0xb0] sm:$0xff] %v263_v40  ;;  %328 = vst [vmem:[%s1387_s4 + $0xb8] sm:$0xff] %v264_v11  ;;  %v1444_v47 = vsub.f32 %v579_v50, %v423_v10  ;;  %v1445_v24 = vsub.f32 %v592_v55, %v423_v10 }
  0x30   :  { %v198_v43 = vmul.f32 %v850_v51, %v1443_v42  ;;  %v1446_v25 = vsub.f32 %v597_v56, %v423_v10  ;;  %v265_v15 = vadd.f32 %v861_v53, %v194_v36  ;;  %v266_v49 = vadd.f32 %v861_v53, %v195_v21 }
  0x31   :  { %v199_v48 = vmul.f32 %v850_v51, %v1444_v47  ;;  %v200_v14 = vmul.f32 %v850_v51, %v1445_v24  ;;  %v267_v39 = vadd.f32 %v861_v53, %v196_v22  ;;  %v268_v50 = vadd.f32 %v861_v53, %v197_v7  ;;  %v1459_v22 = vld [vmem:[#allocation3_spill] sm:$0xff]  ;;  %v1465_v24 = vld [vmem:[#allocation6_spill] sm:$0xff] }
  0x32   :  { %v201_v8 = vmul.f32 %v850_v51, %v1446_v25  ;;  %v269_v46 = vadd.f32 %v861_v53, %v198_v43  ;;  %329 = vst [vmem:[%s1387_s4 + $0xc0] sm:$0xff] %v265_v15  ;;  %330 = vst [vmem:[%s1387_s4 + $0xc8] sm:$0xff] %v266_v49  ;;  %v1447_v56 = vsub.f32 %v602_v57, %v423_v10  ;;  %v1463_v43 = vld [vmem:[#allocation5_spill] sm:$0xff] }
  0x33   :  { %v270_v52 = vadd.f32 %v861_v53, %v199_v48  ;;  %v271_v55 = vadd.f32 %v861_v53, %v200_v14  ;;  %331 = vst [vmem:[%s1387_s4 + $0xd0] sm:$0xff] %v267_v39  ;;  %332 = vst [vmem:[%s1387_s4 + $0xd8] sm:$0xff] %v268_v50  ;;  %v1448_v26 = vsub.f32 %v607_v58, %v423_v10 }
  0x34   :  { %v272_v3 = vadd.f32 %v861_v53, %v201_v8  ;;  %v202_v59 = vmul.f32 %v850_v51, %v1447_v56  ;;  %v1449_v32 = vsub.f32 %v620_v63, %v423_v10  ;;  %v1450_v5 = vsub.f32 %v625_v0, %v423_v10  ;;  %333 = vst [vmem:[%s1387_s4 + $0xe0] sm:$0xff] %v269_v46  ;;  %v1467_v8 = vld [vmem:[#allocation7_spill] sm:$0xff] }
  0x35   :  { %v203_v27 = vmul.f32 %v850_v51, %v1448_v26  ;;  %334 = vst [vmem:[%s1387_s4 + $0xe8] sm:$0xff] %v270_v52  ;;  %335 = vst [vmem:[%s1387_s4 + $0xf0] sm:$0xff] %v271_v55  ;;  %v1451_v57 = vsub.f32 %v630_v1, %v423_v10  ;;  %v1452_v63 = vsub.f32 %v643_v18, %v423_v10  ;;  %v1469_v26 = vld [vmem:[#allocation8_spill] sm:$0xff] }
  0x36   :  { %v204_v33 = vmul.f32 %v850_v51, %v1449_v32  ;;  %v205_v38 = vmul.f32 %v850_v51, %v1450_v5  ;;  %336 = vst [vmem:[%s1387_s4 + $0xf8] sm:$0xff] %v272_v3  ;;  %v1453_v16 = vsub.f32 %v648_v28, %v423_v10  ;;  %v1454_v19 = vsub.f32 %v653_v4, %v423_v10 }
  0x37   :  { %v206_v58 = vmul.f32 %v850_v51, %v1451_v57  ;;  %v207_v0 = vmul.f32 %v850_v51, %v1452_v63  ;;  %v273_v20 = vadd.f32 %v861_v53, %v202_v59  ;;  %v274_v1 = vadd.f32 %v861_v53, %v203_v27  ;;  %v1473_v57 = vld [vmem:[#allocation10_spill] sm:$0xff] }
  0x38   :  { %v208_v17 = vmul.f32 %v850_v51, %v1453_v16  ;;  %v209_v34 = vmul.f32 %v850_v51, %v1454_v19  ;;  %v275_v35 = vadd.f32 %v861_v53, %v204_v33  ;;  %v276_v18 = vadd.f32 %v861_v53, %v205_v38  ;;  %v1471_v33 = vld [vmem:[#allocation9_spill] sm:$0xff]  ;;  %v1477_v19 = vld [vmem:[#allocation12_spill] sm:$0xff] }
  0x39   :  { %v277_v45 = vadd.f32 %v861_v53, %v206_v58  ;;  %v278_v62 = vadd.f32 %v861_v53, %v207_v0  ;;  %337 = vst [vmem:[%s1387_s4 + $0x100] sm:$0xff] %v273_v20  ;;  %338 = vst [vmem:[%s1387_s4 + $0x108] sm:$0xff] %v274_v1  ;;  %v1455_v4 = vsub.f32 %v666_v61, %v423_v10  ;;  %v1475_v0 = vld [vmem:[#allocation11_spill] sm:$0xff] }
  0x3a   :  { %v279_v28 = vadd.f32 %v861_v53, %v208_v17  ;;  %v280_v40 = vadd.f32 %v861_v53, %v209_v34  ;;  %339 = vst [vmem:[%s1387_s4 + $0x110] sm:$0xff] %v275_v35  ;;  %340 = vst [vmem:[%s1387_s4 + $0x118] sm:$0xff] %v276_v18  ;;  %v1456_v41 = vsub.f32 %v671_v60, %v423_v10  ;;  %v1461_v60 = vld [vmem:[#allocation4_spill] sm:$0xff] }
  0x3b   :  { %v210_v11 = vmul.f32 %v850_v51, %v1455_v4  ;;  %v1458_v21 = vsub.f32 %v1457_v12, %v423_v10  ;;  %v1460_v13 = vsub.f32 %v1459_v22, %v423_v10  ;;  %341 = vst [vmem:[%s1387_s4 + $0x120] sm:$0xff] %v277_v45  ;;  %342 = vst [vmem:[%s1387_s4 + $0x128] sm:$0xff] %v278_v62 }
  0x3c   :  { %v211_v36 = vmul.f32 %v850_v51, %v1456_v41  ;;  %343 = vst [vmem:[%s1387_s4 + $0x130] sm:$0xff] %v279_v28  ;;  %344 = vst [vmem:[%s1387_s4 + $0x138] sm:$0xff] %v280_v40  ;;  %v1462_v61 = vsub.f32 %v1461_v60, %v423_v10  ;;  %v1464_v47 = vsub.f32 %v1463_v43, %v423_v10 }
  0x3d   :  { %v212_v6 = vmul.f32 %v850_v51, %v1458_v21  ;;  %v213_v7 = vmul.f32 %v850_v51, %v1460_v13  ;;  %v1466_v14 = vsub.f32 %v1465_v24, %v423_v10  ;;  %v1468_v15 = vsub.f32 %v1467_v8, %v423_v10 }
  0x3e   :  { %v214_v42 = vmul.f32 %v850_v51, %v1462_v61  ;;  %v215_v48 = vmul.f32 %v850_v51, %v1464_v47  ;;  %v281_v39 = vadd.f32 %v861_v53, %v210_v11  ;;  %v282_v50 = vadd.f32 %v861_v53, %v211_v36 }
  0x3f   :  { %v216_v25 = vmul.f32 %v850_v51, %v1466_v14  ;;  %v217_v49 = vmul.f32 %v850_v51, %v1468_v15  ;;  %v283_v46 = vadd.f32 %v861_v53, %v212_v6  ;;  %v284_v52 = vadd.f32 %v861_v53, %v213_v7 }
  0x40   :  { %v285_v55 = vadd.f32 %v861_v53, %v214_v42  ;;  %v286_v3 = vadd.f32 %v861_v53, %v215_v48  ;;  %345 = vst [vmem:[%s1387_s4 + $0x140] sm:$0xff] %v281_v39  ;;  %346 = vst [vmem:[%s1387_s4 + $0x148] sm:$0xff] %v282_v50  ;;  %v1470_v27 = vsub.f32 %v1469_v26, %v423_v10  ;;  %v1488_v42 = vld [vmem:[#allocation13_spill] sm:$0xff]  ;;  %v1490_v48 = vld [vmem:[#allocation14_spill] sm:$0xff] }
  0x41   :  { %v287_v56 = vadd.f32 %v861_v53, %v216_v25  ;;  %v288_v59 = vadd.f32 %v861_v53, %v217_v49  ;;  %347 = vst [vmem:[%s1387_s4 + $0x150] sm:$0xff] %v283_v46  ;;  %348 = vst [vmem:[%s1387_s4 + $0x158] sm:$0xff] %v284_v52  ;;  %v1472_v5 = vsub.f32 %v1471_v33, %v423_v10 }
  0x42   :  { %v218_v32 = vmul.f32 %v850_v51, %v1470_v27  ;;  %v1474_v58 = vsub.f32 %v1473_v57, %v423_v10  ;;  %v1476_v16 = vsub.f32 %v1475_v0, %v423_v10  ;;  %349 = vst [vmem:[%s1387_s4 + $0x160] sm:$0xff] %v285_v55  ;;  %350 = vst [vmem:[%s1387_s4 + $0x168] sm:$0xff] %v286_v3 }
  0x43   :  { %v219_v38 = vmul.f32 %v850_v51, %v1472_v5  ;;  %351 = vst [vmem:[%s1387_s4 + $0x170] sm:$0xff] %v287_v56  ;;  %352 = vst [vmem:[%s1387_s4 + $0x178] sm:$0xff] %v288_v59  ;;  %v1478_v34 = vsub.f32 %v1477_v19, %v423_v10  ;;  %v1479_v1 = vsub.f32 %v766_v31, %v423_v10 }
  0x44   :  { %v220_v63 = vmul.f32 %v850_v51, %v1474_v58  ;;  %v221_v17 = vmul.f32 %v850_v51, %v1476_v16  ;;  %v1480_v18 = vsub.f32 %v771_v44, %v423_v10  ;;  %v1481_v62 = vsub.f32 %v784_v29, %v423_v10 }
  0x45   :  { %v222_v20 = vmul.f32 %v850_v51, %v1478_v34  ;;  %v223_v35 = vmul.f32 %v850_v51, %v1479_v1  ;;  %v289_v40 = vadd.f32 %v861_v53, %v218_v32  ;;  %v290_v4 = vadd.f32 %v861_v53, %v219_v38 }
  0x46   :  { %v224_v45 = vmul.f32 %v850_v51, %v1480_v18  ;;  %v225_v28 = vmul.f32 %v850_v51, %v1481_v62  ;;  %v291_v11 = vadd.f32 %v861_v53, %v220_v63  ;;  %v292_v31 = vadd.f32 %v861_v53, %v221_v17 }
  0x47   :  { %v293_v41 = vadd.f32 %v861_v53, %v222_v20  ;;  %v294_v36 = vadd.f32 %v861_v53, %v223_v35  ;;  %353 = vst [vmem:[%s1387_s4 + $0x180] sm:$0xff] %v289_v40  ;;  %354 = vst [vmem:[%s1387_s4 + $0x188] sm:$0xff] %v290_v4  ;;  %v1482_v29 = vsub.f32 %v789_v23, %v423_v10 }
  0x48   :  { %v295_v44 = vadd.f32 %v861_v53, %v224_v45  ;;  %v296_v12 = vadd.f32 %v861_v53, %v225_v28  ;;  %355 = vst [vmem:[%s1387_s4 + $0x190] sm:$0xff] %v291_v11  ;;  %356 = vst [vmem:[%s1387_s4 + $0x198] sm:$0xff] %v292_v31  ;;  %v1483_v6 = vsub.f32 %v794_v37, %v423_v10 }
  0x49   :  { %v226_v21 = vmul.f32 %v850_v51, %v1482_v29  ;;  %v1484_v13 = vsub.f32 %v807_v54, %v423_v10  ;;  %v1485_v60 = vsub.f32 %v812_v9, %v423_v10  ;;  %357 = vst [vmem:[%s1387_s4 + $0x1a0] sm:$0xff] %v293_v41  ;;  %358 = vst [vmem:[%s1387_s4 + $0x1a8] sm:$0xff] %v294_v36 }
  0x4a   :  { %v227_v22 = vmul.f32 %v850_v51, %v1483_v6  ;;  %359 = vst [vmem:[%s1387_s4 + $0x1b0] sm:$0xff] %v295_v44  ;;  %360 = vst [vmem:[%s1387_s4 + $0x1b8] sm:$0xff] %v296_v12  ;;  %v1486_v23 = vsub.f32 %v817_v30, %v423_v10  ;;  %v1487_v54 = vsub.f32 %v828_v2, %v423_v10 }
  0x4b   :  { %v228_v7 = vmul.f32 %v850_v51, %v1484_v13  ;;  %v229_v61 = vmul.f32 %v850_v51, %v1485_v60  ;;  %v1489_v43 = vsub.f32 %v1488_v42, %v423_v10  ;;  %v1491_v24 = vsub.f32 %v1490_v48, %v423_v10 }
  0x4c   :  { %v230_v37 = vmul.f32 %v850_v51, %v1486_v23  ;;  %v231_v9 = vmul.f32 %v850_v51, %v1487_v54  ;;  %v297_v25 = vadd.f32 %v861_v53, %v226_v21  ;;  %v298_v30 = vadd.f32 %v861_v53, %v227_v22 }
  0x4d   :  { %v232_v47 = vmul.f32 %v850_v51, %v1489_v43  ;;  %v233_v14 = vmul.f32 %v850_v51, %v1491_v24  ;;  %v299_v8 = vadd.f32 %v861_v53, %v228_v7  ;;  %v300_v2 = vadd.f32 %v861_v53, %v229_v61 }
  0x4e   :  { %v301_v15 = vadd.f32 %v861_v53, %v230_v37  ;;  %v302_v49 = vadd.f32 %v861_v53, %v231_v9  ;;  %361 = vst [vmem:[%s1387_s4 + $0x1c0] sm:$0xff] %v297_v25  ;;  %362 = vst [vmem:[%s1387_s4 + $0x1c8] sm:$0xff] %v298_v30 }
  0x4f   :  { %v303_v39 = vadd.f32 %v861_v53, %v232_v47  ;;  %v304_v50 = vadd.f32 %v861_v53, %v233_v14  ;;  %363 = vst [vmem:[%s1387_s4 + $0x1d0] sm:$0xff] %v299_v8  ;;  %364 = vst [vmem:[%s1387_s4 + $0x1d8] sm:$0xff] %v300_v2 }
  0x50   :  { %365 = vst [vmem:[%s1387_s4 + $0x1e0] sm:$0xff] %v301_v15  ;;  %366 = vst [vmem:[%s1387_s4 + $0x1e8] sm:$0xff] %v302_v49 }
  0x51   :  { %367 = vst [vmem:[%s1387_s4 + $0x1f0] sm:$0xff] %v303_v39  ;;  %368 = vst [vmem:[%s1387_s4 + $0x1f8] sm:$0xff] %v304_v50 }

// kernel: tile.6
= control target key start
LH: loop header
LB: loop body
LE: loop exit
PB: predicated region body
PF: predicated region fallthrough
CT: control target
= control target key end

     0   :  { %s22_s0 = inlined_call_operand.vmem [shape: f32[3], index: 0, kind: input, shape index: {}]   ;;  %s23_s1 = inlined_call_operand.vmem [shape: f32[4,3], index: 1, kind: output, shape index: {}]  }
   0x1   :  { %v4_v0 = vld [vmem:[%s22_s0] ss:$0 sm:$0xff] }
   0x2   :  { %5 = vst [vmem:[%s23_s1] sm:$0xf] %v4_v0 }

// kernel: tile.7
= control target key start
LH: loop header
LB: loop body
LE: loop exit
PB: predicated region body
PF: predicated region fallthrough
CT: control target
= control target key end

     0   :  { %vm7_vm0 = vcmask 23552   ;;  %s37_s8 = smov 3   ;;  %s38_s9 = smov 6   ;;  %vm13_vm1 = vcmask 97352   ;;  %vm19_vm2 = vcmask 72752   ;;  %vm25_vm3 = vcmask 48152   ;;  %s55_s0 = inlined_call_operand.vmem [shape: f32[4,3], index: 0, kind: input, shape index: {}]   ;;  %s56_s1 = inlined_call_operand.vmem [shape: f32[12], index: 1, kind: output, shape index: {}]  }
   0x1   :  { %v4_v0 = vld [vmem:[%s55_s0] sm:$0xf]  ;;  %s36_s0 = smov 9  }
   0x2   :  { %5 = vst [vmem:[#allocation1] sm:$0xf] %v4_v0 }
   0x9   :  { %v10_v1 = vld [vmem:[#allocation1 + $0x3] sm:$0x1]   ;;  %v22_v2 = vld [vmem:[#allocation1 + $0x1] sm:$0x1]   ;;  %v6_v3 = vld [vmem:[#allocation1] sm:$0x1]  }
   0xa   :  { %11 = vrot.lane.b32.xlu0 %v10_v1, %s36_s0  ;;  %23 = vrot.lane.b32.xlu1 %v22_v2, %s37_s8  ;;  %v16_v4 = vld [vmem:[#allocation1 + $0x2] sm:$0x1]   ;;  %8 = vst.msk [vmem:[#allocation0] sm:$0x1] %vm7_vm0, %v6_v3  }
   0xe   :  { %17 = vrot.lane.b32.xlu0 %v16_v4, %s38_s9 }
  0x7c   :  { %v12_v5 = vpop.permute.xlu0 %11   ;;  %v24_v6 = vpop.permute.xlu1 %23  }
  0x7d   :  { %14 = vst.msk [vmem:[#allocation0] sm:$0x1] %vm13_vm1, %v12_v5  }
  0x80   :  { %v18_v7 = vpop.permute.xlu0 %17  }
  0x81   :  { %20 = vst.msk [vmem:[#allocation0] sm:$0x1] %vm19_vm2, %v18_v7  }
  0x82   :  { %26 = vst.msk [vmem:[#allocation0] sm:$0x1] %vm25_vm3, %v24_v6  }
  0x89   :  { %v30_v8 = vld [vmem:[#allocation0] sm:$0x1] }
  0x8a   :  { %32 = vst [vmem:[%s56_s1] sm:$0x1] %v30_v8 }

// kernel: _lambda_.47
= control target key start
LH: loop header
LB: loop body
LE: loop exit
PB: predicated region body
PF: predicated region fallthrough
CT: control target
= control target key end

     0   :  { %s1507_s12 = smov 0   ;;  %s1509_s13 = smov 0   ;;  %s1732_s0 = inlined_call_operand.vmem [shape: bf16[512,256], index: 0, kind: input, shape index: {}]   ;;  %s1733_s1 = inlined_call_operand.vmem [shape: bf16[256,128], index: 1, kind: input, shape index: {}]   ;;  %s1734_s2 = inlined_call_operand.vmem [shape: f32[1,128], index: 2, kind: input, shape index: {}]   ;;  %s1735_s3 = inlined_call_operand.vmem [shape: f32[512,128], index: 3, kind: output, shape index: {}]  }
   0x1   :  { %s1511_s14 = smov 0  }
   0x2 LB: > { %s32_s15 = sadd.s32 1, %s1480_s13  ;;  %p1171_p0 = scmp.ge.s32.totalorder %s1484_s14, 1  ;;  %s1484_s14 = sphi %s1511_s14, %s13_s14   ;;  %s1480_s13 = sphi %s1509_s13, %s1737_s13   ;;  %s1476_s12 = sphi %s1507_s12, %s1736_s12  }
   0x3   : > { %p34_p1 = scmp.ge.s32.totalorder %s32_s15, 2  ;;  %p191_p2 = scmp.lt.s32.totalorder %s1484_s14, 3 }
   0x5   : > { %s1739_s15 = smov (%p34_p1, %s32_s15), 0  ;;  %p192_p3 = pnand %p1171_p0, %p191_p2 }
   0x6   : > { %v1382_v0 = vld [vmem:[%s1733_s1 + $0x40] sm:$0xff] (!%p192_p3)   ;;  %s1172_s18 = sshll.u32 (!%p192_p3), %s1476_s12, 5  ;;  %v1384_v2 = vld [vmem:[%s1733_s1 + $0x48] sm:$0xff] (!%p192_p3)   ;;  %v1386_v4 = vld [vmem:[%s1733_s1 + $0x50] sm:$0xff] (!%p192_p3)   ;;  %v1486_v14 = vmov (!%p192_p3), 0  }
   0x7   : > { %195 = sbr.rel (%p192_p3) target bundleno = 329 (0x149), region = 32  ;;  %v1383_v1 = vld [vmem:[%s1733_s1] sm:$0xff] (!%p192_p3)   ;;  %1229 = vmatprep.subr.bf16.mxu0 (!%p192_p3), %v1382_v0  ;;  %1341 = vmatprep.subr.bf16.mxu1 (!%p192_p3), %v1382_v0  ;;  %p236_p4 = scmp.lt.s32.totalorder (!%p192_p3), %s1172_s18, 63  ;;  %v1385_v3 = vld [vmem:[%s1733_s1 + $0x8] sm:$0xff] (!%p192_p3)   ;;  %v1387_v5 = vld [vmem:[%s1733_s1 + $0x10] sm:$0xff] (!%p192_p3)  }
   0x8   : > { %1230 = vmatpush3.bf16.msra.mxu0 (!%p192_p3), %v1383_v1  ;;  %1349 = vmatpush3.bf16.msra.mxu1 (!%p192_p3), %v1383_v1  ;;  %v1388_v6 = vld [vmem:[%s1733_s1 + $0x58] sm:$0xff] (!%p192_p3)   ;;  %v1390_v8 = vld [vmem:[%s1733_s1 + $0x60] sm:$0xff] (!%p192_p3)   ;;  %v1392_v10 = vld [vmem:[%s1733_s1 + $0x68] sm:$0xff] (!%p192_p3)  }
   0x9   : > { %1231 = vmatprep.subr.bf16.mxu0 (!%p192_p3), %v1384_v2  ;;  %1342 = vmatprep.subr.bf16.mxu1 (!%p192_p3), %v1384_v2  ;;  %v1389_v7 = vld [vmem:[%s1733_s1 + $0x18] sm:$0xff] (!%p192_p3)   ;;  %v1391_v9 = vld [vmem:[%s1733_s1 + $0x20] sm:$0xff] (!%p192_p3)   ;;  %v1393_v20 = vld [vmem:[%s1733_s1 + $0x28] sm:$0xff] (!%p192_p3)  }
   0xa   : > { %v1394_v22 = vld [vmem:[%s1733_s1 + $0x70] sm:$0xff] (!%p192_p3)   ;;  %v1396_v25 = vld [vmem:[%s1733_s1 + $0x78] sm:$0xff] (!%p192_p3)  }
   0xb   : > { %v1395_v24 = vld [vmem:[%s1733_s1 + $0x30] sm:$0xff] (!%p192_p3)   ;;  %v1397_v31 = vld [vmem:[%s1733_s1 + $0x38] sm:$0xff] (!%p192_p3)  }
   0xc   : > { %1232 = vmatpush3.bf16.msra.mxu0 (!%p192_p3), %v1385_v3  ;;  %1350 = vmatpush3.bf16.msra.mxu1 (!%p192_p3), %v1385_v3 }
   0xd   : > { %1233 = vmatprep.subr.bf16.mxu0 (!%p192_p3), %v1386_v4  ;;  %1343 = vmatprep.subr.bf16.mxu1 (!%p192_p3), %v1386_v4 }
   0xe   : > { %s1741_s18 = smov (!%p236_p4, %s1172_s18), 63 }
   0xf   : > { %s1228_s4 = sshll.u32 %s1741_s18, 3 }
  0x10   : > { %1234 = vmatpush3.bf16.msra.mxu0 %v1387_v5  ;;  %1351 = vmatpush3.bf16.msra.mxu1 %v1387_v5  ;;  %s1560_s11 = scalar_lea.vmem %s1732_s0, %s1228_s4  ;;  %s1663_s8 = scalar_lea.vmem %s1735_s3, %s1228_s4 }
  0x11   : > { %1235 = vmatprep.subr.bf16.mxu0 %v1388_v6  ;;  %1344 = vmatprep.subr.bf16.mxu1 %v1388_v6  ;;  %v304_v11 = vld [vmem:[%s1560_s11] sm:$0xff]  ;;  %v305_v12 = vld [vmem:[%s1560_s11 + $0x8] sm:$0xff]  ;;  %v306_v26 = vld [vmem:[%s1560_s11 + $0x10] sm:$0xff] }
  0x12   : > { %v320_v13 = vld [vmem:[%s1560_s11 + $0x80] sm:$0xff]  ;;  %v336_v15 = vmax.bf16 %v1486_v14, %v304_v11  ;;  %v337_v16 = vmax.bf16 %v1486_v14, %v305_v12  ;;  %v321_v17 = vld [vmem:[%s1560_s11 + $0x88] sm:$0xff]  ;;  %v307_v27 = vld [vmem:[%s1560_s11 + $0x18] sm:$0xff]  ;;  %v338_v30 = vmax.bf16 %v1486_v14, %v306_v26 }
  0x13   : > { %v352_v18 = vmax.bf16 %v1486_v14, %v320_v13  ;;  %v353_v19 = vmax.bf16 %v1486_v14, %v321_v17  ;;  %v322_v28 = vld [vmem:[%s1560_s11 + $0x90] sm:$0xff]  ;;  %v323_v29 = vld [vmem:[%s1560_s11 + $0x98] sm:$0xff]  ;;  %v339_v32 = vmax.bf16 %v1486_v14, %v307_v27  ;;  %v308_v39 = vld [vmem:[%s1560_s11 + $0x20] sm:$0xff] }
  0x14   : > { %1236 = vmatpush3.bf16.msra.mxu0 %v1389_v7  ;;  %1352 = vmatpush3.bf16.msra.mxu1 %v1389_v7  ;;  %v1178_v21 = vcombine.high %v336_v15, %v337_v16  ;;  %v354_v33 = vmax.bf16 %v1486_v14, %v322_v28  ;;  %v355_v34 = vmax.bf16 %v1486_v14, %v323_v29  ;;  %v309_v40 = vld [vmem:[%s1560_s11 + $0x28] sm:$0xff]  ;;  %v324_v41 = vld [vmem:[%s1560_s11 + $0xa0] sm:$0xff]  ;;  %v310_v51 = vld [vmem:[%s1560_s11 + $0x30] sm:$0xff] }
  0x15   : > { %1237 = vmatprep.subr.bf16.mxu0 %v1390_v8  ;;  %1345 = vmatprep.subr.bf16.mxu1 %v1390_v8  ;;  %v1194_v23 = vcombine.high %v352_v18, %v353_v19  ;;  %v1177_v35 = vcombine.low %v336_v15, %v337_v16  ;;  %v1193_v36 = vcombine.low %v352_v18, %v353_v19  ;;  %v325_v42 = vld [vmem:[%s1560_s11 + $0xa8] sm:$0xff]  ;;  %v311_v52 = vld [vmem:[%s1560_s11 + $0x38] sm:$0xff]  ;;  %v326_v53 = vld [vmem:[%s1560_s11 + $0xb0] sm:$0xff] }
  0x16   : > { %720 = vmatprep.mubr.bf16.mxu0 %v1178_v21  ;;  %v1180_v37 = vcombine.high %v338_v30, %v339_v32  ;;  %v1196_v38 = vcombine.high %v354_v33, %v355_v34  ;;  %v340_v43 = vmax.bf16 %v1486_v14, %v308_v39  ;;  %v341_v44 = vmax.bf16 %v1486_v14, %v309_v40  ;;  %v327_v54 = vld [vmem:[%s1560_s11 + $0xb8] sm:$0xff]  ;;  %v312_v63 = vld [vmem:[%s1560_s11 + $0x40] sm:$0xff]  ;;  %v313_v0 = vld [vmem:[%s1560_s11 + $0x48] sm:$0xff] }
  0x17   : > { %784 = vmatprep.mubr.bf16.mxu1 %v1194_v23  ;;  %v356_v45 = vmax.bf16 %v1486_v14, %v324_v41  ;;  %v357_v46 = vmax.bf16 %v1486_v14, %v325_v42  ;;  %v1179_v47 = vcombine.low %v338_v30, %v339_v32  ;;  %v1195_v48 = vcombine.low %v354_v33, %v355_v34  ;;  %v328_v1 = vld [vmem:[%s1560_s11 + $0xc0] sm:$0xff]  ;;  %v329_v2 = vld [vmem:[%s1560_s11 + $0xc8] sm:$0xff]  ;;  %v314_v11 = vld [vmem:[%s1560_s11 + $0x50] sm:$0xff] }
  0x18   : > { %1238 = vmatpush3.bf16.msra.mxu0 %v1391_v9  ;;  %1353 = vmatpush3.bf16.msra.mxu1 %v1391_v9  ;;  %v1182_v49 = vcombine.high %v340_v43, %v341_v44  ;;  %v342_v55 = vmax.bf16 %v1486_v14, %v310_v51  ;;  %v343_v56 = vmax.bf16 %v1486_v14, %v311_v52  ;;  %v315_v12 = vld [vmem:[%s1560_s11 + $0x58] sm:$0xff]  ;;  %v330_v13 = vld [vmem:[%s1560_s11 + $0xd0] sm:$0xff]  ;;  %v332_v26 = vld [vmem:[%s1560_s11 + $0xe0] sm:$0xff] }
  0x19   : > { %1239 = vmatprep.subr.bf16.mxu0 %v1392_v10  ;;  %1346 = vmatprep.subr.bf16.mxu1 %v1392_v10  ;;  %v1198_v50 = vcombine.high %v356_v45, %v357_v46  ;;  %v358_v57 = vmax.bf16 %v1486_v14, %v326_v53  ;;  %v359_v58 = vmax.bf16 %v1486_v14, %v327_v54  ;;  %v331_v15 = vld [vmem:[%s1560_s11 + $0xd8] sm:$0xff]  ;;  %v333_v27 = vld [vmem:[%s1560_s11 + $0xe8] sm:$0xff]  ;;  %v1650_v53 = vld [vmem:[%s1734_s2] ss:$0 sm:$0xff] }
  0x1a   : > { %v1181_v59 = vcombine.low %v340_v43, %v341_v44  ;;  %v1197_v60 = vcombine.low %v356_v45, %v357_v46  ;;  %v1184_v61 = vcombine.high %v342_v55, %v343_v56  ;;  %v344_v3 = vmax.bf16 %v1486_v14, %v312_v63  ;;  %v335_v39 = vld [vmem:[%s1560_s11 + $0xf8] sm:$0xff] }
  0x1b   : > { %v1200_v62 = vcombine.high %v358_v57, %v359_v58  ;;  %v345_v4 = vmax.bf16 %v1486_v14, %v313_v0  ;;  %v360_v5 = vmax.bf16 %v1486_v14, %v328_v1  ;;  %v361_v6 = vmax.bf16 %v1486_v14, %v329_v2 }
  0x1c   : > { %1240 = vmatpush3.bf16.msra.mxu0 %v1393_v20  ;;  %1354 = vmatpush3.bf16.msra.mxu1 %v1393_v20  ;;  %v1183_v7 = vcombine.low %v342_v55, %v343_v56  ;;  %v1199_v8 = vcombine.low %v358_v57, %v359_v58  ;;  %v346_v16 = vmax.bf16 %v1486_v14, %v314_v11 }
  0x1d   : > { %1241 = vmatprep.subr.bf16.mxu0 %v1394_v22  ;;  %1347 = vmatprep.subr.bf16.mxu1 %v1394_v22  ;;  %v1186_v9 = vcombine.high %v344_v3, %v345_v4  ;;  %v1202_v10 = vcombine.high %v360_v5, %v361_v6  ;;  %v347_v17 = vmax.bf16 %v1486_v14, %v315_v12 }
  0x1e   : > { %v362_v18 = vmax.bf16 %v1486_v14, %v330_v13  ;;  %v363_v19 = vmax.bf16 %v1486_v14, %v331_v15  ;;  %v1185_v20 = vcombine.low %v344_v3, %v345_v4  ;;  %v1201_v21 = vcombine.low %v360_v5, %v361_v6 }
  0x1f   : > { %v1188_v22 = vcombine.high %v346_v16, %v347_v17  ;;  %v364_v30 = vmax.bf16 %v1486_v14, %v332_v26  ;;  %v1187_v32 = vcombine.low %v346_v16, %v347_v17  ;;  %v367_v43 = vmax.bf16 %v1486_v14, %v335_v39 }
  0x20   : > { %1242 = vmatpush3.bf16.msra.mxu0 %v1395_v24  ;;  %1355 = vmatpush3.bf16.msra.mxu1 %v1395_v24  ;;  %v1204_v23 = vcombine.high %v362_v18, %v363_v19  ;;  %v316_v24 = vld [vmem:[%s1560_s11 + $0x60] sm:$0xff]  ;;  %v1203_v33 = vcombine.low %v362_v18, %v363_v19 }
  0x21   : > { %1243 = vmatprep.subr.bf16.mxu0 %v1396_v25  ;;  %1348 = vmatprep.subr.bf16.mxu1 %v1396_v25  ;;  %v317_v25 = vld [vmem:[%s1560_s11 + $0x68] sm:$0xff]  ;;  %v348_v28 = vmax.bf16 %v1486_v14, %v316_v24 }
  0x22   : > { %v349_v29 = vmax.bf16 %v1486_v14, %v317_v25 }
  0x24   : > { %1244 = vmatpush3.bf16.msra.mxu0 %v1397_v31  ;;  %1356 = vmatpush3.bf16.msra.mxu1 %v1397_v31  ;;  %v365_v31 = vmax.bf16 %v1486_v14, %v333_v27  ;;  %v1190_v34 = vcombine.high %v348_v28, %v349_v29  ;;  %v1189_v44 = vcombine.low %v348_v28, %v349_v29 }
  0x26   : > { %v1205_v45 = vcombine.low %v364_v30, %v365_v31 }
  0x27   : > { %721 = vmatmul.mubr.bf16.vlgmr.msra.gmra.mrb[0].mxu0 %v1177_v35  ;;  %785 = vmatmul.mubr.bf16.vlgmr.msra.gmra.mrb[0].mxu1 %v1193_v36  ;;  %v1206_v35 = vcombine.high %v364_v30, %v365_v31  ;;  %v318_v36 = vld [vmem:[%s1560_s11 + $0x70] sm:$0xff] }
  0x28   : > { %728 = vmatprep.mubr.bf16.mxu0 %v1180_v37  ;;  %792 = vmatprep.mubr.bf16.mxu1 %v1196_v38  ;;  %v319_v37 = vld [vmem:[%s1560_s11 + $0x78] sm:$0xff]  ;;  %v334_v38 = vld [vmem:[%s1560_s11 + $0xf0] sm:$0xff]  ;;  %v350_v40 = vmax.bf16 %v1486_v14, %v318_v36 }
  0x29   : > { %v351_v41 = vmax.bf16 %v1486_v14, %v319_v37  ;;  %v366_v42 = vmax.bf16 %v1486_v14, %v334_v38 }
  0x2b   : > { %v1192_v46 = vcombine.high %v350_v40, %v351_v41 }
  0x2f   : > { %729 = vmatmul.mubr.bf16.gmra.mrb[4].mxu0 %v1179_v47  ;;  %793 = vmatmul.mubr.bf16.gmra.mrb[4].mxu1 %v1195_v48  ;;  %v1208_v47 = vcombine.high %v366_v42, %v367_v43  ;;  %v1191_v48 = vcombine.low %v350_v40, %v351_v41 }
  0x30   : > { %736 = vmatprep.mubr.bf16.mxu0 %v1182_v49  ;;  %800 = vmatprep.mubr.bf16.mxu1 %v1198_v50  ;;  %v1207_v49 = vcombine.low %v366_v42, %v367_v43 }
  0x37   : > { %737 = vmatmul.mubr.bf16.gmra.mrb[8].mxu0 %v1181_v59  ;;  %801 = vmatmul.mubr.bf16.gmra.mrb[8].mxu1 %v1197_v60 }
  0x38   : > { %744 = vmatprep.mubr.bf16.mxu0 %v1184_v61  ;;  %808 = vmatprep.mubr.bf16.mxu1 %v1200_v62 }
  0x3f   : > { %745 = vmatmul.mubr.bf16.gmra.mrb[12].mxu0 %v1183_v7  ;;  %809 = vmatmul.mubr.bf16.gmra.mrb[12].mxu1 %v1199_v8 }
  0x40   : > { %752 = vmatprep.mubr.bf16.mxu0 %v1186_v9  ;;  %816 = vmatprep.mubr.bf16.mxu1 %v1202_v10 }
  0x47   : > { %753 = vmatmul.mubr.bf16.gmra.mrb[16].mxu0 %v1185_v20  ;;  %817 = vmatmul.mubr.bf16.gmra.mrb[16].mxu1 %v1201_v21 }
  0x48   : > { %760 = vmatprep.mubr.bf16.mxu0 %v1188_v22  ;;  %824 = vmatprep.mubr.bf16.mxu1 %v1204_v23 }
  0x4f   : > { %761 = vmatmul.mubr.bf16.gmra.mrb[20].mxu0 %v1187_v32  ;;  %825 = vmatmul.mubr.bf16.gmra.mrb[20].mxu1 %v1203_v33 }
  0x50   : > { %768 = vmatprep.mubr.bf16.mxu0 %v1190_v34  ;;  %832 = vmatprep.mubr.bf16.mxu1 %v1206_v35 }
  0x57   : > { %769 = vmatmul.mubr.bf16.gmra.mrb[24].mxu0 %v1189_v44  ;;  %833 = vmatmul.mubr.bf16.gmra.mrb[24].mxu1 %v1205_v45 }
  0x58   : > { %776 = vmatprep.mubr.bf16.mxu0 %v1192_v46  ;;  %840 = vmatprep.mubr.bf16.mxu1 %v1208_v47 }
  0x5f   : > { %777 = vmatmul.mubr.bf16.gmra.mrb[28].mxu0 %v1191_v48  ;;  %841 = vmatmul.mubr.bf16.gmra.mrb[28].mxu1 %v1207_v49 }
  0xfa   : > { %v1245_v50 = vpop.f32.mrb[0].mxu0  ;;  %v1293_v51 = vpop.f32.mrb[0].mxu1 }
  0xfb   : > { %v1246_v52 = vpop.f32.mrb[1].mxu0  ;;  %v1294_v14 = vpop.f32.mrb[1].mxu1 }
  0xfc   : > { %v1247_v54 = vadd.f32 %v1246_v52, %v1245_v50  ;;  %v1295_v55 = vadd.f32 %v1294_v14, %v1293_v51  ;;  %v1248_v56 = vpop.f32.mrb[2].mxu0  ;;  %v1296_v57 = vpop.f32.mrb[2].mxu1 }
  0xfd   : > { %v1249_v58 = vpop.f32.mrb[3].mxu0  ;;  %v1297_v59 = vpop.f32.mrb[3].mxu1 }
  0xfe   : > { %v955_v60 = vadd.f32 %v1247_v54, %v1650_v53  ;;  %v971_v61 = vadd.f32 %v1295_v55, %v1650_v53  ;;  %v1250_v62 = vadd.f32 %v1249_v58, %v1248_v56  ;;  %v1298_v63 = vadd.f32 %v1297_v59, %v1296_v57 }
 0x100   : > { %1398 = vtanh.f32 %v955_v60  ;;  %v956_v0 = vadd.f32 %v1250_v62, %v1650_v53  ;;  %v972_v1 = vadd.f32 %v1298_v63, %v1650_v53 }
 0x101   : > { %1400 = vtanh.f32 %v971_v61 }
 0x102   : > { %1402 = vtanh.f32 %v956_v0  ;;  %v1251_v2 = vpop.f32.mrb[4].mxu0  ;;  %v1299_v3 = vpop.f32.mrb[4].mxu1 }
 0x103   : > { %1404 = vtanh.f32 %v972_v1  ;;  %v1252_v4 = vpop.f32.mrb[5].mxu0  ;;  %v1300_v5 = vpop.f32.mrb[5].mxu1 }
 0x104   : > { %v1253_v6 = vadd.f32 %v1252_v4, %v1251_v2  ;;  %v1301_v7 = vadd.f32 %v1300_v5, %v1299_v3  ;;  %v1254_v8 = vpop.f32.mrb[6].mxu0  ;;  %v1302_v9 = vpop.f32.mrb[6].mxu1 }
 0x105   : > { %v1255_v10 = vpop.f32.mrb[7].mxu0  ;;  %v1303_v11 = vpop.f32.mrb[7].mxu1 }
 0x106   : > { %v957_v12 = vadd.f32 %v1253_v6, %v1650_v53  ;;  %v973_v13 = vadd.f32 %v1301_v7, %v1650_v53  ;;  %v1256_v15 = vadd.f32 %v1255_v10, %v1254_v8  ;;  %v1304_v16 = vadd.f32 %v1303_v11, %v1302_v9 }
 0x108   : > { %1406 = vtanh.f32 %v957_v12  ;;  %v958_v17 = vadd.f32 %v1256_v15, %v1650_v53  ;;  %v974_v18 = vadd.f32 %v1304_v16, %v1650_v53 }
 0x109   : > { %1408 = vtanh.f32 %v973_v13 }
 0x10a   : > { %v1399_v19 = vpop.eup %1398  ;;  %1410 = vtanh.f32 %v958_v17  ;;  %v1257_v20 = vpop.f32.mrb[8].mxu0 }
 0x10b   : > { %v1305_v21 = vpop.f32.mrb[8].mxu1  ;;  %v1401_v22 = vpop.eup %1400  ;;  %1019 = vst [vmem:[%s1663_s8] sm:$0xff] %v1399_v19  ;;  %1412 = vtanh.f32 %v974_v18 }
 0x10c   : > { %v1258_v23 = vpop.f32.mrb[9].mxu0  ;;  %v1306_v24 = vpop.f32.mrb[9].mxu1  ;;  %1035 = vst [vmem:[%s1663_s8 + $0x80] sm:$0xff] %v1401_v22 }
 0x10d   : > { %v1403_v25 = vpop.eup %1402  ;;  %v1259_v26 = vadd.f32 %v1258_v23, %v1257_v20  ;;  %v1307_v27 = vadd.f32 %v1306_v24, %v1305_v21  ;;  %v1260_v28 = vpop.f32.mrb[10].mxu0 }
 0x10e   : > { %v1308_v29 = vpop.f32.mrb[10].mxu1  ;;  %v1405_v30 = vpop.eup %1404  ;;  %1020 = vst [vmem:[%s1663_s8 + $0x8] sm:$0xff] %v1403_v25 }
 0x10f   : > { %v1261_v31 = vpop.f32.mrb[11].mxu0  ;;  %v1309_v32 = vpop.f32.mrb[11].mxu1  ;;  %1036 = vst [vmem:[%s1663_s8 + $0x88] sm:$0xff] %v1405_v30  ;;  %v959_v33 = vadd.f32 %v1259_v26, %v1650_v53  ;;  %v975_v34 = vadd.f32 %v1307_v27, %v1650_v53 }
 0x110   : > { %v1262_v35 = vadd.f32 %v1261_v31, %v1260_v28  ;;  %v1310_v36 = vadd.f32 %v1309_v32, %v1308_v29 }
 0x111   : > { %1414 = vtanh.f32 %v959_v33 }
 0x112   : > { %v960_v37 = vadd.f32 %v1262_v35, %v1650_v53  ;;  %v976_v38 = vadd.f32 %v1310_v36, %v1650_v53  ;;  %1416 = vtanh.f32 %v975_v34  ;;  %v1407_v39 = vpop.eup %1406  ;;  %v1263_v40 = vpop.f32.mrb[12].mxu0 }
 0x113   : > { %v1311_v41 = vpop.f32.mrb[12].mxu1  ;;  %v1409_v42 = vpop.eup %1408  ;;  %1021 = vst [vmem:[%s1663_s8 + $0x10] sm:$0xff] %v1407_v39 }
 0x114   : > { %1418 = vtanh.f32 %v960_v37  ;;  %v1264_v43 = vpop.f32.mrb[13].mxu0  ;;  %v1312_v44 = vpop.f32.mrb[13].mxu1  ;;  %1037 = vst [vmem:[%s1663_s8 + $0x90] sm:$0xff] %v1409_v42 }
 0x115   : > { %1420 = vtanh.f32 %v976_v38  ;;  %v1411_v45 = vpop.eup %1410  ;;  %v1265_v46 = vadd.f32 %v1264_v43, %v1263_v40  ;;  %v1313_v47 = vadd.f32 %v1312_v44, %v1311_v41  ;;  %v1266_v48 = vpop.f32.mrb[14].mxu0 }
 0x116   : > { %v1314_v49 = vpop.f32.mrb[14].mxu1  ;;  %v1413_v50 = vpop.eup %1412  ;;  %1022 = vst [vmem:[%s1663_s8 + $0x18] sm:$0xff] %v1411_v45 }
 0x117   : > { %v1267_v51 = vpop.f32.mrb[15].mxu0  ;;  %v1315_v52 = vpop.f32.mrb[15].mxu1  ;;  %1038 = vst [vmem:[%s1663_s8 + $0x98] sm:$0xff] %v1413_v50  ;;  %v961_v14 = vadd.f32 %v1265_v46, %v1650_v53  ;;  %v977_v54 = vadd.f32 %v1313_v47, %v1650_v53 }
 0x118   : > { %v1268_v55 = vadd.f32 %v1267_v51, %v1266_v48  ;;  %v1316_v56 = vadd.f32 %v1315_v52, %v1314_v49 }
 0x119   : > { %1422 = vtanh.f32 %v961_v14 }
 0x11a   : > { %v962_v57 = vadd.f32 %v1268_v55, %v1650_v53  ;;  %v978_v58 = vadd.f32 %v1316_v56, %v1650_v53  ;;  %1424 = vtanh.f32 %v977_v54  ;;  %v1269_v60 = vpop.f32.mrb[16].mxu0  ;;  %v1317_v61 = vpop.f32.mrb[16].mxu1 }
 0x11b   : > { %v1415_v59 = vpop.eup %1414  ;;  %v1270_v63 = vpop.f32.mrb[17].mxu0 }
 0x11c   : > { %1426 = vtanh.f32 %v962_v57  ;;  %v1417_v62 = vpop.eup %1416  ;;  %1023 = vst [vmem:[%s1663_s8 + $0x20] sm:$0xff] %v1415_v59  ;;  %v1318_v0 = vpop.f32.mrb[17].mxu1  ;;  %v1271_v2 = vadd.f32 %v1270_v63, %v1269_v60 }
 0x11d   : > { %1428 = vtanh.f32 %v978_v58  ;;  %1039 = vst [vmem:[%s1663_s8 + $0xa0] sm:$0xff] %v1417_v62  ;;  %v1319_v3 = vadd.f32 %v1318_v0, %v1317_v61  ;;  %v1272_v4 = vpop.f32.mrb[18].mxu0  ;;  %v1320_v5 = vpop.f32.mrb[18].mxu1 }
 0x11e   : > { %v1419_v1 = vpop.eup %1418  ;;  %v1273_v7 = vpop.f32.mrb[19].mxu0  ;;  %v963_v9 = vadd.f32 %v1271_v2, %v1650_v53 }
 0x11f   : > { %v1421_v6 = vpop.eup %1420  ;;  %1024 = vst [vmem:[%s1663_s8 + $0x28] sm:$0xff] %v1419_v1  ;;  %v1321_v8 = vpop.f32.mrb[19].mxu1  ;;  %v979_v10 = vadd.f32 %v1319_v3, %v1650_v53  ;;  %v1274_v11 = vadd.f32 %v1273_v7, %v1272_v4 }
 0x120   : > { %1040 = vst [vmem:[%s1663_s8 + $0xa8] sm:$0xff] %v1421_v6  ;;  %v1322_v12 = vadd.f32 %v1321_v8, %v1320_v5  ;;  %1430 = vtanh.f32 %v963_v9 }
 0x121   : > { %v964_v13 = vadd.f32 %v1274_v11, %v1650_v53  ;;  %1432 = vtanh.f32 %v979_v10 }
 0x122   : > { %v980_v15 = vadd.f32 %v1322_v12, %v1650_v53  ;;  %v1275_v17 = vpop.f32.mrb[20].mxu0  ;;  %v1323_v18 = vpop.f32.mrb[20].mxu1 }
 0x123   : > { %v1423_v16 = vpop.eup %1422  ;;  %1434 = vtanh.f32 %v964_v13  ;;  %v1276_v20 = vpop.f32.mrb[21].mxu0 }
 0x124   : > { %v1425_v19 = vpop.eup %1424  ;;  %1025 = vst [vmem:[%s1663_s8 + $0x30] sm:$0xff] %v1423_v16  ;;  %1436 = vtanh.f32 %v980_v15  ;;  %v1324_v21 = vpop.f32.mrb[21].mxu1  ;;  %v1277_v23 = vadd.f32 %v1276_v20, %v1275_v17 }
 0x125   : > { %1041 = vst [vmem:[%s1663_s8 + $0xb0] sm:$0xff] %v1425_v19  ;;  %v1325_v24 = vadd.f32 %v1324_v21, %v1323_v18  ;;  %v1278_v25 = vpop.f32.mrb[22].mxu0  ;;  %v1326_v26 = vpop.f32.mrb[22].mxu1 }
 0x126   : > { %v1427_v22 = vpop.eup %1426  ;;  %v1279_v28 = vpop.f32.mrb[23].mxu0  ;;  %v965_v30 = vadd.f32 %v1277_v23, %v1650_v53 }
 0x127   : > { %v1429_v27 = vpop.eup %1428  ;;  %1026 = vst [vmem:[%s1663_s8 + $0x38] sm:$0xff] %v1427_v22  ;;  %v1327_v29 = vpop.f32.mrb[23].mxu1  ;;  %v981_v31 = vadd.f32 %v1325_v24, %v1650_v53  ;;  %v1280_v32 = vadd.f32 %v1279_v28, %v1278_v25 }
 0x128   : > { %1042 = vst [vmem:[%s1663_s8 + $0xb8] sm:$0xff] %v1429_v27  ;;  %v1328_v33 = vadd.f32 %v1327_v29, %v1326_v26  ;;  %1438 = vtanh.f32 %v965_v30 }
 0x129   : > { %v966_v34 = vadd.f32 %v1280_v32, %v1650_v53  ;;  %1440 = vtanh.f32 %v981_v31 }
 0x12a   : > { %v982_v35 = vadd.f32 %v1328_v33, %v1650_v53  ;;  %v1431_v36 = vpop.eup %1430  ;;  %v1281_v37 = vpop.f32.mrb[24].mxu0 }
 0x12b   : > { %1442 = vtanh.f32 %v966_v34  ;;  %v1329_v38 = vpop.f32.mrb[24].mxu1  ;;  %v1433_v39 = vpop.eup %1432  ;;  %1027 = vst [vmem:[%s1663_s8 + $0x40] sm:$0xff] %v1431_v36 }
 0x12c   : > { %1444 = vtanh.f32 %v982_v35  ;;  %v1282_v40 = vpop.f32.mrb[25].mxu0  ;;  %v1330_v41 = vpop.f32.mrb[25].mxu1  ;;  %1043 = vst [vmem:[%s1663_s8 + $0xc0] sm:$0xff] %v1433_v39 }
 0x12d   : > { %v1435_v42 = vpop.eup %1434  ;;  %v1283_v43 = vadd.f32 %v1282_v40, %v1281_v37  ;;  %v1331_v44 = vadd.f32 %v1330_v41, %v1329_v38  ;;  %v1284_v45 = vpop.f32.mrb[26].mxu0 }
 0x12e   : > { %v1332_v46 = vpop.f32.mrb[26].mxu1  ;;  %v1437_v47 = vpop.eup %1436  ;;  %1028 = vst [vmem:[%s1663_s8 + $0x48] sm:$0xff] %v1435_v42 }
 0x12f   : > { %v1285_v48 = vpop.f32.mrb[27].mxu0  ;;  %v1333_v49 = vpop.f32.mrb[27].mxu1  ;;  %1044 = vst [vmem:[%s1663_s8 + $0xc8] sm:$0xff] %v1437_v47  ;;  %v967_v50 = vadd.f32 %v1283_v43, %v1650_v53  ;;  %v983_v51 = vadd.f32 %v1331_v44, %v1650_v53 }
 0x130   : > { %v1286_v52 = vadd.f32 %v1285_v48, %v1284_v45  ;;  %v1334_v14 = vadd.f32 %v1333_v49, %v1332_v46 }
 0x131   : > { %1446 = vtanh.f32 %v967_v50 }
 0x132   : > { %v968_v54 = vadd.f32 %v1286_v52, %v1650_v53  ;;  %v984_v55 = vadd.f32 %v1334_v14, %v1650_v53  ;;  %1448 = vtanh.f32 %v983_v51  ;;  %v1439_v56 = vpop.eup %1438  ;;  %v1287_v57 = vpop.f32.mrb[28].mxu0 }
 0x133   : > { %v1335_v58 = vpop.f32.mrb[28].mxu1  ;;  %v1441_v59 = vpop.eup %1440  ;;  %1029 = vst [vmem:[%s1663_s8 + $0x50] sm:$0xff] %v1439_v56 }
 0x134   : > { %1450 = vtanh.f32 %v968_v54  ;;  %v1288_v60 = vpop.f32.mrb[29].mxu0  ;;  %v1336_v61 = vpop.f32.mrb[29].mxu1  ;;  %1045 = vst [vmem:[%s1663_s8 + $0xd0] sm:$0xff] %v1441_v59 }
 0x135   : > { %1452 = vtanh.f32 %v984_v55  ;;  %v1443_v62 = vpop.eup %1442  ;;  %v1289_v63 = vadd.f32 %v1288_v60, %v1287_v57  ;;  %v1337_v0 = vadd.f32 %v1336_v61, %v1335_v58  ;;  %v1290_v1 = vpop.f32.mrb[30].mxu0 }
 0x136   : > { %v1338_v2 = vpop.f32.mrb[30].mxu1  ;;  %v1445_v3 = vpop.eup %1444  ;;  %1030 = vst [vmem:[%s1663_s8 + $0x58] sm:$0xff] %v1443_v62 }
 0x137   : > { %v1291_v4 = vpop.f32.mrb[31].mxu0  ;;  %v1339_v5 = vpop.f32.mrb[31].mxu1  ;;  %1046 = vst [vmem:[%s1663_s8 + $0xd8] sm:$0xff] %v1445_v3  ;;  %v969_v6 = vadd.f32 %v1289_v63, %v1650_v53  ;;  %v985_v7 = vadd.f32 %v1337_v0, %v1650_v53 }
 0x138   : > { %v1292_v8 = vadd.f32 %v1291_v4, %v1290_v1  ;;  %v1340_v9 = vadd.f32 %v1339_v5, %v1338_v2 }
 0x139   : > { %1454 = vtanh.f32 %v969_v6 }
 0x13a   : > { %v970_v10 = vadd.f32 %v1292_v8, %v1650_v53  ;;  %v986_v11 = vadd.f32 %v1340_v9, %v1650_v53  ;;  %1456 = vtanh.f32 %v985_v7 }
 0x13b   : > { %v1447_v12 = vpop.eup %1446 }
 0x13c   : > { %1458 = vtanh.f32 %v970_v10  ;;  %v1449_v13 = vpop.eup %1448  ;;  %1031 = vst [vmem:[%s1663_s8 + $0x60] sm:$0xff] %v1447_v12 }
 0x13d   : > { %1460 = vtanh.f32 %v986_v11  ;;  %1047 = vst [vmem:[%s1663_s8 + $0xe0] sm:$0xff] %v1449_v13 }
 0x13e   : > { %v1451_v15 = vpop.eup %1450 }
 0x13f   : > { %v1453_v16 = vpop.eup %1452  ;;  %1032 = vst [vmem:[%s1663_s8 + $0x68] sm:$0xff] %v1451_v15 }
 0x140   : > { %1048 = vst [vmem:[%s1663_s8 + $0xe8] sm:$0xff] %v1453_v16 }
 0x143   : > { %v1455_v17 = vpop.eup %1454 }
 0x144   : > { %v1457_v18 = vpop.eup %1456  ;;  %1033 = vst [vmem:[%s1663_s8 + $0x70] sm:$0xff] %v1455_v17 }
 0x145   : > { %1049 = vst [vmem:[%s1663_s8 + $0xf0] sm:$0xff] %v1457_v18 }
 0x146   : > { %v1459_v19 = vpop.eup %1458 }
 0x147   : > { %v1461_v53 = vpop.eup %1460  ;;  %1034 = vst [vmem:[%s1663_s8 + $0x78] sm:$0xff] %v1459_v19 }
 0x148   : > { %1050 = vst [vmem:[%s1663_s8 + $0xf8] sm:$0xff] %v1461_v53 }
 0x149 PF: > { %s13_s14 = sadd.s32 1, %s1484_s14   ;;  %s1736_s12 = smov %s1480_s13 }
 0x14a   : > { %p10_p5 = scmp.ge.s32.totalorder %s13_s14, 4   ;;  %s1737_s13 = smov %s1739_s15 }
 0x14c   :  { %12 = sbr.rel (!%p10_p5) target bundleno = 2 (0x2), region = 76 }

</bundles_post_ra>
